<compile_context>
chip_gen: v5e
topology: v5e:2x2
jax: 0.10.0
libtpu: 0.0.40
codegen_flags: <defaults>
</compile_context>

<pallas_src>
from functools import partial

import jax
import jax.numpy as jnp
from jax.experimental import pallas as pl
from jax.experimental.pallas import tpu as pltpu


def _round_up(x, m):
    return (x + m - 1) // m * m


def _resblock_kernel(x_ref, w1_ref, b1_ref, w2_ref, b2_ref, o_ref, a_ref, *,
                     K, Wa, La, Lo, pre, pad, RB, H, W, res_scale):
    """One (image, row-block) grid step.

    x_ref : (Lin, C)   f32  flattened input slab: row stride Wa, 2*pad zero rows
                            above/below, 2*pad zero cols on the left, `pre` zero
                            prefix, zero suffix (covers flat-wrapping tap reads).
    w*_ref: (K*K*C, C) bf16 im2col weight slab.
    b*_ref: (1, C)     f32  bias.
    o_ref : (Lo, C)         output on the flat grid t = r*Wa + c (cols >= W junk,
                            cropped by the wrapper).
    a_ref : (La, C)    bf16 conv1 activation scratch; fully rewritten every step.
    """
    p = pad

    # ---- conv1: single im2col matmul, contraction depth K*K*C ----------------
    taps1 = [x_ref[pl.ds(pre + ki * Wa + kj, La), :].astype(jnp.bfloat16)
             for ki in range(K) for kj in range(K)]
    patch1 = jnp.concatenate(taps1, axis=1)                     # (La, K*K*C) bf16
    h = jnp.dot(patch1, w1_ref[...], preferred_element_type=jnp.float32)
    h = jnp.maximum(h + b1_ref[...], 0.0)

    # Interior predicate (activation must be zero outside the image so the
    # scratch doubles as conv2's zero-padded input), computed in-kernel:
    #   flat position t -> row a_r = t // Wa, col a_c = t % Wa.
    # Valid rows are contiguous in t -> two integer threshold compares.
    # Column via exact f32 floor((t + 0.5) / Wa) (t << 2^22, so this is exact).
    ti = jax.lax.broadcasted_iota(jnp.int32, (La, 1), 0)
    r0 = p - pl.program_id(1) * RB                  # first image-interior act row
    row_ok = (ti >= r0 * Wa) & (ti < (r0 + H) * Wa)
    tf = ti.astype(jnp.float32)
    col = tf - jnp.floor((tf + 0.5) * (1.0 / Wa)) * Wa
    col_ok = (col >= p) & (col < p + W)
    a_ref[...] = jnp.where(row_ok & col_ok, h, 0.0).astype(jnp.bfloat16)

    # ---- conv2: single im2col matmul over the (zero-padded) activation -------
    taps2 = [a_ref[pl.ds(ki * Wa + kj, Lo), :] for ki in range(K) for kj in range(K)]
    patch2 = jnp.concatenate(taps2, axis=1)                     # (Lo, K*K*C) bf16
    res = jnp.dot(patch2, w2_ref[...], preferred_element_type=jnp.float32)
    res = res + b2_ref[...]
    if res_scale != 1.0:                  # statically skipped in the EDSR default
        res = res * res_scale

    # residual: image pixel of output position t sits at slab offset
    # pre + 2p*Wa + 2p + t;  `pre` is chosen so this base offset is 8-aligned.
    out = res + x_ref[pl.ds(pre + 2 * p * Wa + 2 * p, Lo), :]
    o_ref[...] = out.astype(o_ref.dtype)


def resblock_forward(x_nchw, w1, b1, w2, b2, res_scale=1.0, row_block=32):
    """x: (N, C, H, W);  w: (C_out, C_in, K, K) PyTorch OIHW;  b: (C,)."""
    N, C, H, W = x_nchw.shape
    K = w1.shape[-1]
    assert K % 2 == 1, "odd kernel size expected (EDSR default_conv)"
    p = K // 2

    RB = max(1, min(row_block, H))                 # output rows per grid step
    nb = pl.cdiv(H, RB)
    Hb = nb * RB
    Wa = _round_up(W + 2 * p, 8)                   # aligned padded row stride
    pre = (-2 * p) % 8                             # aligns the residual read
    La = _round_up((RB + 2 * p) * Wa + 2 * p, 8)   # activation flat length
    Lo = RB * Wa                                   # output flat length (mult of 8)
    Lin = _round_up(pre + La + 2 * p * Wa + 2 * p, 8)
    KKC = K * K * C

    # ---- wrapper-side glue: layout, halo slabs, weight slabs -----------------
    x_nhwc = jnp.transpose(x_nchw, (0, 2, 3, 1))
    xpad = jnp.pad(x_nhwc, ((0, 0), (2 * p, 2 * p + Hb - H),
                            (2 * p, Wa - W - 2 * p), (0, 0)))
    # per-row-block input slabs with a 2*pad-row halo on each side.
    slabs = jnp.stack([xpad[:, b * RB: b * RB + RB + 4 * p] for b in range(nb)],
                      axis=1)                                   # (N, nb, RB+4p, Wa, C)
    slabs = slabs.reshape(N, nb, (RB + 4 * p) * Wa, C)
    slabs = jnp.pad(slabs, ((0, 0), (0, 0),
                            (pre, Lin - pre - (RB + 4 * p) * Wa), (0, 0)))

    # OIHW -> (ki, kj, C_in, C_out) -> (K*K*C_in, C_out) bf16 im2col weight slab.
    w1s = jnp.transpose(w1, (2, 3, 1, 0)).reshape(KKC, C).astype(jnp.bfloat16)
    w2s = jnp.transpose(w2, (2, 3, 1, 0)).reshape(KKC, C).astype(jnp.bfloat16)
    b1r = b1.reshape(1, C).astype(jnp.float32)
    b2r = b2.reshape(1, C).astype(jnp.float32)

    kernel = partial(_resblock_kernel, K=K, Wa=Wa, La=La, Lo=Lo, pre=pre, pad=p,
                     RB=RB, H=H, W=W, res_scale=float(res_scale))

    out_flat = pl.pallas_call(
        kernel,
        out_shape=jax.ShapeDtypeStruct((N, nb, Lo, C), x_nchw.dtype),
        grid_spec=pltpu.PrefetchScalarGridSpec(
            num_scalar_prefetch=0,
            grid=(N, nb),
            in_specs=[
                pl.BlockSpec((None, None, Lin, C), lambda n, b: (n, b, 0, 0)),
                pl.BlockSpec((KKC, C), lambda n, b: (0, 0)),     # w1 slab (resident)
                pl.BlockSpec((1, C), lambda n, b: (0, 0)),       # b1
                pl.BlockSpec((KKC, C), lambda n, b: (0, 0)),     # w2 slab (resident)
                pl.BlockSpec((1, C), lambda n, b: (0, 0)),       # b2
            ],
            out_specs=pl.BlockSpec((None, None, Lo, C), lambda n, b: (n, b, 0, 0)),
            scratch_shapes=[pltpu.VMEM((La, C), jnp.bfloat16)],
        ),
        compiler_params=pltpu.CompilerParams(
            dimension_semantics=("parallel", "parallel"),
            vmem_limit_bytes=32 * 1024 * 1024,
        ),
    )(slabs, w1s, b1r, w2s, b2r)

    # crop junk rows (>= H) / columns (>= W) and go back to NCHW (glue only).
    out = out_flat.reshape(N, Hb, Wa, C)[:, :H, :W, :]
    return jnp.transpose(out, (0, 3, 1, 2))


def resblock_reference(x, w1, b1, w2, b2, res_scale=1.0):
    """Pure-JAX f32 reference in NCHW (matches PyTorch nn.Conv2d, padding=K//2)."""
    dn = jax.lax.conv_dimension_numbers(x.shape, w1.shape, ("NCHW", "OIHW", "NCHW"))
    h = jax.lax.conv_general_dilated(x, w1, (1, 1), "SAME", dimension_numbers=dn)
    h = jnp.maximum(h + b1[None, :, None, None], 0.0)
    h = jax.lax.conv_general_dilated(h, w2, (1, 1), "SAME", dimension_numbers=dn)
    h = h + b2[None, :, None, None]
    return h * res_scale + x


if __name__ == "__main__":
    # Small setup consistent with ResBlock(conv, n_feats=4, kernel_size=3).
    N, C, H, W, K = 2, 4, 16, 16, 3

    key = jax.random.PRNGKey(0)
    kx, kw1, kb1, kw2, kb2 = jax.random.split(key, 5)
    x = jax.random.normal(kx, (N, C, H, W), jnp.float32)
    w1 = jax.random.normal(kw1, (C, C, K, K), jnp.float32) * 0.1
    b1 = jax.random.normal(kb1, (C,), jnp.float32) * 0.1
    w2 = jax.random.normal(kw2, (C, C, K, K), jnp.float32) * 0.1
    b2 = jax.random.normal(kb2, (C,), jnp.float32) * 0.1

    # Two row blocks -> exercises the halo + in-kernel row-band masking path.
    out = jax.block_until_ready(
        resblock_forward(x, w1, b1, w2, b2, res_scale=1.0, row_block=8))
    ref = resblock_reference(x, w1, b1, w2, b2, 1.0)
    assert out.shape == ref.shape == (N, C, H, W)
    err = float(jnp.max(jnp.abs(out - ref)))
    # bf16 MXU operands with f32 accumulation -> bf16-level tolerance vs f32 ref.
    assert jnp.allclose(out, ref, atol=3e-2, rtol=3e-2), f"max abs err = {err}"

    # Single-block path + res_scale != 1 branch.
    out2 = jax.block_until_ready(
        resblock_forward(x, w1, b1, w2, b2, res_scale=0.1, row_block=16))
    ref2 = resblock_reference(x, w1, b1, w2, b2, 0.1)
    err2 = float(jnp.max(jnp.abs(out2 - ref2)))
    assert jnp.allclose(out2, ref2, atol=3e-2, rtol=3e-2), f"max abs err = {err2}"

    print("KERNEL_OK")
</pallas_src>

<mosaic_0001>
module attributes {stable_mosaic.version = 11 : i64} {
  func.func @_resblock_kernel(%arg0: i32, %arg1: i32, %arg2: memref<1x1x304x4xf32, #tpu.memory_space<vmem>>, %arg3: memref<36x4xbf16, #tpu.memory_space<vmem>>, %arg4: memref<1x4xf32, #tpu.memory_space<vmem>>, %arg5: memref<36x4xbf16, #tpu.memory_space<vmem>>, %arg6: memref<1x4xf32, #tpu.memory_space<vmem>>, %arg7: memref<1x1x192x4xf32, #tpu.memory_space<vmem>>, %arg8: memref<248x4xbf16, #tpu.memory_space<vmem>>) attributes {dimension_semantics = [#tpu.dimension_semantics<parallel>, #tpu.dimension_semantics<parallel>], iteration_bounds = array<i64: 2, 2>, scalar_prefetch = 0 : i64, scratch_operands = 1 : i64, tpu.core_type = #tpu.core_type<tc>, window_params = [{transform_indices = @transform_0, window_bounds = array<i64: 1, 1, 304, 4>}, {pipeline_mode = #tpu.pipeline_mode<synchronous>, transform_indices = @transform_1, window_bounds = array<i64: 36, 4>}, {pipeline_mode = #tpu.pipeline_mode<synchronous>, transform_indices = @transform_2, window_bounds = array<i64: 1, 4>}, {pipeline_mode = #tpu.pipeline_mode<synchronous>, transform_indices = @transform_3, window_bounds = array<i64: 36, 4>}, {pipeline_mode = #tpu.pipeline_mode<synchronous>, transform_indices = @transform_4, window_bounds = array<i64: 1, 4>}, {transform_indices = @transform_5, window_bounds = array<i64: 1, 1, 192, 4>}]} {
    %c0 = arith.constant 0 : index
    %c0_0 = arith.constant 0 : index
    %c6 = arith.constant 6 : index
    %c0_1 = arith.constant 0 : index
    %0 = vector.load %arg2[%c0, %c0_0, %c6, %c0_1] : memref<1x1x304x4xf32, #tpu.memory_space<vmem>>, vector<1x1x248x4xf32>
    %1 = vector.shape_cast %0 : vector<1x1x248x4xf32> to vector<248x4xf32>
    %2 = arith.truncf %1 : vector<248x4xf32> to vector<248x4xbf16>
    %c0_2 = arith.constant 0 : index
    %c0_3 = arith.constant 0 : index
    %c7 = arith.constant 7 : index
    %c0_4 = arith.constant 0 : index
    %3 = vector.load %arg2[%c0_2, %c0_3, %c7, %c0_4] : memref<1x1x304x4xf32, #tpu.memory_space<vmem>>, vector<1x1x248x4xf32>
    %4 = vector.shape_cast %3 : vector<1x1x248x4xf32> to vector<248x4xf32>
    %5 = arith.truncf %4 : vector<248x4xf32> to vector<248x4xbf16>
    %c0_5 = arith.constant 0 : index
    %c0_6 = arith.constant 0 : index
    %c8 = arith.constant 8 : index
    %c0_7 = arith.constant 0 : index
    %6 = vector.load %arg2[%c0_5, %c0_6, %c8, %c0_7] : memref<1x1x304x4xf32, #tpu.memory_space<vmem>>, vector<1x1x248x4xf32>
    %7 = vector.shape_cast %6 : vector<1x1x248x4xf32> to vector<248x4xf32>
    %8 = arith.truncf %7 : vector<248x4xf32> to vector<248x4xbf16>
    %c0_8 = arith.constant 0 : index
    %c0_9 = arith.constant 0 : index
    %c30 = arith.constant 30 : index
    %c0_10 = arith.constant 0 : index
    %9 = vector.load %arg2[%c0_8, %c0_9, %c30, %c0_10] : memref<1x1x304x4xf32, #tpu.memory_space<vmem>>, vector<1x1x248x4xf32>
    %10 = vector.shape_cast %9 : vector<1x1x248x4xf32> to vector<248x4xf32>
    %11 = arith.truncf %10 : vector<248x4xf32> to vector<248x4xbf16>
    %c0_11 = arith.constant 0 : index
    %c0_12 = arith.constant 0 : index
    %c31 = arith.constant 31 : index
    %c0_13 = arith.constant 0 : index
    %12 = vector.load %arg2[%c0_11, %c0_12, %c31, %c0_13] : memref<1x1x304x4xf32, #tpu.memory_space<vmem>>, vector<1x1x248x4xf32>
    %13 = vector.shape_cast %12 : vector<1x1x248x4xf32> to vector<248x4xf32>
    %14 = arith.truncf %13 : vector<248x4xf32> to vector<248x4xbf16>
    %c0_14 = arith.constant 0 : index
    %c0_15 = arith.constant 0 : index
    %c32 = arith.constant 32 : index
    %c0_16 = arith.constant 0 : index
    %15 = vector.load %arg2[%c0_14, %c0_15, %c32, %c0_16] : memref<1x1x304x4xf32, #tpu.memory_space<vmem>>, vector<1x1x248x4xf32>
    %16 = vector.shape_cast %15 : vector<1x1x248x4xf32> to vector<248x4xf32>
    %17 = arith.truncf %16 : vector<248x4xf32> to vector<248x4xbf16>
    %c0_17 = arith.constant 0 : index
    %c0_18 = arith.constant 0 : index
    %c54 = arith.constant 54 : index
    %c0_19 = arith.constant 0 : index
    %18 = vector.load %arg2[%c0_17, %c0_18, %c54, %c0_19] : memref<1x1x304x4xf32, #tpu.memory_space<vmem>>, vector<1x1x248x4xf32>
    %19 = vector.shape_cast %18 : vector<1x1x248x4xf32> to vector<248x4xf32>
    %20 = arith.truncf %19 : vector<248x4xf32> to vector<248x4xbf16>
    %c0_20 = arith.constant 0 : index
    %c0_21 = arith.constant 0 : index
    %c55 = arith.constant 55 : index
    %c0_22 = arith.constant 0 : index
    %21 = vector.load %arg2[%c0_20, %c0_21, %c55, %c0_22] : memref<1x1x304x4xf32, #tpu.memory_space<vmem>>, vector<1x1x248x4xf32>
    %22 = vector.shape_cast %21 : vector<1x1x248x4xf32> to vector<248x4xf32>
    %23 = arith.truncf %22 : vector<248x4xf32> to vector<248x4xbf16>
    %c0_23 = arith.constant 0 : index
    %c0_24 = arith.constant 0 : index
    %c56 = arith.constant 56 : index
    %c0_25 = arith.constant 0 : index
    %24 = vector.load %arg2[%c0_23, %c0_24, %c56, %c0_25] : memref<1x1x304x4xf32, #tpu.memory_space<vmem>>, vector<1x1x248x4xf32>
    %25 = vector.shape_cast %24 : vector<1x1x248x4xf32> to vector<248x4xf32>
    %26 = arith.truncf %25 : vector<248x4xf32> to vector<248x4xbf16>
    %27 = tpu.concatenate %2, %5, %8, %11, %14, %17, %20, %23, %26 in 1 : vector<248x4xbf16>, vector<248x4xbf16>, vector<248x4xbf16>, vector<248x4xbf16>, vector<248x4xbf16>, vector<248x4xbf16>, vector<248x4xbf16>, vector<248x4xbf16>, vector<248x4xbf16> -> vector<248x36xbf16>
    %c0_26 = arith.constant 0 : index
    %c0_27 = arith.constant 0 : index
    %28 = vector.load %arg3[%c0_26, %c0_27] : memref<36x4xbf16, #tpu.memory_space<vmem>>, vector<36x4xbf16>
    %cst = arith.constant dense<0.000000e+00> : vector<248x4xf32>
    %29 = tpu.matmul %27, %28, %cst {dimension_numbers = #tpu.dot_dimension_numbers<[1], [0], [0], [1], [0, 0, 1, 1], [], []>} : vector<248x36xbf16>, vector<36x4xbf16>, vector<248x4xf32> -> vector<248x4xf32>
    %c0_28 = arith.constant 0 : index
    %c0_29 = arith.constant 0 : index
    %30 = vector.load %arg4[%c0_28, %c0_29] : memref<1x4xf32, #tpu.memory_space<vmem>>, vector<1x4xf32>
    %31 = vector.broadcast %30 : vector<1x4xf32> to vector<248x4xf32>
    %32 = arith.addf %29, %31 : vector<248x4xf32>
    %cst_30 = arith.constant 0.000000e+00 : f32
    %33 = vector.broadcast %cst_30 : f32 to vector<248x4xf32>
    %34 = arith.maximumf %32, %33 : vector<248x4xf32>
    %35 = tpu.iota {dimensions = array<i32: 0>} : vector<248x1xi32>
    %c8_i32 = arith.constant 8 : i32
    %36 = arith.muli %arg1, %c8_i32 : i32
    %c1_i32 = arith.constant 1 : i32
    %37 = arith.subi %c1_i32, %36 : i32
    %c24_i32 = arith.constant 24 : i32
    %38 = arith.muli %37, %c24_i32 : i32
    %39 = vector.broadcast %38 : i32 to vector<248x1xi32>
    %40 = arith.cmpi sge, %35, %39 : vector<248x1xi32>
    %c16_i32 = arith.constant 16 : i32
    %41 = arith.addi %37, %c16_i32 : i32
    %c24_i32_31 = arith.constant 24 : i32
    %42 = arith.muli %41, %c24_i32_31 : i32
    %43 = vector.broadcast %42 : i32 to vector<248x1xi32>
    %44 = arith.cmpi slt, %35, %43 : vector<248x1xi32>
    %45 = arith.andi %40, %44 : vector<248x1xi1>
    %46 = arith.sitofp %35 : vector<248x1xi32> to vector<248x1xf32>
    %cst_32 = arith.constant 5.000000e-01 : f32
    %47 = vector.broadcast %cst_32 : f32 to vector<248x1xf32>
    %48 = arith.addf %46, %47 : vector<248x1xf32>
    %cst_33 = arith.constant 0.0416666679 : f32
    %49 = vector.broadcast %cst_33 : f32 to vector<248x1xf32>
    %50 = arith.mulf %48, %49 : vector<248x1xf32>
    %51 = math.floor %50 : vector<248x1xf32>
    %cst_34 = arith.constant 2.400000e+01 : f32
    %52 = vector.broadcast %cst_34 : f32 to vector<248x1xf32>
    %53 = arith.mulf %51, %52 : vector<248x1xf32>
    %54 = arith.subf %46, %53 : vector<248x1xf32>
    %cst_35 = arith.constant 1.000000e+00 : f32
    %55 = vector.broadcast %cst_35 : f32 to vector<248x1xf32>
    %56 = arith.cmpf oge, %54, %55 : vector<248x1xf32>
    %cst_36 = arith.constant 1.700000e+01 : f32
    %57 = vector.broadcast %cst_36 : f32 to vector<248x1xf32>
    %58 = arith.cmpf olt, %54, %57 : vector<248x1xf32>
    %59 = arith.andi %56, %58 : vector<248x1xi1>
    %60 = arith.andi %45, %59 : vector<248x1xi1>
    %cst_37 = arith.constant 0.000000e+00 : f32
    %61 = vector.shape_cast %60 : vector<248x1xi1> to vector<248x1xi1>
    %62 = vector.broadcast %61 : vector<248x1xi1> to vector<248x4xi1>
    %63 = vector.broadcast %cst_37 : f32 to vector<248x4xf32>
    %64 = arith.select %62, %34, %63 : vector<248x4xi1>, vector<248x4xf32>
    %65 = arith.truncf %64 : vector<248x4xf32> to vector<248x4xbf16>
    %c0_38 = arith.constant 0 : index
    %c0_39 = arith.constant 0 : index
    %66 = vector.load %arg8[%c0_38, %c0_39] : memref<248x4xbf16, #tpu.memory_space<vmem>>, vector<248x4xbf16>
    tpu.vector_store %arg8[%c0_38, %c0_39], %65 {strides = array<i32>} : memref<248x4xbf16, #tpu.memory_space<vmem>>, vector<248x4xbf16>,
    %c0_40 = arith.constant 0 : index
    %c0_41 = arith.constant 0 : index
    %67 = vector.load %arg8[%c0_40, %c0_41] : memref<248x4xbf16, #tpu.memory_space<vmem>>, vector<192x4xbf16>
    %c1 = arith.constant 1 : index
    %c0_42 = arith.constant 0 : index
    %68 = vector.load %arg8[%c1, %c0_42] : memref<248x4xbf16, #tpu.memory_space<vmem>>, vector<192x4xbf16>
    %c2 = arith.constant 2 : index
    %c0_43 = arith.constant 0 : index
    %69 = vector.load %arg8[%c2, %c0_43] : memref<248x4xbf16, #tpu.memory_space<vmem>>, vector<192x4xbf16>
    %c24 = arith.constant 24 : index
    %c0_44 = arith.constant 0 : index
    %70 = vector.load %arg8[%c24, %c0_44] : memref<248x4xbf16, #tpu.memory_space<vmem>>, vector<192x4xbf16>
    %c25 = arith.constant 25 : index
    %c0_45 = arith.constant 0 : index
    %71 = vector.load %arg8[%c25, %c0_45] : memref<248x4xbf16, #tpu.memory_space<vmem>>, vector<192x4xbf16>
    %c26 = arith.constant 26 : index
    %c0_46 = arith.constant 0 : index
    %72 = vector.load %arg8[%c26, %c0_46] : memref<248x4xbf16, #tpu.memory_space<vmem>>, vector<192x4xbf16>
    %c48 = arith.constant 48 : index
    %c0_47 = arith.constant 0 : index
    %73 = vector.load %arg8[%c48, %c0_47] : memref<248x4xbf16, #tpu.memory_space<vmem>>, vector<192x4xbf16>
    %c49 = arith.constant 49 : index
    %c0_48 = arith.constant 0 : index
    %74 = vector.load %arg8[%c49, %c0_48] : memref<248x4xbf16, #tpu.memory_space<vmem>>, vector<192x4xbf16>
    %c50 = arith.constant 50 : index
    %c0_49 = arith.constant 0 : index
    %75 = vector.load %arg8[%c50, %c0_49] : memref<248x4xbf16, #tpu.memory_space<vmem>>, vector<192x4xbf16>
    %76 = tpu.concatenate %67, %68, %69, %70, %71, %72, %73, %74, %75 in 1 : vector<192x4xbf16>, vector<192x4xbf16>, vector<192x4xbf16>, vector<192x4xbf16>, vector<192x4xbf16>, vector<192x4xbf16>, vector<192x4xbf16>, vector<192x4xbf16>, vector<192x4xbf16> -> vector<192x36xbf16>
    %c0_50 = arith.constant 0 : index
    %c0_51 = arith.constant 0 : index
    %77 = vector.load %arg5[%c0_50, %c0_51] : memref<36x4xbf16, #tpu.memory_space<vmem>>, vector<36x4xbf16>
    %cst_52 = arith.constant dense<0.000000e+00> : vector<192x4xf32>
    %78 = tpu.matmul %76, %77, %cst_52 {dimension_numbers = #tpu.dot_dimension_numbers<[1], [0], [0], [1], [0, 0, 1, 1], [], []>} : vector<192x36xbf16>, vector<36x4xbf16>, vector<192x4xf32> -> vector<192x4xf32>
    %c0_53 = arith.constant 0 : index
    %c0_54 = arith.constant 0 : index
    %79 = vector.load %arg6[%c0_53, %c0_54] : memref<1x4xf32, #tpu.memory_space<vmem>>, vector<1x4xf32>
    %80 = vector.broadcast %79 : vector<1x4xf32> to vector<192x4xf32>
    %81 = arith.addf %78, %80 : vector<192x4xf32>
    %c0_55 = arith.constant 0 : index
    %c0_56 = arith.constant 0 : index
    %c56_57 = arith.constant 56 : index
    %c0_58 = arith.constant 0 : index
    %82 = vector.load %arg2[%c0_55, %c0_56, %c56_57, %c0_58] : memref<1x1x304x4xf32, #tpu.memory_space<vmem>>, vector<1x1x192x4xf32>
    %83 = vector.shape_cast %82 : vector<1x1x192x4xf32> to vector<192x4xf32>
    %84 = arith.addf %81, %83 : vector<192x4xf32>
    %c0_59 = arith.constant 0 : index
    %c0_60 = arith.constant 0 : index
    %c0_61 = arith.constant 0 : index
    %c0_62 = arith.constant 0 : index
    %85 = vector.load %arg7[%c0_59, %c0_60, %c0_61, %c0_62] : memref<1x1x192x4xf32, #tpu.memory_space<vmem>>, vector<1x1x192x4xf32>
    %86 = vector.shape_cast %85 : vector<1x1x192x4xf32> to vector<192x4xf32>
    %87 = vector.shape_cast %84 : vector<192x4xf32> to vector<1x1x192x4xf32>
    tpu.vector_store %arg7[%c0_59, %c0_60, %c0_61, %c0_62], %87 {strides = array<i32>} : memref<1x1x192x4xf32, #tpu.memory_space<vmem>>, vector<1x1x192x4xf32>,
    return
  }
  func.func @transform_0(%arg0: i32, %arg1: i32) -> (i32, i32, i32, i32) {
    %c0_i32 = arith.constant 0 : i32
    %c0_i32_0 = arith.constant 0 : i32
    %c0_i32_1 = arith.constant 0 : i32
    return %arg0, %arg1, %c0_i32, %c0_i32_0 : i32, i32, i32, i32
  }
  func.func @transform_1(%arg0: i32, %arg1: i32) -> (i32, i32) {
    %c0_i32 = arith.constant 0 : i32
    %c0_i32_0 = arith.constant 0 : i32
    %c0_i32_1 = arith.constant 0 : i32
    return %c0_i32, %c0_i32_0 : i32, i32
  }
  func.func @transform_2(%arg0: i32, %arg1: i32) -> (i32, i32) {
    %c0_i32 = arith.constant 0 : i32
    %c0_i32_0 = arith.constant 0 : i32
    %c0_i32_1 = arith.constant 0 : i32
    return %c0_i32, %c0_i32_0 : i32, i32
  }
  func.func @transform_3(%arg0: i32, %arg1: i32) -> (i32, i32) {
    %c0_i32 = arith.constant 0 : i32
    %c0_i32_0 = arith.constant 0 : i32
    %c0_i32_1 = arith.constant 0 : i32
    return %c0_i32, %c0_i32_0 : i32, i32
  }
  func.func @transform_4(%arg0: i32, %arg1: i32) -> (i32, i32) {
    %c0_i32 = arith.constant 0 : i32
    %c0_i32_0 = arith.constant 0 : i32
    %c0_i32_1 = arith.constant 0 : i32
    return %c0_i32, %c0_i32_0 : i32, i32
  }
  func.func @transform_5(%arg0: i32, %arg1: i32) -> (i32, i32, i32, i32) {
    %c0_i32 = arith.constant 0 : i32
    %c0_i32_0 = arith.constant 0 : i32
    %c0_i32_1 = arith.constant 0 : i32
    return %arg0, %arg1, %c0_i32, %c0_i32_0 : i32, i32, i32, i32
  }
}

</mosaic_0001>

<bundles_post_ra>
// kernel: tpu_custom_call.1
= control target key start
LH: loop header
LB: loop body
LE: loop exit
PB: predicated region body
PF: predicated region fallthrough
CT: control target
= control target key end

     0   :  { %s3587_s18 = smov 0   ;;  %s3589_s19 = smov 0   ;;  %s6409_s0 = inlined_call_operand.vmem [shape: f32[2,2,304,4], index: 0, kind: input, shape index: {}]   ;;  %s6410_s1 = inlined_call_operand.vmem [shape: bf16[36,4], index: 1, kind: input, shape index: {}]   ;;  %s6411_s2 = inlined_call_operand.vmem [shape: f32[1,4], index: 2, kind: input, shape index: {}]   ;;  %s6412_s3 = inlined_call_operand.vmem [shape: bf16[36,4], index: 3, kind: input, shape index: {}]   ;;  %s6413_s4 = inlined_call_operand.vmem [shape: f32[1,4], index: 4, kind: input, shape index: {}]   ;;  %s6414_s5 = inlined_call_operand.vmem [shape: f32[2,2,192,4], index: 5, kind: output, shape index: {}]  }
   0x1   :  { %s3591_s20 = smov 0   ;;  %s3593_s21 = smov 0  }
   0x2   :  { %s3595_s22 = smov 0  }
   0x3 LB: > { %s24_s23 = sadd.s32 1, %s3539_s20  ;;  %s27_s24 = sadd.s32 1, %s3543_s21  ;;  %s3547_s22 = sphi %s3595_s22, %s15_s22   ;;  %s3543_s21 = sphi %s3593_s21, %s6884_s21   ;;  %s3539_s20 = sphi %s3591_s20, %s6883_s20   ;;  %s3535_s19 = sphi %s3589_s19, %s6882_s19   ;;  %s3531_s18 = sphi %s3587_s18, %s6881_s18  }
   0x4   : > { %p25_p0 = scmp.ge.s32.totalorder %s24_s23, 2  ;;  %p3235_p1 = scmp.ge.s32.totalorder %s3547_s22, 1 }
   0x5   : > { %p207_p2 = scmp.lt.s32.totalorder %s3547_s22, 5 }
   0x6   : > { %s6886_s23 = smov (%p25_p0, %s24_s23), 0  ;;  %s6888_s24 = smov (!%p25_p0, %s27_s24), %s3543_s21 }
   0x7   : > { %p208_p3 = pnand %p3235_p1, %p207_p2  ;;  %p29_p4 = scmp.ge.s32.totalorder %s6888_s24, 2 }
   0x9   : > { %s6890_s24 = smov (%p29_p4, %s6888_s24), 0  ;;  %211 = sbr.rel (%p208_p3) target bundleno = 1021 (0x3fd), region = 40 }
   0xe   : > { %p243_p5 = scmp.lt.s32.totalorder %s3535_s19, 1  ;;  %p245_p6 = scmp.lt.s32.totalorder %s3531_s18, 1  ;;  %vm6473_vm0 = vcmask 1041408   ;;  %vm6477_vm1 = vcmask 31744   ;;  %vm6475_vm2 = vcmask 97280   ;;  %vm6476_vm3 = vcmask 64512  }
   0xf   : > { %s3549_s8 = smov 4   ;;  %s3550_s9 = smov 8   ;;  %vm6474_vm4 = vcmask 130048   ;;  %vm1218_vm5 = vcmask 162816   ;;  %vm6481_vm6 = vcmask 195584   ;;  %vm6480_vm7 = vcmask 228352  }
  0x10   : > { %s6892_s19 = smov (!%p243_p5, %s3535_s19), 1  ;;  %s3551_s10 = smov 12   ;;  %vm6479_vm8 = vcmask 261120   ;;  %vm6478_vm9 = vcmask 293888  }
  0x11   : > { %s3623_s25 = scalar_select %p245_p6, %s3531_s18, 1 }
  0x12   : > { %s3446_s26 = smul.u32 76, %s6892_s19  ;;  %s3552_s11 = smov 24  }
  0x13   : > { %s3445_s27 = smul.u32 38, %s3623_s25  ;;  %s3553_s12 = smov 20  }
  0x14   : > { %s3554_s13 = smov 16   ;;  %s3555_s14 = smov 32  }
  0x15   : > { %s249_s28 = sadd.s32 %s3446_s26, %s3445_s27  ;;  %s3556_s15 = smov 28  }
  0x16   : > { %s3236_s29 = sshll.u32 %s249_s28, 3  ;;  %s3262_s30 = sshll.u32 %s3531_s18, 3 }
  0x17   : > { %s3630_s7 = scalar_lea.vmem %s6409_s0, %s3236_s29  ;;  %s1563_s6 = ssub.s32 1, %s3262_s30 }
  0x18   : > { %v332_v0 = vld [vmem:[%s3630_s7 + $0x47] sm:$0xff]  ;;  %v333_v1 = vld [vmem:[%s3630_s7 + $0x4f] sm:$0xff]  ;;  %v334_v12 = vld [vmem:[%s3630_s7 + $0x57] sm:$0xff]  ;;  %s1597_s16 = ssub.s32 17, %s3262_s30  ;;  %s1564_s17 = smul.u32 24, %s1563_s6 }
  0x19   : > { %v328_v2 = vld [vmem:[%s3630_s7 + $0x27] sm:$0xff]  ;;  %v363_v3 = vpack.c.bf16 %v332_v0, %v332_v0  ;;  %v364_v4 = vpack.c.bf16 %v333_v1, %v333_v1  ;;  %v329_v5 = vld [vmem:[%s3630_s7 + $0x2f] sm:$0xff]  ;;  %v335_v13 = vld [vmem:[%s3630_s7 + $0x5f] sm:$0xff]  ;;  %v365_v18 = vpack.c.bf16 %v334_v12, %v334_v12  ;;  %s1598_s18 = smul.u32 24, %s1597_s16 }
  0x1a   : > { %v359_v6 = vpack.c.bf16 %v328_v2, %v328_v2  ;;  %v324_v7 = vld [vmem:[%s3630_s7 + $0x7] sm:$0xff]  ;;  %v325_v8 = vld [vmem:[%s3630_s7 + $0xf] sm:$0xff]  ;;  %v360_v9 = vpack.c.bf16 %v329_v5, %v329_v5  ;;  %v330_v14 = vld [vmem:[%s3630_s7 + $0x37] sm:$0xff]  ;;  %v366_v24 = vpack.c.bf16 %v335_v13, %v335_v13 }
  0x1b   : > { %v355_v10 = vpack.c.bf16 %v324_v7, %v324_v7  ;;  %v356_v11 = vpack.c.bf16 %v325_v8, %v325_v8  ;;  %v3641_v15 = vunpack.c.l.b16 %v363_v3  ;;  %v3643_v16 = vunpack.c.l.b16 %v364_v4  ;;  %v331_v19 = vld [vmem:[%s3630_s7 + $0x3f] sm:$0xff]  ;;  %v326_v20 = vld [vmem:[%s3630_s7 + $0x17] sm:$0xff]  ;;  %v340_v35 = vld [vmem:[%s3630_s7 + $0x87] sm:$0xff] }
  0x1c   : > { %v3645_v17 = vunpack.c.l.b16 %v359_v6  ;;  %v3649_v21 = vunpack.c.l.b16 %v360_v9  ;;  %v327_v25 = vld [vmem:[%s3630_s7 + $0x1f] sm:$0xff]  ;;  %v361_v27 = vpack.c.bf16 %v330_v14, %v330_v14  ;;  %v362_v28 = vpack.c.bf16 %v331_v19, %v331_v19  ;;  %v341_v36 = vld [vmem:[%s3630_s7 + $0x8f] sm:$0xff]  ;;  %v338_v40 = vld [vmem:[%s3630_s7 + $0x77] sm:$0xff] }
  0x1d   : > { %v593_v22 = vunpack.c.l.b16 %v355_v10  ;;  %v594_v23 = vunpack.c.l.b16 %v356_v11  ;;  %v3654_v26 = vpack.c.b16 %v3643_v16, %v3641_v15  ;;  %v357_v31 = vpack.c.bf16 %v326_v20, %v326_v20  ;;  %v339_v41 = vld [vmem:[%s3630_s7 + $0x7f] sm:$0xff]  ;;  %v336_v43 = vld [vmem:[%s3630_s7 + $0x67] sm:$0xff]  ;;  %v337_v44 = vld [vmem:[%s3630_s7 + $0x6f] sm:$0xff] }
  0x1e   : > { %v626_v29 = vpack.c.b16 %v3649_v21, %v3645_v17  ;;  %v3660_v32 = vunpack.c.l.b16 %v365_v18  ;;  %v3662_v33 = vunpack.c.l.b16 %v366_v24  ;;  %v358_v34 = vpack.c.bf16 %v327_v25, %v327_v25  ;;  %v346_v58 = vld [vmem:[%s3630_s7 + $0xb7] sm:$0xff]  ;;  %v347_v61 = vld [vmem:[%s3630_s7 + $0xbf] sm:$0xff]  ;;  %v344_v62 = vld [vmem:[%s3630_s7 + $0xa7] sm:$0xff] }
  0x1f   : > { %v624_v30 = vpack.c.b16 %v594_v23, %v593_v22  ;;  %648 = vrot.lane.b32.xlu2 %v3654_v26, %s3549_s8  ;;  %v3668_v37 = vunpack.c.l.b16 %v361_v27  ;;  %v3670_v38 = vunpack.c.l.b16 %v362_v28  ;;  %v595_v39 = vunpack.c.l.b16 %v357_v31  ;;  %v345_v63 = vld [vmem:[%s3630_s7 + $0xaf] sm:$0xff]  ;;  %v342_v0 = vld [vmem:[%s3630_s7 + $0x97] sm:$0xff]  ;;  %v343_v1 = vld [vmem:[%s3630_s7 + $0x9f] sm:$0xff] }
  0x20   : > { %6482 = vst [vmem:[#allocation3_spill] sm:$0xff] %v3662_v33  ;;  %644 = vrot.lane.b32.xlu1 %v626_v29, %s3549_s8  ;;  %v3674_v42 = vunpack.c.l.b16 %v358_v34  ;;  %v371_v45 = vpack.c.bf16 %v340_v35, %v340_v35  ;;  %v3680_v46 = vpack.c.b16 %v3662_v33, %v3660_v32  ;;  %v372_v47 = vpack.c.bf16 %v341_v36, %v341_v36  ;;  %v352_v13 = vld [vmem:[%s3630_s7 + $0xe7] sm:$0xff]  ;;  %v353_v14 = vld [vmem:[%s3630_s7 + $0xef] sm:$0xff]  ;;  %v350_v23 = vld [vmem:[%s3630_s7 + $0xd7] sm:$0xff] }
  0x21   : > { %640 = vrot.lane.b32.xlu0 %v624_v30, %s3549_s8  ;;  %v369_v48 = vpack.c.bf16 %v338_v40, %v338_v40  ;;  %v370_v49 = vpack.c.bf16 %v339_v41, %v339_v41  ;;  %v3684_v50 = vpack.c.b16 %v3670_v38, %v3668_v37  ;;  %v367_v52 = vpack.c.bf16 %v336_v43, %v336_v43  ;;  %v351_v24 = vld [vmem:[%s3630_s7 + $0xdf] sm:$0xff]  ;;  %v348_v25 = vld [vmem:[%s3630_s7 + $0xc7] sm:$0xff]  ;;  %v349_v27 = vld [vmem:[%s3630_s7 + $0xcf] sm:$0xff] }
  0x22   : > { %v625_v51 = vpack.c.b16 %v3674_v42, %v595_v39  ;;  %v368_v53 = vpack.c.bf16 %v337_v44, %v337_v44  ;;  %v3689_v54 = vunpack.c.l.b16 %v371_v45  ;;  %v3691_v55 = vunpack.c.l.b16 %v372_v47  ;;  %v388_v44 = vld [vmem:[%s3630_s7 + $0x18] sm:$0xff]  ;;  %v389_v45 = vld [vmem:[%s3630_s7 + $0x20] sm:$0xff] }
  0x23   : > { %v3693_v56 = vunpack.c.l.b16 %v369_v48  ;;  %v3695_v57 = vunpack.c.l.b16 %v370_v49  ;;  %v3701_v59 = vunpack.c.l.b16 %v367_v52  ;;  %v377_v2 = vpack.c.bf16 %v346_v58, %v346_v58  ;;  %v386_v52 = vld [vmem:[%s3630_s7 + $0x8] sm:$0xff]  ;;  %v354_v58 = vld [vmem:[%s3630_s7 + $0xf7] sm:$0xff] }
  0x24   : > { %6483 = vst [vmem:[#allocation4_spill] sm:$0xff] %v3689_v54  ;;  %v3703_v60 = vunpack.c.l.b16 %v368_v53  ;;  %v3712_v3 = vpack.c.b16 %v3691_v55, %v3689_v54  ;;  %v378_v5 = vpack.c.bf16 %v347_v61, %v347_v61  ;;  %v375_v6 = vpack.c.bf16 %v344_v62, %v344_v62  ;;  %v387_v53 = vld [vmem:[%s3630_s7 + $0x10] sm:$0xff]  ;;  %v413_v54 = vld [vmem:[%s3630_s7 + $0xe0] sm:$0xff] }
  0x25   : > { %6484 = vst [vmem:[#allocation5_spill] sm:$0xff] %v3693_v56  ;;  %v3716_v4 = vpack.c.b16 %v3695_v57, %v3693_v56  ;;  %v376_v8 = vpack.c.bf16 %v345_v63, %v345_v63  ;;  %v373_v9 = vpack.c.bf16 %v342_v0, %v342_v0  ;;  %v374_v10 = vpack.c.bf16 %v343_v1, %v343_v1 }
  0x26   : > { %6485 = vst [vmem:[#allocation6_spill] sm:$0xff] %v3695_v57  ;;  %v3720_v7 = vpack.c.b16 %v3703_v60, %v3701_v59  ;;  %v3724_v11 = vunpack.c.l.b16 %v377_v2  ;;  %v3726_v12 = vunpack.c.l.b16 %v378_v5  ;;  %v3734_v18 = vunpack.c.l.b16 %v375_v6  ;;  %v410_v57 = vld [vmem:[%s3630_s7 + $0xc8] sm:$0xff] }
  0x27   : > { %650 = vrot.lane.b32.xlu2 %v3680_v46, %s3549_s8  ;;  %6486 = vst [vmem:[#allocation7_spill] sm:$0xff] %v3701_v59  ;;  %v3736_v19 = vunpack.c.l.b16 %v376_v8  ;;  %v3738_v20 = vunpack.c.l.b16 %v373_v9  ;;  %v3740_v22 = vunpack.c.l.b16 %v374_v10  ;;  %v383_v28 = vpack.c.bf16 %v352_v13, %v352_v13  ;;  %v265_v59 = vld [vmem:[%s3630_s7 + $0x1e] sm:$0xff] }
  0x28   : > { %646 = vrot.lane.b32.xlu1 %v3684_v50, %s3549_s8  ;;  %6487 = vst [vmem:[#allocation8_spill] sm:$0xff] %v3703_v60  ;;  %v384_v29 = vpack.c.bf16 %v353_v14, %v353_v14  ;;  %v3748_v30 = vpack.c.b16 %v3726_v12, %v3724_v11  ;;  %v381_v31 = vpack.c.bf16 %v350_v23, %v350_v23  ;;  %v394_v14 = vld [vmem:[%s3630_s7 + $0x48] sm:$0xff] }
  0x29   : > { %642 = vrot.lane.b32.xlu0 %v625_v51, %s3549_s8  ;;  %6488 = vst [vmem:[#allocation9_spill] sm:$0xff] %v3712_v3  ;;  %v382_v34 = vpack.c.bf16 %v351_v24, %v351_v24  ;;  %v3752_v35 = vpack.c.b16 %v3736_v19, %v3734_v18  ;;  %v3756_v36 = vpack.c.b16 %v3740_v22, %v3738_v20  ;;  %v3758_v41 = vunpack.c.l.b16 %v383_v28  ;;  %v395_v24 = vld [vmem:[%s3630_s7 + $0x50] sm:$0xff]  ;;  %v390_v28 = vld [vmem:[%s3630_s7 + $0x28] sm:$0xff] }
  0x2a   : > { %6489 = vst [vmem:[#allocation10_spill] sm:$0xff] %v3716_v4  ;;  %v379_v39 = vpack.c.bf16 %v348_v25, %v348_v25  ;;  %v380_v40 = vpack.c.bf16 %v349_v27, %v349_v27  ;;  %v3760_v43 = vunpack.c.l.b16 %v384_v29  ;;  %v3770_v47 = vunpack.c.l.b16 %v381_v31  ;;  %v392_v25 = vld [vmem:[%s3630_s7 + $0x38] sm:$0xff]  ;;  %v393_v27 = vld [vmem:[%s3630_s7 + $0x40] sm:$0xff]  ;;  %v391_v29 = vld [vmem:[%s3630_s7 + $0x30] sm:$0xff] }
  0x2b   : > { %6490 = vst [vmem:[#allocation11_spill] sm:$0xff] %v3720_v7  ;;  %v3772_v48 = vunpack.c.l.b16 %v382_v34  ;;  %v419_v62 = vpack.c.bf16 %v388_v44, %v388_v44  ;;  %v420_v63 = vpack.c.bf16 %v389_v45, %v389_v45  ;;  %v417_v0 = vpack.c.bf16 %v386_v52, %v386_v52 }
  0x2c   : > { %6491 = vst [vmem:[#allocation12_spill] sm:$0xff] %v3724_v11  ;;  %v3774_v49 = vunpack.c.l.b16 %v379_v39  ;;  %v3776_v51 = vunpack.c.l.b16 %v380_v40  ;;  %v3783_v61 = vpack.c.b16 %v3760_v43, %v3758_v41  ;;  %v418_v1 = vpack.c.bf16 %v387_v53, %v387_v53 }
  0x2d   : > { %6492 = vst [vmem:[#allocation13_spill] sm:$0xff] %v3726_v12  ;;  %v3787_v2 = vpack.c.b16 %v3772_v48, %v3770_v47  ;;  %v385_v6 = vpack.c.bf16 %v354_v58, %v354_v58  ;;  %v705_v8 = vunpack.c.l.b16 %v419_v62  ;;  %v3795_v9 = vunpack.c.l.b16 %v420_v63  ;;  %v414_v12 = vld [vmem:[%s3630_s7 + $0xe8] sm:$0xff] }
  0x2e   : > { %6493 = vst [vmem:[#allocation14_spill] sm:$0xff] %v3736_v19  ;;  %v3791_v5 = vpack.c.b16 %v3776_v51, %v3774_v49  ;;  %v703_v10 = vunpack.c.l.b16 %v417_v0  ;;  %v704_v13 = vunpack.c.l.b16 %v418_v1  ;;  %v425_v31 = vpack.c.bf16 %v394_v14, %v394_v14  ;;  %v400_v0 = vld [vmem:[%s3630_s7 + $0x78] sm:$0xff]  ;;  %v401_v1 = vld [vmem:[%s3630_s7 + $0x80] sm:$0xff]  ;;  %v398_v14 = vld [vmem:[%s3630_s7 + $0x68] sm:$0xff] }
  0x2f   : > { %656 = vrot.lane.b32.xlu2 %v3712_v3, %s3549_s8  ;;  %6494 = vst [vmem:[#allocation15_spill] sm:$0xff] %v3748_v30  ;;  %v3802_v23 = vunpack.c.l.b16 %v385_v6  ;;  %v735_v34 = vpack.c.b16 %v3795_v9, %v705_v8  ;;  %v426_v40 = vpack.c.bf16 %v395_v24, %v395_v24  ;;  %v423_v44 = vpack.c.bf16 %v392_v25, %v392_v25  ;;  %v399_v24 = vld [vmem:[%s3630_s7 + $0x70] sm:$0xff]  ;;  %v396_v25 = vld [vmem:[%s3630_s7 + $0x58] sm:$0xff] }
  0x30   : > { %654 = vrot.lane.b32.xlu1 %v3716_v4, %s3549_s8  ;;  %6495 = vst [vmem:[#allocation16_spill] sm:$0xff] %v3756_v36  ;;  %v734_v39 = vpack.c.b16 %v704_v13, %v703_v10  ;;  %v424_v52 = vpack.c.bf16 %v393_v27, %v393_v27  ;;  %v421_v53 = vpack.c.bf16 %v390_v28, %v390_v28  ;;  %v3813_v62 = vunpack.c.l.b16 %v425_v31  ;;  %v397_v27 = vld [vmem:[%s3630_s7 + $0x60] sm:$0xff]  ;;  %v408_v3 = vld [vmem:[%s3630_s7 + $0xb8] sm:$0xff] }
  0x31   : > { %652 = vrot.lane.b32.xlu0 %v3720_v7, %s3549_s8  ;;  %6496 = vst [vmem:[#allocation17_spill] sm:$0xff] %v3758_v41  ;;  %v639_v45 = vpack.c.b16 %v3802_v23, %v3802_v23  ;;  %v422_v58 = vpack.c.bf16 %v391_v29, %v391_v29  ;;  %v3815_v63 = vunpack.c.l.b16 %v426_v40  ;;  %v3821_v6 = vunpack.c.l.b16 %v423_v44 }
  0x32   : > { %6497 = vst [vmem:[#allocation18_spill] sm:$0xff] %v3760_v43  ;;  %v3823_v8 = vunpack.c.l.b16 %v424_v52  ;;  %v3825_v10 = vunpack.c.l.b16 %v421_v53  ;;  %v431_v28 = vpack.c.bf16 %v400_v0, %v400_v0  ;;  %v432_v29 = vpack.c.bf16 %v401_v1, %v401_v1  ;;  %v406_v0 = vld [vmem:[%s3630_s7 + $0xa8] sm:$0xff]  ;;  %v407_v1 = vld [vmem:[%s3630_s7 + $0xb0] sm:$0xff] }
  0x33   : > { %6498 = vst [vmem:[#allocation19_spill] sm:$0xff] %v3770_v47  ;;  %v3827_v13 = vunpack.c.l.b16 %v422_v58  ;;  %v3835_v31 = vpack.c.b16 %v3815_v63, %v3813_v62  ;;  %v428_v52 = vpack.c.bf16 %v397_v27, %v397_v27  ;;  %v444_v47 = vpack.c.bf16 %v413_v54, %v413_v54  ;;  %v416_v54 = vld [vmem:[%s3630_s7 + $0xf8] sm:$0xff] }
  0x34   : > { %6499 = vst [vmem:[#allocation20_spill] sm:$0xff] %v3772_v48  ;;  %v3839_v40 = vpack.c.b16 %v3823_v8, %v3821_v6  ;;  %v3843_v53 = vunpack.c.l.b16 %v431_v28  ;;  %v3845_v58 = vunpack.c.l.b16 %v432_v29  ;;  %v402_v29 = vld [vmem:[%s3630_s7 + $0x88] sm:$0xff]  ;;  %v437_v48 = vpack.c.bf16 %v406_v0, %v406_v0 }
  0x35   : > { %6500 = vst [vmem:[#allocation21_spill] sm:$0xff] %v3774_v49  ;;  %v736_v44 = vpack.c.b16 %v3827_v13, %v3825_v10  ;;  %v3862_v28 = vunpack.c.l.b16 %v428_v52  ;;  %v439_v4 = vpack.c.bf16 %v408_v3, %v408_v3 }
  0x36   : > { %6501 = vst [vmem:[#allocation22_spill] sm:$0xff] %v3776_v51  ;;  %v3868_v41 = vpack.c.b16 %v3845_v58, %v3843_v53  ;;  %v3878_v0 = vunpack.c.l.b16 %v437_v48  ;;  %v272_v48 = vld [vmem:[%s3630_s7 + $0x56] sm:$0xff] }
  0x37   : > { %662 = vrot.lane.b32.xlu2 %v3748_v30, %s3549_s8  ;;  %6502 = vst [vmem:[#allocation23_spill] sm:$0xff] %v3783_v61  ;;  %v303_v60 = vpack.c.bf16 %v272_v48, %v272_v48 }
  0x38   : > { %660 = vrot.lane.b32.xlu1 %v3752_v35, %s3549_s8  ;;  %6503 = vst [vmem:[#allocation24_spill] sm:$0xff] %v3787_v2 }
  0x39   : > { %658 = vrot.lane.b32.xlu0 %v3756_v36, %s3549_s8  ;;  %6504 = vst [vmem:[#allocation25_spill] sm:$0xff] %v3791_v5  ;;  %v438_v36 = vpack.c.bf16 %v407_v1, %v407_v1  ;;  %v3926_v48 = vunpack.c.l.b16 %v303_v60 }
  0x3a   : > { %6505 = vst [vmem:[#allocation26_spill] sm:$0xff] %v3802_v23  ;;  %v403_v23 = vld [vmem:[%s3630_s7 + $0x90] sm:$0xff] }
  0x3b   : > { %6506 = vst [vmem:[#allocation27_spill] sm:$0xff] %v3815_v63  ;;  %v3880_v1 = vunpack.c.l.b16 %v438_v36  ;;  %v411_v36 = vld [vmem:[%s3630_s7 + $0xd0] sm:$0xff] }
  0x3c   : > { %6507 = vst [vmem:[#allocation28_spill] sm:$0xff] %v3843_v53 }
  0x3d   : > { %6508 = vst [vmem:[#allocation29_spill] sm:$0xff] %v3845_v58  ;;  %v412_v58 = vld [vmem:[%s3630_s7 + $0xd8] sm:$0xff] }
  0x3e   : > { %6512 = vst [vmem:[#allocation33_spill] sm:$0xff] %v3862_v28 }
  0x3f   : > { %668 = vrot.lane.b32.xlu2 %v3783_v61, %s3549_s8  ;;  %6513 = vst [vmem:[#allocation34_spill] sm:$0xff] %v3868_v41  ;;  %v433_v61 = vpack.c.bf16 %v402_v29, %v402_v29 }
  0x40   : > { %666 = vrot.lane.b32.xlu1 %v3787_v2, %s3549_s8  ;;  %6515 = vst [vmem:[#allocation36_spill] sm:$0xff] %v3880_v1  ;;  %v442_v2 = vpack.c.bf16 %v411_v36, %v411_v36  ;;  %v3938_v36 = vunpack.c.l.b16 %v439_v4  ;;  %v296_v4 = vpack.c.bf16 %v265_v59, %v265_v59 }
  0x41   : > { %664 = vrot.lane.b32.xlu0 %v3791_v5, %s3549_s8 }
  0x42   : > { %6523 = vst [vmem:[#allocation44_spill] sm:$0xff] %v3938_v36 }
  0x47   : > { %752 = vrot.lane.b32.xlu2 %v735_v34, %s3550_s9  ;;  %v429_v34 = vpack.c.bf16 %v398_v14, %v398_v14  ;;  %v404_v14 = vld [vmem:[%s3630_s7 + $0x98] sm:$0xff] }
  0x48   : > { %750 = vrot.lane.b32.xlu1 %v734_v39, %s3550_s9  ;;  %v430_v39 = vpack.c.bf16 %v399_v24, %v399_v24  ;;  %v405_v24 = vld [vmem:[%s3630_s7 + $0xa0] sm:$0xff] }
  0x49   : > { %670 = vrot.lane.b32.xlu0 %v639_v45, %s3549_s8  ;;  %v427_v45 = vpack.c.bf16 %v396_v25, %v396_v25  ;;  %v3856_v43 = vunpack.c.l.b16 %v429_v34  ;;  %v436_v34 = vpack.c.bf16 %v405_v24, %v405_v24  ;;  %v3888_v24 = vunpack.c.l.b16 %v433_v61 }
  0x4a   : > { %v3858_v25 = vunpack.c.l.b16 %v430_v39  ;;  %v434_v39 = vpack.c.bf16 %v403_v23, %v403_v23  ;;  %v3906_v61 = vpack.c.b16 %v3880_v1, %v3878_v0 }
  0x4b   : > { %6509 = vst [vmem:[#allocation30_spill] sm:$0xff] %v3856_v43  ;;  %v3860_v27 = vunpack.c.l.b16 %v427_v45 }
  0x4c   : > { %6510 = vst [vmem:[#allocation31_spill] sm:$0xff] %v3858_v25  ;;  %v3872_v45 = vpack.c.b16 %v3858_v25, %v3856_v43  ;;  %v3890_v29 = vunpack.c.l.b16 %v434_v39  ;;  %v443_v39 = vpack.c.bf16 %v412_v58, %v412_v58  ;;  %v441_v25 = vpack.c.bf16 %v410_v57, %v410_v57 }
  0x4d   : > { %6511 = vst [vmem:[#allocation32_spill] sm:$0xff] %v3860_v27  ;;  %v3876_v52 = vpack.c.b16 %v3862_v28, %v3860_v27  ;;  %v3918_v58 = vunpack.c.l.b16 %v444_v47  ;;  %v3936_v47 = vunpack.c.l.b16 %v442_v2  ;;  %v445_v2 = vpack.c.bf16 %v414_v12, %v414_v12  ;;  %v291_v27 = vld [vmem:[%s3630_s7 + $0xee] sm:$0xff] }
  0x4e   : > { %6514 = vst [vmem:[#allocation35_spill] sm:$0xff] %v3872_v45  ;;  %v3914_v56 = vpack.c.b16 %v3890_v29, %v3888_v24  ;;  %v3916_v49 = vunpack.c.l.b16 %v443_v39  ;;  %v3934_v3 = vunpack.c.l.b16 %v441_v25  ;;  %v278_v39 = vld [vmem:[%s3630_s7 + $0x86] sm:$0xff]  ;;  %v447_v25 = vpack.c.bf16 %v416_v54, %v416_v54 }
  0x4f   : > { %758 = vrot.lane.b32.xlu2 %v3835_v31, %s3550_s9  ;;  %6516 = vst [vmem:[#allocation37_spill] sm:$0xff] %v3888_v24  ;;  %v415_v24 = vld [vmem:[%s3630_s7 + $0xf0] sm:$0xff]  ;;  %v3963_v12 = vunpack.c.l.b16 %v445_v2  ;;  %v322_v63 = vpack.c.bf16 %v291_v27, %v291_v27 }
  0x50   : > { %756 = vrot.lane.b32.xlu1 %v3839_v40, %s3550_s9  ;;  %6518 = vst [vmem:[#allocation39_spill] sm:$0xff] %v3914_v56  ;;  %v3955_v28 = vpack.c.b16 %v3936_v47, %v3934_v3  ;;  %v3961_v54 = vunpack.c.l.b16 %v447_v25  ;;  %v284_v25 = vld [vmem:[%s3630_s7 + $0xb6] sm:$0xff]  ;;  %v267_v2 = vld [vmem:[%s3630_s7 + $0x2e] sm:$0xff] }
  0x51   : > { %754 = vrot.lane.b32.xlu0 %v736_v44, %s3550_s9  ;;  %v435_v44 = vpack.c.bf16 %v404_v14, %v404_v14  ;;  %v3886_v14 = vunpack.c.l.b16 %v436_v34  ;;  %v273_v34 = vld [vmem:[%s3630_s7 + $0x5e] sm:$0xff]  ;;  %6519 = vst [vmem:[#allocation40_spill] sm:$0xff] %v3916_v49  ;;  %v315_v5 = vpack.c.bf16 %v284_v25, %v284_v25  ;;  %v298_v19 = vpack.c.bf16 %v267_v2, %v267_v2 }
  0x52   : > { %v304_v53 = vpack.c.bf16 %v273_v34, %v273_v34  ;;  %6520 = vst [vmem:[#allocation41_spill] sm:$0xff] %v3918_v58  ;;  %v266_v34 = vld [vmem:[%s3630_s7 + $0x26] sm:$0xff] }
  0x53   : > { %v3884_v23 = vunpack.c.l.b16 %v435_v44  ;;  %v409_v44 = vld [vmem:[%s3630_s7 + $0xc0] sm:$0xff]  ;;  %6521 = vst [vmem:[#allocation42_spill] sm:$0xff] %v3934_v3  ;;  %v297_v33 = vpack.c.bf16 %v266_v34, %v266_v34 }
  0x54   : > { %v3928_v57 = vunpack.c.l.b16 %v304_v53  ;;  %6522 = vst [vmem:[#allocation43_spill] sm:$0xff] %v3936_v47  ;;  %v279_v53 = vld [vmem:[%s3630_s7 + $0x8e] sm:$0xff] }
  0x55   : > { %v3910_v51 = vpack.c.b16 %v3886_v14, %v3884_v23  ;;  %v310_v43 = vpack.c.bf16 %v279_v53, %v279_v53  ;;  %6526 = vst [vmem:[#allocation47_spill] sm:$0xff] %v3955_v28  ;;  %v3971_v34 = vunpack.c.l.b16 %v297_v33  ;;  %v270_v53 = vld [vmem:[%s3630_s7 + $0x46] sm:$0xff] }
  0x56   : > { %v3946_v60 = vpack.c.b16 %v3928_v57, %v3926_v48  ;;  %6527 = vst [vmem:[#allocation48_spill] sm:$0xff] %v3961_v54  ;;  %v301_v11 = vpack.c.bf16 %v270_v53, %v270_v53  ;;  %v4016_v53 = vunpack.c.l.b16 %v298_v19 }
  0x57   : > { %764 = vrot.lane.b32.xlu2 %v3868_v41, %s3550_s9  ;;  %6517 = vst [vmem:[#allocation38_spill] sm:$0xff] %v3910_v51  ;;  %v440_v41 = vpack.c.bf16 %v409_v44, %v409_v44  ;;  %v3977_v47 = vunpack.c.l.b16 %v310_v43  ;;  %v749_v43 = vpack.c.b16 %v3961_v54, %v3961_v54 }
  0x58   : > { %762 = vrot.lane.b32.xlu1 %v3872_v45, %s3550_s9  ;;  %6528 = vst [vmem:[#allocation49_spill] sm:$0xff] %v3963_v12 }
  0x59   : > { %760 = vrot.lane.b32.xlu0 %v3876_v52, %s3550_s9  ;;  %v3940_v44 = vunpack.c.l.b16 %v440_v41  ;;  %v309_v41 = vpack.c.bf16 %v278_v39, %v278_v39  ;;  %6531 = vst [vmem:[#allocation52_spill] sm:$0xff] %v3971_v34  ;;  %v269_v39 = vld [vmem:[%s3630_s7 + $0x3e] sm:$0xff] }
  0x5a   : > { %v300_v45 = vpack.c.bf16 %v269_v39, %v269_v39  ;;  %6534 = vst [vmem:[#allocation55_spill] sm:$0xff] %v4016_v53 }
  0x5b   : > { %6524 = vst [vmem:[#allocation45_spill] sm:$0xff] %v3940_v44 }
  0x5c   : > { %v4012_v39 = vunpack.c.l.b16 %v300_v45 }
  0x5f   : > { %770 = vrot.lane.b32.xlu2 %v3906_v61, %s3550_s9 }
  0x60   : > { %768 = vrot.lane.b32.xlu1 %v3910_v51, %s3550_s9  ;;  %v3951_v51 = vpack.c.b16 %v3918_v58, %v3916_v49  ;;  %v3959_v58 = vpack.c.b16 %v3940_v44, %v3938_v36  ;;  %v3975_v49 = vunpack.c.l.b16 %v309_v41  ;;  %v275_v36 = vld [vmem:[%s3630_s7 + $0x6e] sm:$0xff] }
  0x61   : > { %766 = vrot.lane.b32.xlu0 %v3914_v56, %s3550_s9  ;;  %v446_v56 = vpack.c.bf16 %v415_v24, %v415_v24  ;;  %v3969_v24 = vunpack.c.l.b16 %v296_v4  ;;  %v285_v4 = vld [vmem:[%s3630_s7 + $0xbe] sm:$0xff] }
  0x62   : > { %6525 = vst [vmem:[#allocation46_spill] sm:$0xff] %v3951_v51  ;;  %v3989_v33 = vpack.c.b16 %v3977_v47, %v3975_v49 }
  0x63   : > { %v3965_v59 = vunpack.c.l.b16 %v446_v56  ;;  %6530 = vst [vmem:[#allocation51_spill] sm:$0xff] %v3969_v24  ;;  %v271_v56 = vld [vmem:[%s3630_s7 + $0x4e] sm:$0xff]  ;;  %v788_v3 = vpack.c.b16 %v3971_v34, %v3969_v24  ;;  %v281_v34 = vld [vmem:[%s3630_s7 + $0x9e] sm:$0xff] }
  0x64   : > { %6532 = vst [vmem:[#allocation53_spill] sm:$0xff] %v3989_v33  ;;  %v302_v44 = vpack.c.bf16 %v271_v56, %v271_v56  ;;  %v306_v56 = vpack.c.bf16 %v275_v36, %v275_v36  ;;  %v290_v36 = vld [vmem:[%s3630_s7 + $0xe6] sm:$0xff] }
  0x65   : > { %6529 = vst [vmem:[#allocation50_spill] sm:$0xff] %v3965_v59  ;;  %v3996_v41 = vpack.c.b16 %v3965_v59, %v3963_v12  ;;  %v276_v59 = vld [vmem:[%s3630_s7 + $0x76] sm:$0xff]  ;;  %v4005_v12 = vunpack.c.l.b16 %v315_v5  ;;  %v274_v5 = vld [vmem:[%s3630_s7 + $0x66] sm:$0xff]  ;;  %v321_v24 = vpack.c.bf16 %v290_v36, %v290_v36  ;;  %v544_v36 = vunpack.c.l.b16 %v322_v63 }
  0x66   : > { %v4001_v54 = vunpack.c.l.b16 %v302_v44  ;;  %v277_v44 = vld [vmem:[%s3630_s7 + $0x7e] sm:$0xff]  ;;  %v307_v25 = vpack.c.bf16 %v276_v59, %v276_v59  ;;  %v528_v59 = vunpack.c.l.b16 %v306_v56  ;;  %v286_v63 = vld [vmem:[%s3630_s7 + $0xc6] sm:$0xff] }
  0x67   : > { %776 = vrot.lane.b32.xlu2 %v3951_v51, %s3550_s9  ;;  %v268_v51 = vld [vmem:[%s3630_s7 + $0x36] sm:$0xff]  ;;  %6533 = vst [vmem:[#allocation54_spill] sm:$0xff] %v3996_v41  ;;  %v308_v19 = vpack.c.bf16 %v277_v44, %v277_v44  ;;  %v282_v44 = vld [vmem:[%s3630_s7 + $0xa6] sm:$0xff] }
  0x68   : > { %774 = vrot.lane.b32.xlu1 %v3955_v28, %s3550_s9  ;;  %v316_v28 = vpack.c.bf16 %v285_v4, %v285_v4  ;;  %v299_v33 = vpack.c.bf16 %v268_v51, %v268_v51  ;;  %v4014_v51 = vunpack.c.l.b16 %v301_v11  ;;  %v791_v11 = vpack.c.b16 %v3926_v48, %v4001_v54 }
  0x69   : > { %772 = vrot.lane.b32.xlu0 %v3959_v58, %s3550_s9  ;;  %v305_v4 = vpack.c.bf16 %v274_v5, %v274_v5  ;;  %v530_v45 = vunpack.c.l.b16 %v308_v19 }
  0x6a   : > { %v4007_v1 = vunpack.c.l.b16 %v316_v28  ;;  %v790_v2 = vpack.c.b16 %v4014_v51, %v4012_v39 }
  0x6b   : > { %v527_v48 = vunpack.c.l.b16 %v305_v4  ;;  %v794_v56 = vpack.c.b16 %v3975_v49, %v530_v45  ;;  %v543_v4 = vunpack.c.l.b16 %v321_v24  ;;  %v288_v24 = vld [vmem:[%s3630_s7 + $0xd6] sm:$0xff] }
  0x6c   : > { %v4024_v28 = vpack.c.b16 %v4007_v1, %v4005_v12 }
  0x6d   : > { %v4047_v30 = vpack.c.b16 %v544_v36, %v543_v4 }
  0x6f   : > { %804 = vrot.lane.b32.xlu2 %v788_v3, %s3551_s10  ;;  %v4018_v3 = vunpack.c.l.b16 %v299_v33  ;;  %6536 = vst [vmem:[#allocation57_spill] sm:$0xff] %v4047_v30 }
  0x70   : > { %780 = vrot.lane.b32.xlu1 %v749_v43, %s3550_s9  ;;  %v529_v43 = vunpack.c.l.b16 %v307_v25  ;;  %v312_v25 = vpack.c.bf16 %v281_v34, %v281_v34 }
  0x71   : > { %778 = vrot.lane.b32.xlu0 %v3996_v41, %s3550_s9  ;;  %v789_v33 = vpack.c.b16 %v4018_v3, %v4016_v53  ;;  %v283_v41 = vld [vmem:[%s3630_s7 + $0xae] sm:$0xff]  ;;  %v280_v53 = vld [vmem:[%s3630_s7 + $0x96] sm:$0xff] }
  0x72   : > { %v793_v5 = vpack.c.b16 %v529_v43, %v528_v59  ;;  %v314_v19 = vpack.c.bf16 %v283_v41, %v283_v41  ;;  %v289_v41 = vld [vmem:[%s3630_s7 + $0xde] sm:$0xff]  ;;  %v4064_v30 = vpack.c.b16 %v530_v45, %v529_v43 }
  0x74   : > { %v4052_v49 = vunpack.c.l.b16 %v314_v19 }
  0x77   : > { %810 = vrot.lane.b32.xlu2 %v791_v11, %s3551_s10  ;;  %v313_v11 = vpack.c.bf16 %v282_v44, %v282_v44  ;;  %v4062_v44 = vpack.c.b16 %v528_v59, %v527_v48 }
  0x78   : > { %808 = vrot.lane.b32.xlu1 %v790_v2, %s3551_s10  ;;  %v792_v2 = vpack.c.b16 %v527_v48, %v3928_v57 }
  0x79   : > { %806 = vrot.lane.b32.xlu0 %v789_v33, %s3551_s10  ;;  %v4041_v7 = vpop.permute.xlu2 %648  ;;  %v311_v33 = vpack.c.bf16 %v280_v53, %v280_v53  ;;  %v4050_v27 = vunpack.c.l.b16 %v313_v11  ;;  %v287_v53 = vld [vmem:[%s3630_s7 + $0xce] sm:$0xff]  ;;  %v320_v11 = vpack.c.bf16 %v289_v41, %v289_v41 }
  0x7a   : > { %6535 = vst [vmem:[#allocation56_spill] sm:$0xff] %v4041_v7  ;;  %v534_v7 = vunpack.c.l.b16 %v312_v25  ;;  %v797_v25 = vpack.c.b16 %v4005_v12, %v4052_v49  ;;  %v318_v19 = vpack.c.bf16 %v287_v53, %v287_v53 }
  0x7b   : > { %v533_v34 = vunpack.c.l.b16 %v311_v33  ;;  %v317_v33 = vpack.c.bf16 %v286_v63, %v286_v63 }
  0x7c   : > { %v540_v45 = vunpack.c.l.b16 %v318_v19 }
  0x7d   : > { %v539_v43 = vunpack.c.l.b16 %v317_v33  ;;  %v4075_v12 = vpack.c.b16 %v534_v7, %v533_v34  ;;  %v4130_v33 = vpack.c.b16 %v4001_v54, %v4014_v51  ;;  %v903_v54 = vpack.c.b16 %v3884_v23, %v3890_v29 }
  0x7e   : > { %v898_v23 = vpack.c.b16 %v3813_v62, %v3823_v8  ;;  %v844_v29 = vpack.c.b16 %v3641_v15, %v3670_v38  ;;  %v904_v8 = vpack.c.b16 %v3878_v0, %v3886_v14  ;;  %v6544_v0 = vld [vmem:[#allocation15_spill] sm:$0xff] }
  0x7f   : > { %816 = vrot.lane.b32.xlu2 %v794_v56, %s3551_s10  ;;  %v796_v56 = vpack.c.b16 %v4050_v27, %v534_v7  ;;  %v798_v53 = vpack.c.b16 %v539_v43, %v4007_v1  ;;  %v4094_v1 = vpack.c.b16 %v4012_v39, %v4018_v3 }
  0x80   : > { %814 = vrot.lane.b32.xlu1 %v793_v5, %s3551_s10  ;;  %v795_v5 = vpack.c.b16 %v533_v34, %v3977_v47  ;;  %v896_v34 = vpack.c.b16 %v3825_v10, %v3795_v9 }
  0x81   : > { %812 = vrot.lane.b32.xlu0 %v792_v2, %s3551_s10  ;;  %v4057_v57 = vpop.permute.xlu2 %650  ;;  %v319_v2 = vpack.c.bf16 %v288_v24, %v288_v24  ;;  %v292_v24 = vld [vmem:[%s3630_s7 + $0xf6] sm:$0xff] }
  0x82   : > { %6537 = vst [vmem:[#allocation58_spill] sm:$0xff] %v4057_v57  ;;  %v542_v57 = vunpack.c.l.b16 %v320_v11 }
  0x83   : > { %v541_v59 = vunpack.c.l.b16 %v319_v2  ;;  %v897_v2 = vpack.c.b16 %v3821_v6, %v3827_v13 }
  0x84   : > { %v800_v41 = vpack.c.b16 %v543_v4, %v542_v57  ;;  %v323_v4 = vpack.c.bf16 %v292_v24, %v292_v24  ;;  %v6550_v24 = vld [vmem:[#allocation36_spill] sm:$0xff] }
  0x85   : > { %v799_v47 = vpack.c.b16 %v541_v59, %v540_v45  ;;  %v4090_v7 = vpack.c.b16 %v542_v57, %v541_v59 }
  0x86   : > { %v4102_v19 = vunpack.c.l.b16 %v323_v4  ;;  %v6551_v4 = vld [vmem:[#allocation44_spill] sm:$0xff] }
  0x87   : > { %822 = vrot.lane.b32.xlu2 %v797_v25, %s3551_s10  ;;  %6538 = vst [vmem:[#allocation59_spill] sm:$0xff] %v4090_v7 }
  0x88   : > { %820 = vrot.lane.b32.xlu1 %v796_v56, %s3551_s10  ;;  %v4084_v56 = vpack.c.b16 %v540_v45, %v539_v43  ;;  %6539 = vst [vmem:[#allocation60_spill] sm:$0xff] %v4102_v19  ;;  %v6545_v43 = vld [vmem:[#allocation27_spill] sm:$0xff] }
  0x89   : > { %818 = vrot.lane.b32.xlu0 %v795_v5, %s3551_s10  ;;  %v4073_v48 = vpop.permute.xlu2 %656  ;;  %v842_v5 = vpack.c.b16 %v3645_v17, %v3674_v42  ;;  %v801_v17 = vpack.c.b16 %v4102_v19, %v544_v36  ;;  %v843_v36 = vpack.c.b16 %v3668_v37, %v3649_v21  ;;  %v849_v21 = vpack.c.b16 %v3738_v20, %v3691_v55 }
  0x8a   : > { %v4159_v55 = vpack.c.b16 %v4052_v49, %v4050_v27  ;;  %v850_v49 = vpack.c.b16 %v3734_v18, %v3740_v22 }
  0x8f   : > { %828 = vrot.lane.b32.xlu2 %v800_v41, %s3551_s10  ;;  %v6546_v41 = vld [vmem:[#allocation32_spill] sm:$0xff] }
  0x90   : > { %826 = vrot.lane.b32.xlu1 %v799_v47, %s3551_s10  ;;  %v899_v47 = vpack.c.b16 %v6546_v41, %v6545_v43  ;;  %v6555_v43 = vld [vmem:[#allocation47_spill] sm:$0xff]  ;;  %v6556_v41 = vld [vmem:[#allocation25_spill] sm:$0xff] }
  0x91   : > { %824 = vrot.lane.b32.xlu0 %v798_v53, %s3551_s10  ;;  %v4082_v63 = vpop.permute.xlu2 %662  ;;  %v6547_v53 = vld [vmem:[#allocation11_spill] sm:$0xff] }
  0x92   : > { %v4086_v25 = vpop.permute.xlu1 %644 }
  0x93   : > { %v4088_v11 = vpop.permute.xlu0 %640 }
  0x97   : > { %954 = vrot.lane.b32.xlu2 %v4094_v1, %s3552_s11 }
  0x98   : > { %912 = vrot.lane.b32.xlu1 %v896_v34, %s3553_s12  ;;  %v905_v34 = vpack.c.b16 %v6551_v4, %v6550_v24 }
  0x99   : > { %858 = vrot.lane.b32.xlu0 %v842_v5, %s3554_s13  ;;  %v4106_v39 = vpop.permute.xlu2 %668  ;;  %v6552_v5 = vld [vmem:[#allocation14_spill] sm:$0xff] }
  0x9a   : > { %6540 = vst [vmem:[#allocation61_spill] sm:$0xff] %v4106_v39  ;;  %v4108_v3 = vpop.permute.xlu1 %646 }
  0x9b   : > { %v4110_v9 = vpop.permute.xlu0 %642 }
  0x9f   : > { %830 = vrot.lane.b32.xlu2 %v801_v17, %s3551_s10  ;;  %v6553_v17 = vld [vmem:[#allocation12_spill] sm:$0xff] }
  0xa0   : > { %1038 = vrot.lane.b32.xlu1 %v3839_v40, %s3555_s14 }
  0xa1   : > { %996 = vrot.lane.b32.xlu0 %v3684_v50, %s3556_s15  ;;  %v4118_v42 = vpop.permute.xlu2 %752 }
  0xa2   : > { %v4120_v10 = vpop.permute.xlu1 %654 }
  0xa3   : > { %v4122_v57 = vpop.permute.xlu0 %652 }
  0xa7   : > { %956 = vrot.lane.b32.xlu2 %v4130_v33, %s3552_s11 }
  0xa8   : > { %914 = vrot.lane.b32.xlu1 %v897_v2, %s3553_s12  ;;  %v851_v2 = vpack.c.b16 %v6553_v17, %v6552_v5  ;;  %v6558_v5 = vld [vmem:[#allocation30_spill] sm:$0xff] }
  0xa9   : > { %860 = vrot.lane.b32.xlu0 %v843_v36, %s3554_s13  ;;  %v4136_v50 = vpop.permute.xlu2 %758  ;;  %v1354_v36 = vld [vmem:[%s6410_s1 + $0x10] sm:$0x3] }
  0xaa   : > { %v4138_v40 = vpop.permute.xlu1 %660 }
  0xab   : > { %v4140_v45 = vpop.permute.xlu0 %658 }
  0xaf   : > { %1040 = vrot.lane.b32.xlu2 %v3835_v31, %s3555_s14 }
  0xb0   : > { %872 = vrot.lane.b32.xlu1 %v849_v21, %s3554_s13  ;;  %v1368_v21 = vunpack.c.l.b16 %v1354_v36  ;;  %v6560_v36 = vld [vmem:[#allocation7_spill] sm:$0xff] }
  0xb1   : > { %998 = vrot.lane.b32.xlu0 %v3654_v26, %s3556_s15  ;;  %v4149_v37 = vpop.permute.xlu2 %764 }
  0xb2   : > { %v4151_v6 = vpop.permute.xlu1 %666 }
  0xb3   : > { %6541 = vst [vmem:[#allocation62_spill] sm:$0xff] %v4151_v6  ;;  %v4153_v13 = vpop.permute.xlu0 %664 }
  0xb7   : > { %1010 = vrot.lane.b32.xlu2 %v3752_v35, %s3556_s15 }
  0xb8   : > { %968 = vrot.lane.b32.xlu1 %v4159_v55, %s3552_s11 }
  0xb9   : > { %926 = vrot.lane.b32.xlu0 %v903_v54, %s3553_s12  ;;  %v4166_v26 = vpop.permute.xlu2 %770  ;;  %v1371_v54 = vpack.c.b16 %v1368_v21, %v1368_v21 }
  0xba   : > { %v4168_v20 = vpop.permute.xlu1 %750 }
  0xbb   : > { %v4170_v31 = vpop.permute.xlu0 %670 }
  0xbc   : > { %6542 = vst [vmem:[#allocation63_spill] sm:$0xff] %v4170_v31 }
  0xbf   : > { %916 = vrot.lane.b32.xlu2 %v898_v23, %s3553_s12  ;;  %v6554_v23 = vld [vmem:[#allocation35_spill] sm:$0xff] }
  0xc0   : > { %862 = vrot.lane.b32.xlu1 %v844_v29, %s3554_s13 }
  0xc1   : > { %1052 = vrot.lane.b32.xlu0 %v3906_v61, %s3555_s14  ;;  %v4180_v35 = vpop.permute.xlu2 %776  ;;  %v845_v61 = vpack.c.b16 %v3660_v32, %v3643_v16 }
  0xc2   : > { %6543 = vst [vmem:[#allocation64_spill] sm:$0xff] %v4180_v35  ;;  %v4182_v51 = vpop.permute.xlu1 %756  ;;  %v6571_v35 = vld [vmem:[#allocation8_spill] sm:$0xff] }
  0xc3   : > { %v4184_v27 = vpop.permute.xlu0 %754 }
  0xc7   : > { %874 = vrot.lane.b32.xlu2 %v850_v49, %s3554_s13  ;;  %v1409_v49 = vsel %vm6473_vm0, %v1371_v54, 0 }
  0xc8   : > { %1000 = vrot.lane.b32.xlu1 %v3680_v46, %s3556_s15  ;;  %1416 = vmatpush.bf16.msra.mxu0 %v1409_v49 }
  0xc9   : > { %958 = vrot.lane.b32.xlu0 %v3946_v60, %s3552_s11  ;;  %v4193_v15 = vpop.permute.xlu2 %804  ;;  %3432 = vmatpush.bf16.msra.mxu2 %v1409_v49 }
  0xca   : > { %v4195_v38 = vpop.permute.xlu1 %762  ;;  %3433 = vmatpush.bf16.msra.mxu3 %v1409_v49  ;;  %v263_v49 = vld [vmem:[%s3630_s7 + $0xe] sm:$0xff] }
  0xcb   : > { %v4197_v62 = vpop.permute.xlu0 %760 }
  0xcf   : > { %970 = vrot.lane.b32.xlu2 %v4024_v28, %s3552_s11 }
  0xd0   : > { %928 = vrot.lane.b32.xlu1 %v904_v8, %s3553_s12 }
  0xd1   : > { %1042 = vrot.lane.b32.xlu0 %v3876_v52, %s3555_s14  ;;  %v4206_v46 = vpop.permute.xlu2 %810 }
  0xd2   : > { %v4208_v18 = vpop.permute.xlu1 %768 }
  0xd3   : > { %v4210_v22 = vpop.permute.xlu0 %766 }
  0xd7   : > { %864 = vrot.lane.b32.xlu2 %v845_v61, %s3554_s13 }
  0xd8   : > { %1054 = vrot.lane.b32.xlu1 %v3959_v58, %s3555_s14 }
  0xd9   : > { %1012 = vrot.lane.b32.xlu0 %v6544_v0, %s3556_s15  ;;  %v4219_v14 = vpop.permute.xlu2 %816  ;;  %v3290_v0 = vld [vmem:[%s6410_s1 + $0x8] sm:$0xff] }
  0xda   : > { %v4221_v52 = vpop.permute.xlu1 %774  ;;  %1417 = vmatpush.bf16.msra.mxu0 %v3290_v0  ;;  %3434 = vmatpush.bf16.msra.mxu2 %v3290_v0 }
  0xdb   : > { %v4223_v59 = vpop.permute.xlu0 %772  ;;  %3435 = vmatpush.bf16.msra.mxu3 %v3290_v0 }
  0xdf   : > { %1002 = vrot.lane.b32.xlu2 %v6547_v53, %s3556_s15 }
  0xe0   : > { %960 = vrot.lane.b32.xlu1 %v4062_v44, %s3552_s11 }
  0xe1   : > { %918 = vrot.lane.b32.xlu0 %v899_v47, %s3553_s12  ;;  %v4232_v16 = vpop.permute.xlu2 %822  ;;  %v3289_v47 = vld [vmem:[%s6410_s1] sm:$0xff] }
  0xe2   : > { %v4234_v32 = vpop.permute.xlu1 %780  ;;  %1418 = vmatpush.bf16.msra.mxu0 %v3289_v47  ;;  %3436 = vmatpush.bf16.msra.mxu2 %v3289_v47 }
  0xe3   : > { %6548 = vst [vmem:[#allocation15_spill] sm:$0xff] %v4234_v32  ;;  %v4236_v58 = vpop.permute.xlu0 %778  ;;  %3437 = vmatpush.bf16.msra.mxu3 %v3289_v47  ;;  %v6563_v47 = vld [vmem:[#allocation21_spill] sm:$0xff] }
  0xe4   : > { %6549 = vst [vmem:[#allocation27_spill] sm:$0xff] %v4236_v58 }
  0xe7   : > { %930 = vrot.lane.b32.xlu2 %v905_v34, %s3553_s12  ;;  %v6557_v34 = vld [vmem:[#allocation33_spill] sm:$0xff] }
  0xe8   : > { %1044 = vrot.lane.b32.xlu1 %v6554_v23, %s3555_s14  ;;  %v900_v17 = vpack.c.b16 %v6558_v5, %v6557_v34  ;;  %v262_v23 = vld [vmem:[%s3630_s7 + $0x6] sm:$0xff] }
  0xe9   : > { %876 = vrot.lane.b32.xlu0 %v851_v2, %s3554_s13  ;;  %v4249_v29 = vpop.permute.xlu2 %828  ;;  %v6559_v2 = vld [vmem:[#allocation3_spill] sm:$0xff]  ;;  %v293_v5 = vpack.c.bf16 %v262_v23, %v262_v23 }
  0xea   : > { %v4252_v8 = vpop.permute.xlu1 %808  ;;  %v846_v21 = vpack.c.b16 %v6560_v36, %v6559_v2  ;;  %v294_v2 = vpack.c.bf16 %v263_v49, %v263_v49  ;;  %v6564_v36 = vld [vmem:[#allocation34_spill] sm:$0xff] }
  0xeb   : > { %v4254_v61 = vpop.permute.xlu0 %806 }
  0xec   : > { %v516_v32 = vunpack.c.l.b16 %v294_v2  ;;  %v264_v2 = vld [vmem:[%s3630_s7 + $0x16] sm:$0xff] }
  0xef   : > { %1056 = vrot.lane.b32.xlu2 %v6555_v43, %s3555_s14 }
  0xf0   : > { %1014 = vrot.lane.b32.xlu1 %v6556_v41, %s3556_s15  ;;  %v6562_v41 = vld [vmem:[#allocation13_spill] sm:$0xff] }
  0xf1   : > { %972 = vrot.lane.b32.xlu0 %v4084_v56, %s3552_s11  ;;  %v955_v53 = vpop.permute.xlu2 %954  ;;  %v852_v34 = vpack.c.b16 %v6563_v47, %v6562_v41  ;;  %v6567_v41 = vld [vmem:[#allocation42_spill] sm:$0xff]  ;;  %v6568_v47 = vld [vmem:[#allocation24_spill] sm:$0xff] }
  0xf2   : > { %v4268_v24 = vpop.permute.xlu1 %814 }
  0xf3   : > { %v4270_v4 = vpop.permute.xlu0 %812 }
  0xf7   : > { %962 = vrot.lane.b32.xlu2 %v4064_v30, %s3552_s11 }
  0xf8   : > { %920 = vrot.lane.b32.xlu1 %v900_v17, %s3553_s12  ;;  %v6565_v17 = vld [vmem:[#allocation10_spill] sm:$0xff] }
  0xf9   : > { %866 = vrot.lane.b32.xlu0 %v846_v21, %s3554_s13  ;;  %v4280_v54 = vpop.permute.xlu2 %830  ;;  %v515_v21 = vunpack.c.l.b16 %v293_v5 }
  0xfa   : > { %6561 = vst [vmem:[#allocation32_spill] sm:$0xff] %v4280_v54  ;;  %v4284_v0 = vpop.permute.xlu1 %820  ;;  %v6566_v54 = vld [vmem:[#allocation45_spill] sm:$0xff] }
  0xfb   : > { %v4286_v43 = vpop.permute.xlu0 %818  ;;  %v906_v23 = vpack.c.b16 %v6567_v41, %v6566_v54  ;;  %v546_v49 = vpack.c.b16 %v516_v32, %v515_v21  ;;  %v6569_v21 = vld [vmem:[#allocation31_spill] sm:$0xff]  ;;  %v6570_v41 = vld [vmem:[#allocation28_spill] sm:$0xff] }
  0xff   : > { %1046 = vrot.lane.b32.xlu2 %v6564_v36, %s3555_s14 }
 0x100   : > { %878 = vrot.lane.b32.xlu1 %v852_v34, %s3554_s13  ;;  %v1073_v34 = vsel %vm6477_vm1, %v546_v49, %v4088_v11  ;;  %v6572_v11 = vld [vmem:[#allocation5_spill] sm:$0xff] }
 0x101   : > { %1004 = vrot.lane.b32.xlu0 %v6565_v17, %s3556_s15  ;;  %v957_v31 = vpop.permute.xlu2 %956  ;;  %v1121_v32 = vsel %vm6476_vm3, %v1073_v34, %v4168_v20  ;;  %v847_v49 = vpack.c.b16 %v6572_v11, %v6571_v35  ;;  %v6573_v20 = vld [vmem:[#allocation46_spill] sm:$0xff]  ;;  %v6578_v11 = vld [vmem:[#allocation53_spill] sm:$0xff] }
 0x102   : > { %v4295_v58 = vpop.permute.xlu1 %826  ;;  %v1154_v17 = vsel %vm6475_vm2, %v1121_v32, %v4193_v15 }
 0x103   : > { %v4297_v39 = vpop.permute.xlu0 %824 }
 0x107   : > { %1016 = vrot.lane.b32.xlu2 %v6568_v47, %s3556_s15  ;;  %v901_v47 = vpack.c.b16 %v6570_v41, %v6569_v21 }
 0x108   : > { %974 = vrot.lane.b32.xlu1 %v4090_v7, %s3552_s11  ;;  %v295_v7 = vpack.c.bf16 %v264_v2, %v264_v2  ;;  %v6574_v2 = vld [vmem:[#allocation22_spill] sm:$0xff] }
 0x109   : > { %932 = vrot.lane.b32.xlu0 %v906_v23, %s3553_s12  ;;  %v1041_v5 = vpop.permute.xlu2 %1040 }
 0x10a   : > { %v913_v54 = vpop.permute.xlu1 %912  ;;  %v517_v15 = vunpack.c.l.b16 %v295_v7  ;;  %v6577_v7 = vld [vmem:[#allocation9_spill] sm:$0xff] }
 0x10b   : > { %v859_v36 = vpop.permute.xlu0 %858 }
 0x10c   : > { %v1187_v23 = vsel %vm6474_vm4, %v1154_v17, %v859_v36 }
 0x10d   : > { %v1220_v6 = vsel %vm1218_vm5, %v1187_v23, %v913_v54  ;;  %v6575_v54 = vld [vmem:[#allocation19_spill] sm:$0xff] }
 0x10e   : > { %v1253_v17 = vsel %vm6481_vm6, %v1220_v6, %v955_v53  ;;  %v853_v21 = vpack.c.b16 %v6575_v54, %v6574_v2 }
 0x10f   : > { %922 = vrot.lane.b32.xlu2 %v901_v47, %s3553_s12  ;;  %v6576_v47 = vld [vmem:[#allocation51_spill] sm:$0xff] }
 0x110   : > { %868 = vrot.lane.b32.xlu1 %v847_v49, %s3554_s13  ;;  %v547_v23 = vpack.c.b16 %v6576_v47, %v517_v15 }
 0x111   : > { %1058 = vrot.lane.b32.xlu0 %v6573_v20, %s3555_s14  ;;  %v1011_v34 = vpop.permute.xlu2 %1010 }
 0x112   : > { %v1039_v32 = vpop.permute.xlu1 %1038  ;;  %v1076_v6 = vsel %vm6477_vm1, %v547_v23, %v4110_v9  ;;  %v6582_v9 = vld [vmem:[#allocation39_spill] sm:$0xff] }
 0x113   : > { %v997_v36 = vpop.permute.xlu0 %996  ;;  %v1123_v49 = vsel %vm6476_vm3, %v1076_v6, %v4118_v42  ;;  %v6584_v6 = vld [vmem:[#allocation4_spill] sm:$0xff] }
 0x114   : > { %v1286_v35 = vsel %vm6480_vm7, %v1253_v17, %v997_v36  ;;  %v6579_v17 = vld [vmem:[#allocation43_spill] sm:$0xff] }
 0x115   : > { %v1319_v41 = vsel %vm6479_vm8, %v1286_v35, %v1039_v32  ;;  %v1156_v32 = vsel %vm6475_vm2, %v1123_v49, %v4254_v61  ;;  %v6580_v35 = vld [vmem:[#allocation40_spill] sm:$0xff] }
 0x116   : > { %3246 = vmatmul.msk.bf16.vlgmr.msra.gmra.mxu0 %vm6478_vm9, %v1319_v41  ;;  %v907_v2 = vpack.c.b16 %v6580_v35, %v6579_v17 }
 0x117   : > { %880 = vrot.lane.b32.xlu2 %v853_v21, %s3554_s13  ;;  %v6581_v21 = vld [vmem:[#allocation57_spill] sm:$0xff] }
 0x118   : > { %1006 = vrot.lane.b32.xlu1 %v6577_v7, %s3556_s15  ;;  %v6583_v7 = vld [vmem:[#allocation6_spill] sm:$0xff] }
 0x119   : > { %964 = vrot.lane.b32.xlu0 %v6578_v11, %s3552_s11  ;;  %v4337_v53 = vpop.permute.xlu2 %916  ;;  %v848_v49 = vpack.c.b16 %v6584_v6, %v6583_v7  ;;  %v448_v7 = vld [vmem:[%s3630_s7 + $0xfe] sm:$0xff] }
 0x11a   : > { %v915_v20 = vpop.permute.xlu1 %914 }
 0x11b   : > { %v861_v15 = vpop.permute.xlu0 %860 }
 0x11c   : > { %v1189_v36 = vsel %vm6474_vm4, %v1156_v32, %v861_v15  ;;  %v1094_v15 = vsel %vm6477_vm1, %v4064_v30, %v4120_v10  ;;  %v6585_v32 = vld [vmem:[#allocation54_spill] sm:$0xff] }
 0x11d   : > { %v1222_v54 = vsel %vm1218_vm5, %v1189_v36, %v915_v20 }
 0x11e   : > { %v1255_v61 = vsel %vm6481_vm6, %v1222_v54, %v957_v31  ;;  %v6586_v31 = vld [vmem:[#allocation23_spill] sm:$0xff]  ;;  %v6587_v54 = vld [vmem:[#allocation29_spill] sm:$0xff] }
 0x11f   : > { %976 = vrot.lane.b32.xlu2 %v6581_v21, %s3552_s11 }
 0x120   : > { %934 = vrot.lane.b32.xlu1 %v907_v2, %s3553_s12 }
 0x121   : > { %1048 = vrot.lane.b32.xlu0 %v6582_v9, %s3555_s14  ;;  %v4352_v42 = vpop.permute.xlu2 %874  ;;  %v6588_v9 = vld [vmem:[#allocation37_spill] sm:$0xff] }
 0x122   : > { %v873_v41 = vpop.permute.xlu1 %872 }
 0x123   : > { %v999_v47 = vpop.permute.xlu0 %998 }
 0x124   : > { %v1288_v23 = vsel %vm6480_vm7, %v1255_v61, %v999_v47  ;;  %v902_v47 = vpack.c.b16 %v6588_v9, %v6587_v54 }
 0x125   : > { %v1321_v20 = vsel %vm6479_vm8, %v1288_v23, %v1041_v5  ;;  %v1135_v5 = vsel %vm6476_vm3, %v1094_v15, %v4149_v37  ;;  %v6589_v23 = vld [vmem:[#allocation16_spill] sm:$0xff] }
 0x126   : > { %3247 = vmatmul.msk.bf16.gmra.mxu0 %vm6478_vm9, %v1321_v20  ;;  %v1168_v17 = vsel %vm6475_vm2, %v1135_v5, %v4286_v43  ;;  %v460_v37 = vld [vmem:[%s3630_s7 + $0x100] sm:$0xff] }
 0x127   : > { %870 = vrot.lane.b32.xlu2 %v848_v49, %s3554_s13  ;;  %v1201_v30 = vsel %vm6474_vm4, %v1168_v17, %v873_v41  ;;  %v454_v41 = vld [vmem:[%s3630_s7 + $0xff] sm:$0xff]  ;;  %v463_v17 = vpack.c.bf16 %v460_v37, %v460_v37 }
 0x128   : > { %1060 = vrot.lane.b32.xlu1 %v6585_v32, %s3555_s14  ;;  %v6590_v32 = vld [vmem:[#allocation41_spill] sm:$0xff]  ;;  %v457_v54 = vpack.c.bf16 %v454_v41, %v454_v41 }
 0x129   : > { %1018 = vrot.lane.b32.xlu0 %v6586_v31, %s3556_s15  ;;  %v4370_v36 = vpop.permute.xlu2 %970  ;;  %v6591_v31 = vld [vmem:[#allocation49_spill] sm:$0xff]  ;;  %v4397_v9 = vunpack.c.l.b16 %v463_v17 }
 0x12a   : > { %v969_v35 = vpop.permute.xlu1 %968  ;;  %v908_v5 = vpack.c.b16 %v6591_v31, %v6590_v32  ;;  %v450_v41 = vld [vmem:[%s3630_s7 + $0x10e] sm:$0xff] }
 0x12b   : > { %v927_v2 = vpop.permute.xlu0 %926 }
 0x12c   : > { %v1234_v10 = vsel %vm1218_vm5, %v1201_v30, %v927_v2  ;;  %v6593_v2 = vld [vmem:[#allocation17_spill] sm:$0xff] }
 0x12d   : > { %v1267_v61 = vsel %vm6481_vm6, %v1234_v10, %v969_v35  ;;  %v6592_v35 = vld [vmem:[#allocation20_spill] sm:$0xff]  ;;  %v451_v10 = vpack.c.bf16 %v448_v7, %v448_v7 }
 0x12e   : > { %v1300_v20 = vsel %vm6480_vm7, %v1267_v61, %v1011_v34  ;;  %v854_v30 = vpack.c.b16 %v6593_v2, %v6592_v35  ;;  %v6594_v34 = vld [vmem:[#allocation55_spill] sm:$0xff]  ;;  %v449_v7 = vld [vmem:[%s3630_s7 + $0x106] sm:$0xff] }
 0x12f   : > { %1008 = vrot.lane.b32.xlu2 %v6589_v23, %s3556_s15  ;;  %v4407_v37 = vunpack.c.l.b16 %v451_v10  ;;  %v6598_v35 = vld [vmem:[#allocation48_spill] sm:$0xff]  ;;  %v453_v10 = vpack.c.bf16 %v450_v41, %v450_v41  ;;  %v456_v41 = vld [vmem:[%s3630_s7 + $0x10f] sm:$0xff] }
 0x130   : > { %966 = vrot.lane.b32.xlu1 %v4075_v12, %s3552_s11  ;;  %v1034_v2 = vpack.c.b16 %v4397_v9, %v6598_v35 }
 0x131   : > { %924 = vrot.lane.b32.xlu0 %v902_v47, %s3553_s12  ;;  %v4385_v43 = vpop.permute.xlu2 %864  ;;  %v6595_v47 = vld [vmem:[#allocation52_spill] sm:$0xff] }
 0x132   : > { %v863_v6 = vpop.permute.xlu1 %862  ;;  %v6596_v61 = vpack.c.b16 %v6594_v34, %v6595_v47 }
 0x133   : > { %v1053_v49 = vpop.permute.xlu0 %1052 }
 0x134   : > { %v1333_v15 = vsel %vm6479_vm8, %v1300_v20, %v1053_v49  ;;  %v1079_v23 = vsel %vm6477_vm1, %v6596_v61, %v4086_v25  ;;  %v6597_v49 = vld [vmem:[#allocation38_spill] sm:$0xff]  ;;  %v4409_v20 = vunpack.c.l.b16 %v457_v54  ;;  %v4430_v61 = vunpack.c.l.b16 %v453_v10 }
 0x135   : > { %3253 = vmatmul.msk.bf16.vlgmr.msra.gmra.mxu2 %vm6478_vm9, %v1333_v15  ;;  %v1125_v15 = vsel %vm6476_vm3, %v1079_v23, %v4184_v27  ;;  %v950_v27 = vpack.c.b16 %v4407_v37, %v4102_v19  ;;  %v6599_v54 = vld [vmem:[#allocation26_spill] sm:$0xff]  ;;  %v455_v23 = vld [vmem:[%s3630_s7 + $0x107] sm:$0xff] }
 0x136   : > { %v1158_v31 = vsel %vm6475_vm2, %v1125_v15, %v4252_v8  ;;  %v992_v34 = vpack.c.b16 %v4409_v20, %v6599_v54  ;;  %v462_v15 = vld [vmem:[%s3630_s7 + $0x110] sm:$0xff] }
 0x137   : > { %936 = vrot.lane.b32.xlu2 %v908_v5, %s3553_s12  ;;  %v1191_v17 = vsel %vm6474_vm4, %v1158_v31, %v863_v6  ;;  %v6600_v10 = vld [vmem:[#allocation18_spill] sm:$0xff]  ;;  %v465_v19 = vpack.c.bf16 %v462_v15, %v462_v15  ;;  %v467_v15 = vld [vmem:[%s3630_s7 + $0x11e] sm:$0xff] }
 0x138   : > { %1050 = vrot.lane.b32.xlu1 %v6597_v49, %s3555_s14  ;;  %v1224_v8 = vsel %vm1218_vm5, %v1191_v17, %v4337_v53  ;;  %v1097_v49 = vsel %vm6477_vm1, %v6578_v11, %v4073_v48  ;;  %v461_v53 = vld [vmem:[%s3630_s7 + $0x108] sm:$0xff]  ;;  %v6601_v48 = vld [vmem:[#allocation50_spill] sm:$0xff] }
 0x139   : > { %882 = vrot.lane.b32.xlu0 %v854_v30, %s3554_s13  ;;  %v4415_v32 = vpop.permute.xlu2 %1002  ;;  %v452_v30 = vpack.c.bf16 %v449_v7, %v449_v7  ;;  %v1137_v31 = vsel %vm6476_vm3, %v1097_v49, %v4210_v22  ;;  %v909_v11 = vpack.c.b16 %v6598_v35, %v6601_v48  ;;  %v459_v22 = vpack.c.bf16 %v456_v41, %v456_v41 }
 0x13a   : > { %v1001_v25 = vpop.permute.xlu1 %1000  ;;  %v464_v49 = vpack.c.bf16 %v461_v53, %v461_v53  ;;  %v4463_v41 = vunpack.c.l.b16 %v465_v19  ;;  %v466_v53 = vld [vmem:[%s3630_s7 + $0x116] sm:$0xff] }
 0x13b   : > { %v959_v5 = vpop.permute.xlu0 %958  ;;  %v786_v6 = vunpack.c.l.b16 %v452_v30 }
 0x13c   : > { %v1257_v47 = vsel %vm6481_vm6, %v1224_v8, %v959_v5  ;;  %v458_v8 = vpack.c.bf16 %v455_v23, %v455_v23  ;;  %v894_v23 = vunpack.c.l.b16 %v464_v49  ;;  %v473_v49 = vld [vmem:[%s3630_s7 + $0x11f] sm:$0xff] }
 0x13e   : > { %v840_v35 = vunpack.c.l.b16 %v458_v8  ;;  %v1035_v48 = vpack.c.b16 %v4463_v41, %v894_v23  ;;  %v472_v8 = vld [vmem:[%s3630_s7 + $0x117] sm:$0xff] }
 0x13f   : > { %1062 = vrot.lane.b32.xlu2 %v1034_v2, %s3555_s14  ;;  %v1290_v2 = vsel %vm6480_vm7, %v1257_v47, %v1001_v25  ;;  %v1170_v25 = vsel %vm6475_vm2, %v1137_v31, %v4284_v0 }
 0x140   : > { %1020 = vrot.lane.b32.xlu1 %v992_v34, %s3556_s15  ;;  %v951_v34 = vpack.c.b16 %v4430_v61, %v786_v6  ;;  %v1203_v47 = vsel %vm6474_vm4, %v1170_v25, %v4352_v42  ;;  %v478_v25 = vld [vmem:[%s3630_s7 + $0x118] sm:$0xff] }
 0x141   : > { %978 = vrot.lane.b32.xlu0 %v950_v27, %s3552_s11  ;;  %v4438_v7 = vpop.permute.xlu2 %930  ;;  %v855_v27 = vpack.c.b16 %v6599_v54, %v6600_v10  ;;  %v469_v10 = vpack.c.bf16 %v466_v53, %v466_v53 }
 0x142   : > { %v929_v5 = vpop.permute.xlu1 %928 }
 0x143   : > { %v1043_v17 = vpop.permute.xlu0 %1042  ;;  %v1236_v54 = vsel %vm1218_vm5, %v1203_v47, %v929_v5  ;;  %v479_v47 = vld [vmem:[%s3630_s7 + $0x120] sm:$0xff] }
 0x144   : > { %v1323_v30 = vsel %vm6479_vm8, %v1290_v2, %v1043_v17  ;;  %v4461_v17 = vunpack.c.l.b16 %v459_v22  ;;  %v1269_v5 = vsel %vm6481_vm6, %v1236_v54, %v4370_v36  ;;  %v1082_v36 = vsel %vm6477_vm1, %v4094_v1, %v4108_v3 }
 0x145   : > { %3248 = vmatmul.msk.bf16.gmra.mxu0 %vm6478_vm9, %v1323_v30  ;;  %v802_v30 = vpack.c.b16 %v786_v6, %v4407_v37  ;;  %v947_v37 = vunpack.c.l.b16 %v469_v10 }
 0x147   : > { %980 = vrot.lane.b32.xlu2 %v951_v34, %s3552_s11  ;;  %v993_v34 = vpack.c.b16 %v4461_v17, %v840_v35 }
 0x148   : > { %938 = vrot.lane.b32.xlu1 %v909_v11, %s3553_s12  ;;  %v1127_v11 = vsel %vm6476_vm3, %v1082_v36, %v4182_v51  ;;  %v856_v51 = vpack.c.b16 %v840_v35, %v4409_v20  ;;  %v468_v36 = vld [vmem:[%s3630_s7 + $0x126] sm:$0xff] }
 0x149   : > { %884 = vrot.lane.b32.xlu0 %v855_v27, %s3554_s13  ;;  %v4467_v0 = vpop.permute.xlu2 %1056  ;;  %v470_v27 = vpack.c.bf16 %v467_v15, %v467_v15  ;;  %v1160_v22 = vsel %vm6475_vm2, %v1127_v11, %v4206_v46  ;;  %v481_v46 = vpack.c.bf16 %v478_v25, %v478_v25 }
 0x14a   : > { %v1055_v31 = vpop.permute.xlu1 %1054  ;;  %v1193_v1 = vsel %vm6474_vm4, %v1160_v22, %v4385_v43 }
 0x14b   : > { %v1013_v42 = vpop.permute.xlu0 %1012  ;;  %v948_v6 = vunpack.c.l.b16 %v470_v27  ;;  %v1031_v35 = vunpack.c.l.b16 %v481_v46  ;;  %v6602_v46 = vld [vmem:[#allocation56_spill] sm:$0xff] }
 0x14c   : > { %v1302_v2 = vsel %vm6480_vm7, %v1269_v5, %v1013_v42  ;;  %v475_v42 = vpack.c.bf16 %v472_v8, %v472_v8  ;;  %v471_v8 = vpack.c.bf16 %v468_v36, %v468_v36 }
 0x14d   : > { %v1335_v19 = vsel %vm6479_vm8, %v1302_v2, %v1055_v31  ;;  %v952_v15 = vpack.c.b16 %v948_v6, %v947_v37  ;;  %v910_v31 = vpack.c.b16 %v894_v23, %v4397_v9  ;;  %v476_v2 = vpack.c.bf16 %v473_v49, %v473_v49 }
 0x14e   : > { %3254 = vmatmul.msk.bf16.gmra.mxu2 %vm6478_vm9, %v1335_v19  ;;  %v989_v43 = vunpack.c.l.b16 %v475_v42  ;;  %v1100_v37 = vsel %vm6477_vm1, %v4075_v12, %v4140_v45  ;;  %v949_v25 = vunpack.c.l.b16 %v471_v8  ;;  %v474_v12 = vld [vmem:[%s3630_s7 + $0x127] sm:$0xff] }
 0x14f   : > { %832 = vrot.lane.b32.xlu2 %v802_v30, %s3551_s10  ;;  %v482_v30 = vpack.c.bf16 %v479_v47, %v479_v47  ;;  %v990_v20 = vunpack.c.l.b16 %v476_v2  ;;  %v480_v45 = vld [vmem:[%s3630_s7 + $0x128] sm:$0xff] }
 0x150   : > { %1064 = vrot.lane.b32.xlu1 %v1035_v48, %s3555_s14  ;;  %v803_v48 = vpack.c.b16 %v4430_v61, %v4430_v61  ;;  %v483_v42 = vpack.c.bf16 %v480_v45, %v480_v45 }
 0x151   : > { %1022 = vrot.lane.b32.xlu0 %v993_v34, %s3556_s15  ;;  %v4493_v53 = vpop.permute.xlu2 %962  ;;  %v1032_v27 = vunpack.c.l.b16 %v482_v30  ;;  %v994_v6 = vpack.c.b16 %v990_v20, %v989_v43 }
 0x152   : > { %v961_v3 = vpop.permute.xlu1 %960 }
 0x153   : > { %v919_v54 = vpop.permute.xlu0 %918  ;;  %v1036_v11 = vpack.c.b16 %v1032_v27, %v1031_v35 }
 0x154   : > { %v1226_v5 = vsel %vm1218_vm5, %v1193_v1, %v919_v54  ;;  %v953_v54 = vpack.c.b16 %v949_v25, %v949_v25 }
 0x155   : > { %v1259_v10 = vsel %vm6481_vm6, %v1226_v5, %v961_v3 }
 0x156   : > { %v1292_v19 = vsel %vm6480_vm7, %v1259_v10, %v4415_v32  ;;  %v1139_v32 = vsel %vm6476_vm3, %v1100_v37, %v4208_v18 }
 0x157   : > { %982 = vrot.lane.b32.xlu2 %v952_v15, %s3552_s11  ;;  %v1172_v49 = vsel %vm6475_vm2, %v1139_v32, %v4232_v16  ;;  %v857_v16 = vpack.c.b16 %v4461_v17, %v4461_v17  ;;  %v911_v15 = vpack.c.b16 %v4463_v41, %v4463_v41  ;;  %v1033_v17 = vunpack.c.l.b16 %v483_v42  ;;  %v6603_v42 = vld [vmem:[#allocation58_spill] sm:$0xff] }
 0x158   : > { %940 = vrot.lane.b32.xlu1 %v910_v31, %s3553_s12  ;;  %v477_v31 = vpack.c.bf16 %v474_v12, %v474_v12  ;;  %v1085_v41 = vsel %vm6477_vm1, %v4130_v33, %v6602_v46 }
 0x159   : > { %886 = vrot.lane.b32.xlu0 %v856_v51, %s3554_s13  ;;  %v1047_v22 = vpop.permute.xlu2 %1046  ;;  %v1129_v30 = vsel %vm6476_vm3, %v1085_v41, %v4136_v50  ;;  %v1037_v27 = vpack.c.b16 %v1033_v17, %v1033_v17  ;;  %v4586_v41 = vstv %s1564_s17 }
 0x15a   : > { %v1045_v9 = vpop.permute.xlu1 %1044  ;;  %v1162_v43 = vsel %vm6475_vm2, %v1129_v30, %v4270_v4 }
 0x15b   : > { %v877_v23 = vpop.permute.xlu0 %876  ;;  %v1325_v34 = vsel %vm6479_vm8, %v1292_v19, %v1045_v9  ;;  %v1530_v9 = vlaneseq }
 0x15c   : > { %3249 = vmatmul.msk.bf16.gmra.mxu0 %vm6478_vm9, %v1325_v34  ;;  %v1205_v61 = vsel %vm6474_vm4, %v1172_v49, %v877_v23 }
 0x15d   : > { %v1238_v18 = vsel %vm1218_vm5, %v1205_v61, %v4438_v7  ;;  %v991_v7 = vunpack.c.l.b16 %v477_v31 }
 0x15f   : > { %834 = vrot.lane.b32.xlu2 %v803_v48, %s3551_s10  ;;  %v995_v35 = vpack.c.b16 %v991_v7, %v991_v7  ;;  %v4549_v48 = vshrl.u32 %v1530_v9, 7 }
 0x160   : > { %1066 = vrot.lane.b32.xlu1 %v1036_v11, %s3555_s14 }
 0x161   : > { %1024 = vrot.lane.b32.xlu0 %v994_v6, %s3556_s15  ;;  %v1017_v2 = vpop.permute.xlu2 %1016  ;;  %v1662_v37 = vcvt.s32.f32 %v4549_v48  ;;  %v1103_v6 = vsel %vm6477_vm1, %v4159_v55, %v4138_v40  ;;  %vm1566_vm10 = vcmp.ge.s32.totalorder %v4549_v48, %v4586_v41 }
 0x162   : > { %v1015_v47 = vpop.permute.xlu1 %1014  ;;  %v1141_v11 = vsel %vm6476_vm3, %v1103_v6, %v4166_v26 }
 0x163   : > { %v973_v1 = vpop.permute.xlu0 %972  ;;  %v1693_v49 = vadd.f32 0.5, %v1662_v37 }
 0x164   : > { %v1271_v3 = vsel %vm6481_vm6, %v1238_v18, %v973_v1 }
 0x165   : > { %v1304_v51 = vsel %vm6480_vm7, %v1271_v3, %v1015_v47  ;;  %v1724_v45 = vmul.f32 0.041666668, %v1693_v49 }
 0x166   : > { %v1337_v5 = vsel %vm6479_vm8, %v1304_v51, %v4467_v0 }
 0x167   : > { %3255 = vmatmul.msk.bf16.gmra.mxu2 %vm6478_vm9, %v1337_v5  ;;  %984 = vrot.lane.b32.xlu2 %v953_v54, %s3552_s11  ;;  %v1755_v1 = vfloor.f32 %v1724_v45  ;;  %v1088_v5 = vsel %vm6477_vm1, %v3946_v60, %v6603_v42  ;;  %v4594_v60 = vadd.s32 24, %v4549_v48 }
 0x168   : > { %942 = vrot.lane.b32.xlu1 %v911_v15, %s3553_s12 }
 0x169   : > { %888 = vrot.lane.b32.xlu0 %v857_v16, %s3554_s13  ;;  %v923_v33 = vpop.permute.xlu2 %922  ;;  %v4573_v16 = vadd.s32 16, %v4549_v48  ;;  %v1786_v51 = vmul.f32 24.0, %v1755_v1 }
 0x16a   : > { %v921_v10 = vpop.permute.xlu1 %920 }
 0x16b   : > { %v867_v0 = vpop.permute.xlu0 %866  ;;  %v1664_v31 = vcvt.s32.f32 %v4573_v16  ;;  %v1817_v30 = vsub.f32 %v1662_v37, %v1786_v51 }
 0x16c   : > { %v1195_v20 = vsel %vm6474_vm4, %v1162_v43, %v867_v0  ;;  %v4589_v43 = vstv %s1598_s18 }
 0x16d   : > { %v1228_v23 = vsel %vm1218_vm5, %v1195_v20, %v921_v10  ;;  %v1695_v20 = vadd.f32 0.5, %v1664_v31  ;;  %vm1600_vm11 = vcmp.lt.s32.totalorder %v4549_v48, %v4589_v43  ;;  %vm1848_vm12 = vcmp.ge.f32.partialorder %v1817_v30, 1.0 }
 0x16e   : > { %v1261_v50 = vsel %vm6481_vm6, %v1228_v23, %v4493_v53  ;;  %v1174_v53 = vsel %vm6475_vm2, %v1141_v11, %v4297_v39  ;;  %vm1879_vm13 = vcmp.lt.f32.partialorder %v1817_v30, 17.0  ;;  %v1665_v23 = vcvt.s32.f32 %v4594_v60  ;;  %vm4610_vm14 = vmand %vm1566_vm10, %vm1600_vm11 }
 0x16f   : > { %v1726_v9 = vmul.f32 0.041666668, %v1695_v20  ;;  %vm4617_vm15 = vmand %vm1848_vm12, %vm1879_vm13  ;;  %v4678_v30 = vadd.s32 32, %v4549_v48 }
 0x170   : > { %1068 = vrot.lane.b32.xlu1 %v1037_v27, %s3555_s14  ;;  %v1696_v49 = vadd.f32 0.5, %v1665_v23  ;;  %vm1941_vm10 = vmand %vm4610_vm14, %vm4617_vm15 }
 0x171   : > { %1026 = vrot.lane.b32.xlu0 %v995_v35, %s3556_s15  ;;  %v881_v25 = vpop.permute.xlu2 %880 }
 0x172   : > { %v879_v19 = vpop.permute.xlu1 %878  ;;  %v1727_v45 = vmul.f32 0.041666668, %v1696_v49 }
 0x173   : > { %v1005_v34 = vpop.permute.xlu0 %1004  ;;  %v1207_v61 = vsel %vm6474_vm4, %v1174_v53, %v879_v19  ;;  %v4608_v19 = vld [vmem:[%s6411_s2] ss:$0 sm:$0xff] }
 0x174   : > { %v1294_v4 = vsel %vm6480_vm7, %v1261_v50, %v1005_v34  ;;  %v1106_v34 = vsel %vm6477_vm1, %v4024_v28, %v4082_v63 }
 0x175   : > { %v1327_v36 = vsel %vm6479_vm8, %v1294_v4, %v1047_v22  ;;  %v4563_v22 = vadd.s32 8, %v4549_v48  ;;  %v1143_v11 = vsel %vm6476_vm3, %v1106_v34, %v4223_v59 }
 0x176   : > { %3250 = vmatmul.msk.bf16.gmra.mxu0 %vm6478_vm9, %v1327_v36  ;;  %v1176_v28 = vsel %vm6475_vm2, %v1143_v11, %v4295_v58  ;;  %v4641_v58 = vadd.s32 112, %v4549_v48  ;;  %v1666_v36 = vcvt.s32.f32 %v4678_v30 }
 0x177   : > { %v1663_v40 = vcvt.s32.f32 %v4563_v22  ;;  %vm1567_vm11 = vcmp.ge.s32.totalorder %v4563_v22, %v4586_v41  ;;  %vm1601_vm12 = vcmp.lt.s32.totalorder %v4563_v22, %v4589_v43 }
 0x178   : > { %vm4646_vm14 = vmand %vm1567_vm11, %vm1601_vm12  ;;  %vm1602_vm11 = vcmp.lt.s32.totalorder %v4573_v16, %v4589_v43 }
 0x179   : > { %v1694_v18 = vadd.f32 0.5, %v1663_v40  ;;  %v4576_v54 = vpop.permute.xlu2 %976 }
 0x17a   : > { %v975_v8 = vpop.permute.xlu1 %974 }
 0x17b   : > { %v933_v32 = vpop.permute.xlu0 %932  ;;  %v1725_v15 = vmul.f32 0.041666668, %v1694_v18 }
 0x17c   : > { %v1240_v12 = vsel %vm1218_vm5, %v1207_v61, %v933_v32  ;;  %v1757_v32 = vfloor.f32 %v1726_v9  ;;  %v1209_v61 = vsel %vm6474_vm4, %v1176_v28, %v881_v25 }
 0x17d   : > { %v1273_v55 = vsel %vm6481_vm6, %v1240_v12, %v975_v8  ;;  %v1756_v10 = vfloor.f32 %v1725_v15 }
 0x17e   : > { %v1306_v39 = vsel %vm6480_vm7, %v1273_v55, %v1017_v2  ;;  %v1131_v2 = vsel %vm6476_vm3, %v1088_v5, %v4197_v62  ;;  %v1788_v25 = vmul.f32 24.0, %v1757_v32  ;;  %v1758_v5 = vfloor.f32 %v1727_v45 }
 0x17f   : > { %v1164_v7 = vsel %vm6475_vm2, %v1131_v2, %v4268_v24  ;;  %v1787_v24 = vmul.f32 24.0, %v1756_v10  ;;  %v1091_v10 = vsel %vm6477_vm1, %v4062_v44, %v4122_v57  ;;  %v4718_v32 = vadd.s32 40, %v4549_v48 }
 0x180   : > { %v1819_v42 = vsub.f32 %v1664_v31, %v1788_v25  ;;  %v1133_v20 = vsel %vm6476_vm3, %v1091_v10, %v4195_v38 }
 0x181   : > { %v4601_v35 = vpop.permute.xlu2 %870  ;;  %v1818_v6 = vsub.f32 %v1663_v40, %v1787_v24 }
 0x182   : > { %v869_v26 = vpop.permute.xlu1 %868  ;;  %vm1850_vm12 = vcmp.ge.f32.partialorder %v1819_v42, 1.0 }
 0x183   : > { %v1059_v47 = vpop.permute.xlu0 %1058  ;;  %v1197_v0 = vsel %vm6474_vm4, %v1164_v7, %v869_v26  ;;  %vm1849_vm13 = vcmp.ge.f32.partialorder %v1818_v6, 1.0  ;;  %vm1880_vm0 = vcmp.lt.f32.partialorder %v1818_v6, 17.0  ;;  %vm2096_vm4 = vcmask 27648  }
 0x184   : > { %v1339_v3 = vsel %vm6479_vm8, %v1306_v39, %v1059_v47  ;;  %v1230_v62 = vsel %vm1218_vm5, %v1197_v0, %v923_v33  ;;  %vm4652_vm15 = vmand %vm1849_vm13, %vm1880_vm0  ;;  %vm1881_vm13 = vcmp.lt.f32.partialorder %v1819_v42, 17.0  ;;  %v1109_v47 = vsel %vm6477_vm1, %v4084_v56, %v4153_v13 }
 0x185   : > { %3256 = vmatmul.msk.bf16.gmra.mxu2 %vm6478_vm9, %v1339_v3  ;;  %v1676_v3 = vcvt.s32.f32 %v4641_v58  ;;  %vm1942_vm0 = vmand %vm4646_vm14, %vm4652_vm15 }
 0x186   : > { %vm4692_vm15 = vmand %vm1850_vm12, %vm1881_vm13  ;;  %vm1603_vm12 = vcmp.lt.s32.totalorder %v4594_v60, %v4589_v43 }
 0x187   : > { %v1707_v31 = vadd.f32 0.5, %v1676_v3 }
 0x189   : > { %v4644_v55 = vpop.permute.xlu2 %1008  ;;  %v1738_v44 = vmul.f32 0.041666668, %v1707_v31 }
 0x18a   : > { %v1007_v17 = vpop.permute.xlu1 %1006 }
 0x18b   : > { %v965_v46 = vpop.permute.xlu0 %964 }
 0x18c   : > { %v1263_v27 = vsel %vm6481_vm6, %v1230_v62, %v965_v46  ;;  %v1789_v46 = vmul.f32 24.0, %v1758_v5  ;;  %v4750_v5 = vadd.s32 128, %v4549_v48 }
 0x18d   : > { %v1296_v37 = vsel %vm6480_vm7, %v1263_v27, %v1007_v17  ;;  %v1166_v27 = vsel %vm6475_vm2, %v1133_v20, %v4219_v14 }
 0x18e   : > { %v1678_v20 = vcvt.s32.f32 %v4750_v5 }
 0x191   : > { %v937_v38 = vpop.permute.xlu2 %936 }
 0x192   : > { %v935_v50 = vpop.permute.xlu1 %934 }
 0x193   : > { %v1049_v4 = vpop.permute.xlu0 %1048  ;;  %v1420_v53 = vpop.f32.mrf.mxu0  ;;  %v1242_v12 = vsel %vm1218_vm5, %v1209_v61, %v935_v50 }
 0x194   : > { %v1329_v8 = vsel %vm6479_vm8, %v1296_v37, %v1049_v4  ;;  %v1421_v63 = vadd.f32 %v4608_v19, %v1420_v53  ;;  %v1275_v1 = vsel %vm6481_vm6, %v1242_v12, %v4576_v54  ;;  %v4669_v54 = vadd.s32 120, %v4549_v48 }
 0x195   : > { %3251 = vmatmul.msk.bf16.gmra.mxu0 %vm6478_vm9, %v1329_v8  ;;  %v1820_v4 = vsub.f32 %v1665_v23, %v1789_v46  ;;  %v1769_v23 = vfloor.f32 %v1738_v44  ;;  %v1697_v53 = vadd.f32 0.5, %v1666_v36 }
 0x196   : > { %v1499_v59 = vmax.f32 %v1421_v63, 0.0  ;;  %v1677_v24 = vcvt.s32.f32 %v4669_v54 }
 0x197   : > { %vm1851_vm13 = vcmp.ge.f32.partialorder %v1820_v4, 1.0  ;;  %v1800_v25 = vmul.f32 24.0, %v1769_v23 }
 0x198   : > { %v2034_v40 = vsel %vm1941_vm10, %v1499_v59, 0.0  ;;  %vm1568_vm10 = vcmp.ge.s32.totalorder %v4573_v16, %v4586_v41 }
 0x199   : > { %v2065_v26 = vpack.c.bf16 %v2034_v40, %v2034_v40  ;;  %vm4685_vm14 = vmand %vm1568_vm10, %vm1602_vm11  ;;  %vm1569_vm11 = vcmp.ge.s32.totalorder %v4594_v60, %v4586_v41  ;;  %v1831_v13 = vsub.f32 %v1676_v3, %v1800_v25 }
 0x19a   : > { %v1061_v39 = vpop.permute.xlu1 %1060  ;;  %vm1943_vm10 = vmand %vm4685_vm14, %vm4692_vm15 }
 0x19b   : > { %v1019_v22 = vpop.permute.xlu0 %1018  ;;  %2097 = vst.msk [vmem:[#allocation2] sm:$0xf] %vm2096_vm4, %v2065_v26  ;;  %v1422_v15 = vpop.f32.mrf.mxu0  ;;  %vm4720_vm14 = vmand %vm1569_vm11, %vm1603_vm12  ;;  %v1728_v26 = vmul.f32 0.041666668, %v1697_v53  ;;  %vm6621_vm11 = vcmask 130048   ;;  %vm1580_vm12 = vcmp.ge.s32.totalorder %v4641_v58, %v4586_v41 }
 0x19c   : > { %v1308_v51 = vsel %vm6480_vm7, %v1275_v1, %v1019_v22  ;;  %v1423_v2 = vadd.f32 %v4608_v19, %v1422_v15  ;;  %v1667_v22 = vcvt.s32.f32 %v4718_v32  ;;  %v1063_v1 = vpop.permute.xlu2 %1062 }
 0x19d   : > { %v1341_v7 = vsel %vm6479_vm8, %v1308_v51, %v1061_v39  ;;  %v1759_v42 = vfloor.f32 %v1728_v26 }
 0x19e   : > { %3257 = vmatmul.msk.bf16.gmra.mxu2 %vm6478_vm9, %v1341_v7  ;;  %v1500_v17 = vmax.f32 %v1423_v2, 0.0  ;;  %v1698_v2 = vadd.f32 0.5, %v1667_v22 }
 0x1a0   : > { %v2035_v0 = vsel %vm1942_vm0, %v1500_v17, 0.0  ;;  %vm6616_vm0 = vcmask 130048   ;;  %v1729_v16 = vmul.f32 0.041666668, %v1698_v2 }
 0x1a1   : > { %v2066_v62 = vpack.c.bf16 %v2035_v0, %v2035_v0  ;;  %v1199_v57 = vsel %vm6616_vm0, %v1166_v27, %v4601_v35  ;;  %v1708_v35 = vadd.f32 0.5, %v1677_v24  ;;  %vm1882_vm0 = vcmp.lt.f32.partialorder %v1820_v4, 17.0  ;;  %v6622_v27 = vld [vmem:[#allocation62_spill] sm:$0xff] }
 0x1a2   : > { %v967_v9 = vpop.permute.xlu1 %966  ;;  %vm4724_vm15 = vmand %vm1851_vm13, %vm1882_vm0  ;;  %vm1614_vm13 = vcmp.lt.s32.totalorder %v4641_v58, %v4589_v43  ;;  %vm1862_vm0 = vcmp.ge.f32.partialorder %v1831_v13, 1.0  ;;  %v1790_v0 = vmul.f32 24.0, %v1759_v42 }
 0x1a3   : > { %v925_v33 = vpop.permute.xlu0 %924  ;;  %2098 = vst.msk [vmem:[#allocation2 + $0x4] sm:$0xf] %vm2096_vm4, %v2066_v62  ;;  %v1425_v50 = vpop.f32.mrf.mxu0  ;;  %v1739_v63 = vmul.f32 0.041666668, %v1708_v35 }
 0x1a4   : > { %v1232_v14 = vsel %vm1218_vm5, %v1199_v57, %v925_v33  ;;  %v1426_v37 = vadd.f32 %v4608_v19, %v1425_v50 }
 0x1a5   : > { %v1265_v11 = vsel %vm6481_vm6, %v1232_v14, %v967_v9  ;;  %v1770_v18 = vfloor.f32 %v1739_v63  ;;  %v6623_v9 = vld [vmem:[#allocation59_spill] sm:$0xff]  ;;  %v4782_v14 = vadd.s32 136, %v4549_v48 }
 0x1a6   : > { %v1501_v6 = vmax.f32 %v1426_v37, 0.0  ;;  %v1298_v12 = vsel %vm6480_vm7, %v1265_v11, %v4644_v55  ;;  %v1145_v55 = vsel %vm6476_vm3, %v1109_v47, %v4221_v52  ;;  %v1112_v33 = vsel %vm6477_vm1, %v6623_v9, %v6622_v27  ;;  %v6629_v37 = vld [vmem:[#allocation32_spill] sm:$0xff] }
 0x1a7   : > { %v1178_v51 = vsel %vm6475_vm2, %v1145_v55, %v4249_v29  ;;  %v1801_v17 = vmul.f32 24.0, %v1770_v18  ;;  %v1709_v11 = vadd.f32 0.5, %v1678_v20  ;;  %vm1604_vm1 = vcmp.lt.s32.totalorder %v4678_v30, %v4589_v43 }
 0x1a8   : > { %v2036_v8 = vsel %vm1943_vm10, %v1501_v6, 0.0  ;;  %vm1944_vm10 = vmand %vm4720_vm14, %vm4724_vm15  ;;  %vm1893_vm14 = vcmp.lt.f32.partialorder %v1831_v13, 17.0  ;;  %v981_v6 = vpop.permute.xlu2 %980  ;;  %v1679_v59 = vcvt.s32.f32 %v4782_v14 }
 0x1a9   : > { %v2067_v49 = vpack.c.bf16 %v2036_v8, %v2036_v8  ;;  %vm4767_vm15 = vmand %vm1580_vm12, %vm1614_vm13  ;;  %v1832_v44 = vsub.f32 %v1677_v24, %v1801_v17  ;;  %v1821_v24 = vsub.f32 %v1666_v36, %v1790_v0  ;;  %vm1581_vm12 = vcmp.ge.s32.totalorder %v4669_v54, %v4586_v41 }
 0x1aa   : > { %v1051_v61 = vpop.permute.xlu1 %1050  ;;  %v3295_v3 = vld [vmem:[#allocation2] sm:$0xff]   ;;  %vm1615_vm13 = vcmp.lt.s32.totalorder %v4669_v54, %v4589_v43  ;;  %v1760_v8 = vfloor.f32 %v1729_v16  ;;  %v1710_v42 = vadd.f32 0.5, %v1679_v59 }
 0x1ab   : > { %v883_v60 = vpop.permute.xlu0 %882  ;;  %2099 = vst.msk [vmem:[#allocation2 + $0x8] sm:$0xf] %vm2096_vm4, %v2067_v49  ;;  %v1427_v45 = vpop.f32.mrf.mxu0  ;;  %v1331_v40 = vsel %vm6479_vm8, %v1298_v12, %v1051_v61  ;;  %v2231_v57 = vshll.u32 %v3295_v3, 16  ;;  %v4800_v49 = vadd.s32 48, %v4549_v48  ;;  %v2229_v12 = vshrl.u32 %v3295_v3, 16 }
 0x1ac   : > { %v1428_v39 = vadd.f32 %v4608_v19, %v1427_v45  ;;  %3252 = vmatmul.msk.bf16.gmra.mxu0 %vm6478_vm9, %v1331_v40  ;;  %v1211_v15 = vsel %vm6621_vm11, %v1178_v51, %v883_v60  ;;  %vm2227_vm11 = vsmask.f32 7424  ;;  %v1740_v45 = vmul.f32 0.041666668, %v1709_v11  ;;  %v3363_v47 = vld [vmem:[#allocation2] sm:$0xf0] }
 0x1ad   : > { %v1244_v46 = vsel %vm1218_vm5, %v1211_v15, %v937_v38  ;;  %v6626_v38 = vld [vmem:[#allocation64_spill] sm:$0xff]  ;;  %v2233_v36 = vrot.slane %v2231_v57, 1  ;;  %v3364_v15 = vld [vmem:[#allocation2] sm:$0xe]  ;;  %v4860_v3 = vadd.s32 56, %v4549_v48 }
 0x1ae   : > { %v1502_v56 = vmax.f32 %v1428_v39, 0.0  ;;  %v1147_v50 = vsel %vm6476_vm3, %v1112_v33, %v6626_v38  ;;  %vm1570_vm3 = vcmp.ge.s32.totalorder %v4678_v30, %v4586_v41  ;;  %v1791_v39 = vmul.f32 24.0, %v1760_v8 }
 0x1af   : > { %v1180_v35 = vsel %vm6475_vm2, %v1147_v50, %v6629_v37  ;;  %vm1894_vm2 = vcmp.lt.f32.partialorder %v1832_v44, 17.0  ;;  %v2234_v18 = vor.u32 %v2233_v36, %v2229_v12  ;;  %v3365_v17 = vor.u32 %v3364_v15, %v3363_v47  ;;  %v6647_v12 = vld [vmem:[#allocation61_spill] sm:$0xff] }
 0x1b0   : > { %v2037_v52 = vsel %vm1944_vm10, %v1502_v56, 0.0  ;;  %vm4777_vm10 = vmand %vm1862_vm0, %vm1893_vm14  ;;  %vm1863_vm14 = vcmp.ge.f32.partialorder %v1832_v44, 1.0  ;;  %v1668_v56 = vcvt.s32.f32 %v4800_v49  ;;  %v833_v30 = vpop.permute.xlu2 %832  ;;  %v1822_v0 = vsub.f32 %v1667_v22, %v1791_v39 }
 0x1b1   : > { %v2068_v7 = vpack.c.bf16 %v2037_v52, %v2037_v52  ;;  %vm1955_vm0 = vmand %vm4767_vm15, %vm4777_vm10  ;;  %vm2355_vm10 = vcmask 1046528   ;;  %v1741_v58 = vmul.f32 0.041666668, %v1710_v42  ;;  %v2356_v57 = vrot.slane %v3365_v17, 1 }
 0x1b2   : > { %v1021_v29 = vpop.permute.xlu1 %1020 }
 0x1b3   : > { %v979_v31 = vpop.permute.xlu0 %978  ;;  %2100 = vst.msk [vmem:[#allocation2 + $0xc] sm:$0xf] %vm2096_vm4, %v2068_v7  ;;  %v1772_v11 = vfloor.f32 %v1741_v58  ;;  %v4966_v58 = vadd.s32 64, %v4549_v48 }
 0x1b4   : > { %v1277_v10 = vsel %vm6481_vm6, %v1244_v46, %v979_v31  ;;  %vm4822_vm6 = vmand %vm1581_vm12, %vm1615_vm13  ;;  %v1771_v31 = vfloor.f32 %v1740_v45  ;;  %vm6640_vm13 = vcmask 228352  }
 0x1b5   : > { %v1310_v62 = vsel %vm6480_vm7, %v1277_v10, %v1021_v29  ;;  %vm1883_vm7 = vcmp.lt.f32.partialorder %v1821_v24, 17.0  ;;  %v6657_v29 = vld [vmem:[#allocation60_spill] sm:$0xff] }
 0x1b6   : > { %v1343_v34 = vsel %vm6479_vm8, %v1310_v62, %v1063_v1  ;;  %vm6630_vm8 = vcmask 130048   ;;  %v1699_v62 = vadd.f32 0.5, %v1668_v56  ;;  %v1802_v38 = vmul.f32 24.0, %v1771_v31 }
 0x1b7   : > { %3258 = vmatmul.msk.bf16.gmra.mxu2 %vm6478_vm9, %v1343_v34  ;;  %vm1852_vm9 = vcmp.ge.f32.partialorder %v1821_v24, 1.0  ;;  %v1803_v1 = vmul.f32 24.0, %v1772_v11 }
 0x1b8   : > { %v1455_v23 = vpop.f32.mrf.mxu2  ;;  %vm4855_vm15 = vmand %vm1852_vm9, %vm1883_vm7  ;;  %vm1605_vm7 = vcmp.lt.s32.totalorder %v4718_v32, %v4589_v43  ;;  %vm6639_vm9 = vcmask 195584  }
 0x1b9   : > { %v1456_v53 = vadd.f32 %v4608_v19, %v1455_v23  ;;  %v1730_v23 = vmul.f32 0.041666668, %v1699_v62  ;;  %v1834_v17 = vsub.f32 %v1679_v59, %v1803_v1  ;;  %v4948_v62 = vadd.s32 152, %v4549_v48 }
 0x1ba   : > { %v939_v61 = vpop.permute.xlu1 %938  ;;  %v4802_v60 = vld [vmem:[#allocation2 + $0x8] sm:$0xff]  }
 0x1bb   : > { %v1513_v28 = vmax.f32 %v1456_v53, 0.0  ;;  %v885_v63 = vpop.permute.xlu0 %884  ;;  %v2236_v25 = vshll.u32 %v4802_v60, 16  ;;  %v2357_v22 = vrot.slane %v4802_v60, 1  ;;  %v1761_v45 = vfloor.f32 %v1730_v23 }
 0x1bc   : > { %v1213_v26 = vsel %vm6630_vm8, %v1180_v35, %v885_v63  ;;  %vm4831_vm8 = vmand %vm1863_vm14, %vm1894_vm2  ;;  %v1669_v35 = vcvt.s32.f32 %v4860_v3  ;;  %vm1853_vm14 = vcmp.ge.f32.partialorder %v1822_v0, 1.0 }
 0x1bd   : > { %v2048_v40 = vsel %vm1955_vm0, %v1513_v28, 0.0  ;;  %v4826_v51 = vrot.slane %v2236_v25, 1  ;;  %v1246_v54 = vsel %vm1218_vm5, %v1213_v26, %v939_v61  ;;  %vm4847_vm2 = vmand %vm1570_vm3, %vm1604_vm1  ;;  %vm1571_vm3 = vcmp.ge.s32.totalorder %v4718_v32, %v4586_v41 }
 0x1be   : > { %v2079_v55 = vpack.c.bf16 %v2048_v40, %v2048_v40  ;;  %vm1956_vm1 = vmand %vm4822_vm6, %vm4831_vm8  ;;  %v1279_v33 = vsel %vm6639_vm9, %v1246_v54, %v981_v6  ;;  %vm6641_vm0 = vcmask 261120   ;;  %v2358_v8 = vsel %vm2355_vm10, %v2356_v57, %v2357_v22 }
 0x1bf   : > { %v2239_v2 = vsel %vm2227_vm11, %v2234_v18, %v4826_v51  ;;  %vm1945_vm12 = vmand %vm4847_vm2, %vm4855_vm15  ;;  %vm1884_vm2 = vcmp.lt.f32.partialorder %v1822_v0, 17.0  ;;  %vm6642_vm15 = vcmask 293888   ;;  %v1833_v28 = vsub.f32 %v1678_v20, %v1802_v38  ;;  %v6649_v20 = vld [vmem:[#allocation27_spill] sm:$0xff] }
 0x1c0   : > { %2111 = vst.msk [vmem:[#allocation2 + $0x38] sm:$0xf] %vm2096_vm4, %v2079_v55  ;;  %v1457_v52 = vpop.f32.mrf.mxu2  ;;  %2328 = vrot.lane.b32.xlu2 %v2239_v2, %s3549_s8  ;;  %vm4900_vm6 = vmand %vm1571_vm3, %vm1605_vm7  ;;  %v1700_v61 = vadd.f32 0.5, %v1669_v35  ;;  %v4918_v40 = vadd.s32 144, %v4549_v48  ;;  %vm6650_vm3 = vcmask 64512   ;;  %vm6651_vm7 = vcmask 97280  }
 0x1c1   : > { %v1458_v46 = vadd.f32 %v4608_v19, %v1457_v52  ;;  %vm4907_vm8 = vmand %vm1853_vm14, %vm1884_vm2  ;;  %vm6652_vm14 = vcmask 130048   ;;  %vm1895_vm2 = vcmp.lt.f32.partialorder %v1833_v28, 17.0  ;;  %v1792_v54 = vmul.f32 24.0, %v1761_v45 }
 0x1c2   : > { %v1430_v10 = vpop.f32.mrf.mxu0  ;;  %v1065_v34 = vpop.permute.xlu1 %1064  ;;  %vm1946_vm9 = vmand %vm4900_vm6, %vm4907_vm8  ;;  %v1731_v42 = vmul.f32 0.041666668, %v1700_v61  ;;  %v1680_v52 = vcvt.s32.f32 %v4918_v40  ;;  %vm1583_vm8 = vcmp.ge.s32.totalorder %v4782_v14, %v4586_v41 }
 0x1c3   : > { %v1514_v16 = vmax.f32 %v1458_v46, 0.0  ;;  %v1431_v27 = vadd.f32 %v4608_v19, %v1430_v10  ;;  %v1023_v9 = vpop.permute.xlu0 %1022  ;;  %v1823_v59 = vsub.f32 %v1668_v56, %v1792_v54 }
 0x1c4   : > { %v1312_v44 = vsel %vm6640_vm13, %v1279_v33, %v1023_v9  ;;  %vm1616_vm13 = vcmp.lt.s32.totalorder %v4750_v5, %v4589_v43  ;;  %v1762_v0 = vfloor.f32 %v1731_v42 }
 0x1c5   : > { %v2049_v50 = vsel %vm1956_vm1, %v1514_v16, 0.0  ;;  %v1503_v4 = vmax.f32 %v1431_v27, 0.0  ;;  %v1345_v37 = vsel %vm6641_vm0, %v1312_v44, %v1065_v34  ;;  %vm6648_vm1 = vcmask 31744  }
 0x1c6   : > { %v2080_v6 = vpack.c.bf16 %v2049_v50, %v2049_v50  ;;  %v1115_v32 = vsel %vm6648_vm1, %v6581_v21, %v6647_v12  ;;  %vm1864_vm0 = vcmp.ge.f32.partialorder %v1833_v28, 1.0  ;;  %v983_v21 = vpop.permute.xlu2 %982  ;;  %v1711_v27 = vadd.f32 0.5, %v1680_v52  ;;  %v6670_v28 = vld [vmem:[#allocation15_spill] sm:$0xff] }
 0x1c7   : > { %v2038_v24 = vsel %vm1945_vm12, %v1503_v4, 0.0  ;;  %3259 = vmatmul.msk.bf16.gmra.mxu2 %vm6642_vm15, %v1345_v37  ;;  %v1149_v26 = vsel %vm6650_vm3, %v1115_v32, %v6649_v20  ;;  %vm1582_vm12 = vcmp.ge.s32.totalorder %v4750_v5, %v4586_v41  ;;  %vm4941_vm6 = vmand %vm1864_vm0, %vm1895_vm2  ;;  %vm6658_vm3 = vcmask 195584  }
 0x1c8   : > { %2112 = vst.msk [vmem:[#allocation2 + $0x3c] sm:$0xf] %vm2096_vm4, %v2080_v6  ;;  %v2069_v53 = vpack.c.bf16 %v2038_v24, %v2038_v24  ;;  %2381 = vrot.lane.b32.xlu2 %v2358_v8, %s3550_s9  ;;  %v1182_v18 = vsel %vm6651_vm7, %v1149_v26, %v833_v30  ;;  %vm4934_vm15 = vmand %vm1582_vm12, %vm1616_vm13  ;;  %v561_v30 = vpack.c.b16 %v6657_v29, %v6657_v29  ;;  %vm6659_vm12 = vcmask 228352   ;;  %v6666_v8 = vld [vmem:[#allocation63_spill] sm:$0xff] }
 0x1c9   : > { %vm1957_vm1 = vmand %vm4934_vm15, %vm4941_vm6  ;;  %vm1617_vm7 = vcmp.lt.s32.totalorder %v4782_v14, %v4589_v43  ;;  %vm1896_vm13 = vcmp.lt.f32.partialorder %v1834_v17, 17.0  ;;  %vm1572_vm0 = vcmp.ge.s32.totalorder %v4800_v49, %v4586_v41  ;;  %vm1606_vm2 = vcmp.lt.s32.totalorder %v4800_v49, %v4589_v43 }
 0x1ca   : > { %2101 = vst.msk [vmem:[#allocation2 + $0x10] sm:$0xf] %vm2096_vm4, %v2069_v53  ;;  %v1432_v25 = vpop.f32.mrf.mxu0  ;;  %v941_v55 = vpop.permute.xlu1 %940  ;;  %v1793_v38 = vmul.f32 24.0, %v1762_v0  ;;  %v1681_v50 = vcvt.s32.f32 %v4948_v62  ;;  %vm6661_vm15 = vcmask 293888   ;;  %vm4979_vm6 = vmand %vm1583_vm8, %vm1617_vm7  ;;  %v1742_v6 = vmul.f32 0.041666668, %v1711_v27 }
 0x1cb   : > { %v1433_v47 = vadd.f32 %v4608_v19, %v1432_v25  ;;  %v887_v39 = vpop.permute.xlu0 %886  ;;  %v1670_v53 = vcvt.s32.f32 %v4966_v58  ;;  %vm4994_vm8 = vmand %vm1572_vm0, %vm1606_vm2  ;;  %vm6671_vm7 = vcmask 64512   ;;  %v2240_v25 = vshrl.u32 %v4802_v60, 16 }
 0x1cc   : > { %v1215_v15 = vsel %vm6652_vm14, %v1182_v18, %v887_v39  ;;  %vm6660_vm14 = vcmask 261120   ;;  %v1824_v49 = vsub.f32 %v1669_v35, %v1793_v38  ;;  %v1712_v45 = vadd.f32 0.5, %v1681_v50 }
 0x1cd   : > { %v1504_v13 = vmax.f32 %v1433_v47, 0.0  ;;  %v1248_v5 = vsel %vm1218_vm5, %v1215_v15, %v941_v55  ;;  %v1773_v55 = vfloor.f32 %v1742_v6  ;;  %v5024_v15 = vadd.s32 72, %v4549_v48 }
 0x1ce   : > { %v1281_v33 = vsel %vm6658_vm3, %v1248_v5, %v983_v21  ;;  %vm1854_vm3 = vcmp.ge.f32.partialorder %v1823_v59, 1.0  ;;  %v835_v23 = vpop.permute.xlu2 %834  ;;  %v2242_v21 = vor.u32 %v2240_v25, %v4826_v51  ;;  %v1743_v7 = vmul.f32 0.041666668, %v1712_v45 }
 0x1cf   : > { %v2039_v2 = vsel %vm1946_vm9, %v1504_v13, 0.0  ;;  %vm1865_vm9 = vcmp.ge.f32.partialorder %v1834_v17, 1.0  ;;  %v1701_v13 = vadd.f32 0.5, %v1670_v53  ;;  %v1804_v5 = vmul.f32 24.0, %v1773_v55 }
 0x1d0   : > { %v2070_v31 = vpack.c.bf16 %v2039_v2, %v2039_v2  ;;  %v5217_v45 = vadd.s32 88, %v4549_v48 }
 0x1d1   : > { %v1460_v10 = vpop.f32.mrf.mxu2 }
 0x1d2   : > { %2102 = vst.msk [vmem:[#allocation2 + $0x14] sm:$0xf] %vm2096_vm4, %v2070_v31  ;;  %v1461_v16 = vadd.f32 %v4608_v19, %v1460_v10  ;;  %v1067_v34 = vpop.permute.xlu1 %1066  ;;  %v1671_v10 = vcvt.s32.f32 %v5024_v15 }
 0x1d3   : > { %v1025_v9 = vpop.permute.xlu0 %1024 }
 0x1d4   : > { %v1515_v56 = vmax.f32 %v1461_v16, 0.0  ;;  %v1314_v44 = vsel %vm6659_vm12, %v1281_v33, %v1025_v9  ;;  %vm1885_vm12 = vcmp.lt.f32.partialorder %v1823_v59, 17.0 }
 0x1d5   : > { %v1347_v57 = vsel %vm6660_vm14, %v1314_v44, %v1067_v34  ;;  %vm4984_vm14 = vmand %vm1865_vm9, %vm1896_vm13  ;;  %vm6674_vm13 = vcmask 97280   ;;  %v2158_v34 = vld [vmem:[#allocation2 + $0xc] sm:$0xe] }
 0x1d6   : > { %v2050_v4 = vsel %vm1957_vm1, %v1515_v56, 0.0  ;;  %3260 = vmatmul.msk.bf16.vlgmr.msra.gmra.mxu3 %vm6661_vm15, %v1347_v57  ;;  %vm6667_vm1 = vcmask 31744   ;;  %vm5001_vm9 = vmand %vm1854_vm3, %vm1885_vm12  ;;  %vm1573_vm15 = vcmp.ge.s32.totalorder %v4860_v3, %v4586_v41  ;;  %vm1607_vm3 = vcmp.lt.s32.totalorder %v4860_v3, %v4589_v43  ;;  %v985_v59 = vpop.permute.xlu2 %984 }
 0x1d7   : > { %v2081_v24 = vpack.c.bf16 %v2050_v4, %v2050_v4  ;;  %v1118_v36 = vsel %vm6667_vm1, %v561_v30, %v6666_v8  ;;  %vm1958_vm0 = vmand %vm4979_vm6, %vm4984_vm14  ;;  %vm6675_vm12 = vcmask 130048   ;;  %vm1855_vm1 = vcmp.ge.f32.partialorder %v1824_v49, 1.0 }
 0x1d8   : > { %v1151_v63 = vsel %vm6671_vm7, %v1118_v36, %v6670_v28  ;;  %vm1947_vm2 = vmand %vm4994_vm8, %vm5001_vm9  ;;  %vm1886_vm8 = vcmp.lt.f32.partialorder %v1824_v49, 17.0  ;;  %v1732_v30 = vmul.f32 0.041666668, %v1701_v13  ;;  %v1774_v56 = vfloor.f32 %v1743_v7 }
 0x1d9   : > { %2113 = vst.msk [vmem:[#allocation2 + $0x40] sm:$0xf] %vm2096_vm4, %v2081_v24  ;;  %v1462_v61 = vpop.f32.mrf.mxu2  ;;  %v5005_v32 = vld [vmem:[#allocation2 + $0x10] sm:$0xff]   ;;  %v1184_v20 = vsel %vm6674_vm13, %v1151_v63, %v835_v23  ;;  %v1435_v47 = vpop.f32.mrf.mxu0  ;;  %vm5053_vm6 = vmand %vm1573_vm15, %vm1607_vm3  ;;  %v3301_v3 = vunpack.c.h.b16 %v4802_v60  ;;  %v1835_v57 = vsub.f32 %v1680_v52, %v1804_v5  ;;  %vm6680_vm7 = vcmask 195584  }
 0x1da   : > { %v1463_v26 = vadd.f32 %v4608_v19, %v1462_v61  ;;  %v2244_v39 = vshll.u32 %v5005_v32, 16  ;;  %v1436_v1 = vadd.f32 %v4608_v19, %v1435_v47  ;;  %v943_v35 = vpop.permute.xlu1 %942  ;;  %vm5059_vm14 = vmand %vm1855_vm1, %vm1886_vm8  ;;  %v3304_v33 = vunpack.c.l.b16 %v5005_v32 }
 0x1db   : > { %v889_v18 = vpop.permute.xlu0 %888  ;;  %v1763_v23 = vfloor.f32 %v1732_v30  ;;  %v1702_v24 = vadd.f32 0.5, %v1671_v10  ;;  %vm1948_vm9 = vmand %vm5053_vm6, %vm5059_vm14  ;;  %vm6681_vm13 = vcmask 228352   ;;  %v2575_v52 = vunpack.c.l.b16 %v2158_v34 }
 0x1dc   : > { %v1516_v42 = vmax.f32 %v1463_v26, 0.0  ;;  %v5030_v54 = vrot.slane %v2244_v39, 1  ;;  %v1505_v51 = vmax.f32 %v1436_v1, 0.0  ;;  %v1217_v2 = vsel %vm6675_vm12, %v1184_v20, %v889_v18 }
 0x1dd   : > { %v1250_v16 = vsel %vm1218_vm5, %v1217_v2, %v943_v35  ;;  %vm6682_vm15 = vcmask 261120   ;;  %v5082_v14 = vpack.c.b16 %v3304_v33, %v3301_v3  ;;  %v1805_v28 = vmul.f32 24.0, %v1774_v56 }
 0x1de   : > { %v2051_v17 = vsel %vm1958_vm0, %v1516_v42, 0.0  ;;  %v2247_v31 = vsel %vm2227_vm11, %v2242_v21, %v5030_v54  ;;  %v2040_v29 = vsel %vm1947_vm2, %v1505_v51, 0.0  ;;  %v1283_v38 = vsel %vm6680_vm7, %v1250_v16, %v985_v59 }
 0x1df   : > { %v2082_v46 = vpack.c.bf16 %v2051_v17, %v2051_v17  ;;  %2330 = vrot.lane.b32.xlu0 %v2247_v31, %s3549_s8  ;;  %v2071_v0 = vpack.c.bf16 %v2040_v29, %v2040_v29  ;;  %vm1584_vm0 = vcmp.ge.s32.totalorder %v4918_v40, %v4586_v41  ;;  %vm1618_vm2 = vcmp.lt.s32.totalorder %v4918_v40, %v4589_v43 }
 0x1e0   : > { %vm6683_vm3 = vcmask 293888   ;;  %vm1866_vm12 = vcmp.ge.f32.partialorder %v1835_v57, 1.0  ;;  %vm1897_vm1 = vcmp.lt.f32.partialorder %v1835_v57, 17.0  ;;  %v2576_v63 = vpack.c.b16 %v3304_v33, %v2575_v52  ;;  %vm5093_vm8 = vmand %vm1584_vm0, %vm1618_vm2 }
 0x1e1   : > { %2114 = vst.msk [vmem:[#allocation2 + $0x44] sm:$0xf] %vm2096_vm4, %v2082_v46  ;;  %v1437_v44 = vpop.f32.mrf.mxu0  ;;  %v1794_v12 = vmul.f32 24.0, %v1763_v23  ;;  %v1733_v25 = vmul.f32 0.041666668, %v1702_v24  ;;  %v5098_v20 = vadd.s32 160, %v4549_v48  ;;  %vm5100_vm6 = vmand %vm1866_vm12, %vm1897_vm1  ;;  %v1836_v39 = vsub.f32 %v1681_v50, %v1805_v28 }
 0x1e2   : > { %2103 = vst.msk [vmem:[#allocation2 + $0x18] sm:$0xf] %vm2096_vm4, %v2071_v0  ;;  %v1438_v4 = vadd.f32 %v4608_v19, %v1437_v44  ;;  %v1069_v6 = vpop.permute.xlu1 %1068  ;;  %v2577_v40 = vrot.slane %v2576_v63, 1  ;;  %vm1959_vm14 = vmand %vm5093_vm8, %vm5100_vm6  ;;  %vm1585_vm7 = vcmp.ge.s32.totalorder %v4948_v62, %v4586_v41  ;;  %vm1574_vm2 = vcmp.ge.s32.totalorder %v4966_v58, %v4586_v41 }
 0x1e3   : > { %v1027_v37 = vpop.permute.xlu0 %1026  ;;  %v1825_v35 = vsub.f32 %v1670_v53, %v1794_v12  ;;  %v1764_v21 = vfloor.f32 %v1733_v25  ;;  %v1682_v50 = vcvt.s32.f32 %v5098_v20  ;;  %vm1898_vm0 = vcmp.lt.f32.partialorder %v1836_v39, 17.0 }
 0x1e4   : > { %v1316_v11 = vsel %vm6681_vm13, %v1283_v38, %v1027_v37  ;;  %v1506_v8 = vmax.f32 %v1438_v4, 0.0  ;;  %vm1867_vm13 = vcmp.ge.f32.partialorder %v1836_v39, 1.0  ;;  %v5131_v53 = vadd.s32 168, %v4549_v48 }
 0x1e5   : > { %v1349_v36 = vsel %vm6682_vm15, %v1316_v11, %v1069_v6  ;;  %vm1608_vm15 = vcmp.lt.s32.totalorder %v4966_v58, %v4589_v43  ;;  %vm1856_vm12 = vcmp.ge.f32.partialorder %v1825_v35, 1.0  ;;  %vm1887_vm1 = vcmp.lt.f32.partialorder %v1825_v35, 17.0  ;;  %vm5137_vm8 = vmand %vm1867_vm13, %vm1898_vm0 }
 0x1e6   : > { %3261 = vmatmul.msk.bf16.gmra.mxu3 %vm6683_vm3, %v1349_v36  ;;  %v2041_v61 = vsel %vm1948_vm9, %v1506_v8, 0.0  ;;  %vm1619_vm9 = vcmp.lt.s32.totalorder %v4948_v62, %v4589_v43  ;;  %v1795_v2 = vmul.f32 24.0, %v1764_v21  ;;  %v1713_v31 = vadd.f32 0.5, %v1682_v50  ;;  %vm5148_vm6 = vmand %vm1574_vm2, %vm1608_vm15 }
 0x1e7   : > { %2423 = vrot.lane.b32.xlu0 %v5082_v14, %s3551_s10  ;;  %v2072_v49 = vpack.c.bf16 %v2041_v61, %v2041_v61  ;;  %vm5133_vm3 = vmand %vm1585_vm7, %vm1619_vm9  ;;  %v5144_v58 = vadd.s32 80, %v4549_v48  ;;  %v2248_v29 = vshrl.u32 %v5005_v32, 16  ;;  %v1683_v59 = vcvt.s32.f32 %v5131_v53 }
 0x1e8   : > { %v2453_v27 = vshll.u32 %v5082_v14, 16  ;;  %v1826_v56 = vsub.f32 %v1671_v10, %v1795_v2  ;;  %vm1960_vm7 = vmand %vm5133_vm3, %vm5137_vm8  ;;  %v1744_v57 = vmul.f32 0.041666668, %v1713_v31  ;;  %vm1575_vm13 = vcmp.ge.s32.totalorder %v5024_v15, %v4586_v41 }
 0x1e9   : > { %v5104_v47 = vld [vmem:[#allocation2 + $0x14] sm:$0xff]   ;;  %2104 = vst.msk [vmem:[#allocation2 + $0x1c] sm:$0xf] %vm2096_vm4, %v2072_v49  ;;  %v2250_v34 = vor.u32 %v2248_v29, %v5030_v54  ;;  %v1672_v38 = vcvt.s32.f32 %v5144_v58  ;;  %v2359_v54 = vrot.slane %v5005_v32, 1  ;;  %vm1609_vm0 = vcmp.lt.s32.totalorder %v5024_v15, %v4589_v43 }
 0x1ea   : > { %v1465_v55 = vpop.f32.mrf.mxu2  ;;  %v2578_v18 = vrot.slane %v5104_v47, 1  ;;  %v2458_v6 = vshll.u32 %v5104_v47, 16  ;;  %v1714_v23 = vadd.f32 0.5, %v1683_v59  ;;  %vm1857_vm2 = vcmp.ge.f32.partialorder %v1826_v56, 1.0  ;;  %vm5203_vm3 = vmand %vm1575_vm13, %vm1609_vm0 }
 0x1eb   : > { %v1466_v1 = vadd.f32 %v4608_v19, %v1465_v55  ;;  %vm1888_vm15 = vcmp.lt.f32.partialorder %v1826_v56, 17.0  ;;  %v2455_v11 = vrot.slane %v2453_v27, 1  ;;  %v1775_v36 = vfloor.f32 %v1744_v57 }
 0x1ec   : > { %v2579_v42 = vsel %vm2355_vm10, %v2577_v40, %v2578_v18  ;;  %v1703_v28 = vadd.f32 0.5, %v1672_v38  ;;  %v2360_v61 = vsel %vm2355_vm10, %v2357_v22, %v2359_v54  ;;  %v2451_v25 = vshrl.u32 %v5082_v14, 16 }
 0x1ed   : > { %v1517_v13 = vmax.f32 %v1466_v1, 0.0  ;;  %2602 = vrot.lane.b32.xlu2 %v2579_v42, %s3553_s12  ;;  %v5214_v22 = vrot.slane %v2458_v6, 1  ;;  %v1745_v49 = vmul.f32 0.041666668, %v1714_v23  ;;  %v1806_v39 = vmul.f32 24.0, %v1775_v36 }
 0x1ee   : > { %v2456_v14 = vor.u32 %v2455_v11, %v2451_v25  ;;  %v1734_v55 = vmul.f32 0.041666668, %v1703_v28  ;;  %v1673_v21 = vcvt.s32.f32 %v5217_v45  ;;  %v5232_v2 = vadd.s32 176, %v4549_v48 }
 0x1ef   : > { %v2052_v62 = vsel %vm1959_vm14, %v1517_v13, 0.0  ;;  %vm5156_vm14 = vmand %vm1856_vm12, %vm1887_vm1  ;;  %v1776_v35 = vfloor.f32 %v1745_v49  ;;  %v1837_v42 = vsub.f32 %v1682_v50, %v1806_v39  ;;  %vm1586_vm8 = vcmp.ge.s32.totalorder %v5098_v20, %v4586_v41 }
 0x1f0   : > { %v2083_v7 = vpack.c.bf16 %v2052_v62, %v2052_v62  ;;  %v5146_v5 = vld [vmem:[#allocation2 + $0x18] sm:$0xff]   ;;  %vm1949_vm9 = vmand %vm5148_vm6, %vm5156_vm14  ;;  %v2461_v1 = vsel %vm2227_vm11, %v2456_v14, %v5214_v22  ;;  %v1765_v51 = vfloor.f32 %v1734_v55  ;;  %v1704_v46 = vadd.f32 0.5, %v1673_v21 }
 0x1f1   : > { %2635 = vrot.lane.b32.xlu0 %v5146_v5, %s3552_s11  ;;  %v2252_v16 = vshll.u32 %v5146_v5, 16  ;;  %vm5210_vm12 = vmand %vm1857_vm2, %vm1888_vm15  ;;  %v2163_v62 = vld [vmem:[#allocation2 + $0x18] sm:$0xe]  ;;  %v3309_v17 = vunpack.c.h.b16 %v5146_v5  ;;  %v1807_v31 = vmul.f32 24.0, %v1776_v35  ;;  %vm1620_vm6 = vcmp.lt.s32.totalorder %v5098_v20, %v4589_v43  ;;  %v5334_v35 = vld [vmem:[%s6411_s2] ss:$0 sm:$0xff] }
 0x1f2   : > { %2115 = vst.msk [vmem:[#allocation2 + $0x48] sm:$0xf] %vm2096_vm4, %v2083_v7  ;;  %v1467_v30 = vpop.f32.mrf.mxu2  ;;  %vm1950_vm1 = vmand %vm5203_vm3, %vm5210_vm12  ;;  %v2716_v50 = vunpack.c.l.b16 %v2163_v62  ;;  %vm1868_vm14 = vcmp.ge.f32.partialorder %v1837_v42, 1.0  ;;  %v1796_v29 = vmul.f32 24.0, %v1765_v51  ;;  %vm1587_vm0 = vcmp.ge.s32.totalorder %v5131_v53, %v4586_v41 }
 0x1f3   : > { %v1468_v9 = vadd.f32 %v4608_v19, %v1467_v30  ;;  %v1440_v33 = vpop.f32.mrf.mxu0  ;;  %v5172_v3 = vrot.slane %v2252_v16, 1  ;;  %v1684_v30 = vcvt.s32.f32 %v5232_v2  ;;  %v1838_v27 = vsub.f32 %v1683_v59, %v1807_v31 }
 0x1f4   : > { %v1441_v44 = vadd.f32 %v4608_v19, %v1440_v33  ;;  %v2717_v0 = vpack.c.b16 %v3309_v17, %v2716_v50  ;;  %v2256_v20 = vshrl.u32 %v5146_v5, 16  ;;  %vm1621_vm2 = vcmp.lt.s32.totalorder %v5131_v53, %v4589_v43 }
 0x1f5   : > { %v1518_v4 = vmax.f32 %v1468_v9, 0.0  ;;  %v2255_v37 = vsel %vm2227_vm11, %v2250_v34, %v5172_v3  ;;  %v1735_v9 = vmul.f32 0.041666668, %v1704_v46  ;;  %v1827_v56 = vsub.f32 %v1672_v38, %v1796_v29 }
 0x1f6   : > { %v1507_v10 = vmax.f32 %v1441_v44, 0.0  ;;  %2332 = vrot.lane.b32.xlu1 %v2255_v37, %s3549_s8  ;;  %v1715_v59 = vadd.f32 0.5, %v1684_v30  ;;  %v5263_v44 = vadd.s32 184, %v4549_v48  ;;  %vm1576_vm15 = vcmp.ge.s32.totalorder %v5144_v58, %v4586_v41 }
 0x1f7   : > { %v2053_v24 = vsel %vm1960_vm7, %v1518_v4, 0.0  ;;  %vm1899_vm7 = vcmp.lt.f32.partialorder %v1837_v42, 17.0  ;;  %v2718_v4 = vrot.slane %v2717_v0, 1  ;;  %vm1869_vm12 = vcmp.ge.f32.partialorder %v1838_v27, 1.0 }
 0x1f8   : > { %v2084_v52 = vpack.c.bf16 %v2053_v24, %v2053_v24  ;;  %v2042_v8 = vsel %vm1949_vm9, %v1507_v10, 0.0  ;;  %vm5243_vm9 = vmand %vm1586_vm8, %vm1620_vm6  ;;  %v2258_v10 = vor.u32 %v2256_v20, %v5172_v3  ;;  %v1766_v37 = vfloor.f32 %v1735_v9 }
 0x1f9   : > { %v2073_v63 = vpack.c.bf16 %v2042_v8, %v2042_v8  ;;  %2383 = vrot.lane.b32.xlu0 %v2360_v61, %s3550_s9  ;;  %vm5249_vm13 = vmand %vm1868_vm14, %vm1899_vm7  ;;  %vm1900_vm8 = vcmp.lt.f32.partialorder %v1838_v27, 17.0  ;;  %vm1858_vm6 = vcmp.ge.f32.partialorder %v1827_v56, 1.0  ;;  %v1746_v11 = vmul.f32 0.041666668, %v1715_v59 }
 0x1fa   : > { %2116 = vst.msk [vmem:[#allocation2 + $0x4c] sm:$0xf] %vm2096_vm4, %v2084_v52  ;;  %vm1961_vm3 = vmand %vm5243_vm9, %vm5249_vm13  ;;  %v1685_v52 = vcvt.s32.f32 %v5263_v44  ;;  %vm1889_vm7 = vcmp.lt.f32.partialorder %v1827_v56, 17.0  ;;  %v1797_v25 = vmul.f32 24.0, %v1766_v37  ;;  %v2462_v55 = vshrl.u32 %v5104_v47, 16 }
 0x1fb   : > { %2105 = vst.msk [vmem:[#allocation2 + $0x20] sm:$0xf] %vm2096_vm4, %v2073_v63  ;;  %v1442_v15 = vpop.f32.mrf.mxu0  ;;  %vm5299_vm14 = vmand %vm1587_vm0, %vm1621_vm2  ;;  %v5351_v51 = vadd.s32 104, %v4549_v48  ;;  %v5400_v37 = vadd.s32 192, %v4549_v48 }
 0x1fc   : > { %v1443_v26 = vadd.f32 %v4608_v19, %v1442_v15  ;;  %vm5305_vm9 = vmand %vm1869_vm12, %vm1900_vm8  ;;  %v2464_v50 = vor.u32 %v2462_v55, %v5214_v22  ;;  %vm1611_vm12 = vcmp.lt.s32.totalorder %v5217_v45, %v4589_v43 }
 0x1fd   : > { %vm5339_vm0 = vmand %vm1858_vm6, %vm1889_vm7  ;;  %v1675_v22 = vcvt.s32.f32 %v5351_v51  ;;  %v1686_v12 = vcvt.s32.f32 %v5400_v37 }
 0x1fe   : > { %v1508_v40 = vmax.f32 %v1443_v26, 0.0  ;;  %2550 = vrot.lane.b32.xlu1 %v2461_v1, %s3554_s13  ;;  %v1716_v1 = vadd.f32 0.5, %v1685_v52  ;;  %vm1962_vm2 = vmand %vm5299_vm14, %vm5305_vm9  ;;  %vm1588_vm9 = vcmp.ge.s32.totalorder %v5232_v2, %v4586_v41 }
 0x200   : > { %v2043_v13 = vsel %vm1950_vm1, %v1508_v40, 0.0  ;;  %vm1610_vm1 = vcmp.lt.s32.totalorder %v5144_v58, %v4589_v43  ;;  %v1777_v40 = vfloor.f32 %v1746_v11  ;;  %v1747_v29 = vmul.f32 0.041666668, %v1716_v1  ;;  %v5415_v11 = vld [vmem:[#allocation2 + $0x40] sm:$0xff]  }
 0x201   : > { %v2074_v7 = vpack.c.bf16 %v2043_v13, %v2043_v13  ;;  %vm5324_vm13 = vmand %vm1576_vm15, %vm1610_vm1  ;;  %v2292_v39 = vshll.u32 %v5415_v11, 16 }
 0x202   : > { %vm1951_vm15 = vmand %vm5324_vm13, %vm5339_vm0  ;;  %vm1622_vm13 = vcmp.lt.s32.totalorder %v5232_v2, %v4589_v43 }
 0x203   : > { %2106 = vst.msk [vmem:[#allocation2 + $0x24] sm:$0xf] %vm2096_vm4, %v2074_v7 }
 0x208   : > { %v1470_v34 = vpop.f32.mrf.mxu2 }
 0x209   : > { %v1471_v57 = vadd.f32 %v4608_v19, %v1470_v34  ;;  %v5278_v19 = vadd.s32 96, %v4549_v48  ;;  %v5376_v34 = vld [vmem:[#allocation2 + $0x38] sm:$0xff]  }
 0x20a   : > { %v5273_v38 = vld [vmem:[#allocation2 + $0x20] sm:$0xff]   ;;  %v2288_v1 = vshrl.u32 %v5376_v34, 16 }
 0x20b   : > { %v1519_v6 = vmax.f32 %v1471_v57, 0.0  ;;  %v3312_v3 = vunpack.c.l.b16 %v5273_v38  ;;  %v5282_v23 = vrot.slane %v5273_v38, 1  ;;  %v2260_v24 = vshll.u32 %v5273_v38, 16 }
 0x20c   : > { %v1674_v60 = vcvt.s32.f32 %v5278_v19 }
 0x20d   : > { %v2054_v8 = vsel %vm1961_vm3, %v1519_v6, 0.0  ;;  %v5286_v36 = vpack.c.b16 %v3312_v3, %v3309_v17  ;;  %v2719_v28 = vsel %vm2355_vm10, %v2718_v4, %v5282_v23  ;;  %v5290_v63 = vrot.slane %v2260_v24, 1 }
 0x20e   : > { %v2085_v61 = vpack.c.bf16 %v2054_v8, %v2054_v8  ;;  %2728 = vrot.lane.b32.xlu2 %v2719_v28, %s3555_s14  ;;  %v1828_v17 = vsub.f32 %v1673_v21, %v1797_v25  ;;  %v1705_v31 = vadd.f32 0.5, %v1674_v60  ;;  %vm1577_vm3 = vcmp.ge.s32.totalorder %v5217_v45, %v4586_v41 }
 0x20f   : > { %v5311_v15 = vsel %vm2227_vm11, %v2258_v10, %v5290_v63  ;;  %v2580_v26 = vrot.slane %v5286_v36, 1  ;;  %v2466_v53 = vshll.u32 %v5286_v36, 16  ;;  %v1808_v21 = vmul.f32 24.0, %v1777_v40  ;;  %vm5387_vm6 = vmand %vm1577_vm3, %vm1611_vm12 }
 0x210   : > { %2117 = vst.msk [vmem:[#allocation2 + $0x50] sm:$0xf] %vm2096_vm4, %v2085_v61  ;;  %v1472_v14 = vpop.f32.mrf.mxu2  ;;  %2691 = vrot.lane.b32.xlu1 %v5311_v15, %s3556_s15  ;;  %vm1859_vm1 = vcmp.ge.f32.partialorder %v1828_v17, 1.0  ;;  %vm1890_vm8 = vcmp.lt.f32.partialorder %v1828_v17, 17.0  ;;  %v1736_v33 = vmul.f32 0.041666668, %v1705_v31  ;;  %v1778_v4 = vfloor.f32 %v1747_v29 }
 0x211   : > { %v1473_v13 = vadd.f32 %v5334_v35, %v1472_v14  ;;  %v2581_v42 = vsel %vm2355_vm10, %v2578_v18, %v2580_v26  ;;  %v5348_v62 = vrot.slane %v2466_v53, 1  ;;  %v1839_v57 = vsub.f32 %v1684_v30, %v1808_v21  ;;  %vm5393_vm14 = vmand %vm1859_vm1, %vm1890_vm8  ;;  %v5405_v30 = vld [vmem:[#allocation2 + $0x44] sm:$0xff]  }
 0x212   : > { %v1445_v7 = vpop.f32.mrf.mxu0  ;;  %2604 = vrot.lane.b32.xlu0 %v2581_v42, %s3553_s12  ;;  %v2284_v6 = vshll.u32 %v5376_v34, 16  ;;  %v1767_v3 = vfloor.f32 %v1736_v33  ;;  %vm1952_vm7 = vmand %vm5387_vm6, %vm5393_vm14  ;;  %v1809_v8 = vmul.f32 24.0, %v1778_v4  ;;  %v2506_v2 = vshll.u32 %v5405_v30, 16 }
 0x213   : > { %v1520_v18 = vmax.f32 %v1473_v13, 0.0  ;;  %v1446_v46 = vadd.f32 %v5334_v35, %v1445_v7  ;;  %v2469_v27 = vsel %vm2227_vm11, %v2464_v50, %v5348_v62  ;;  %vm1870_vm0 = vcmp.ge.f32.partialorder %v1839_v57, 1.0 }
 0x214   : > { %v5418_v25 = vrot.slane %v2284_v6, 1  ;;  %v1798_v49 = vmul.f32 24.0, %v1767_v3  ;;  %v1840_v13 = vsub.f32 %v1685_v52, %v1809_v8  ;;  %v1717_v7 = vadd.f32 0.5, %v1686_v12 }
 0x215   : > { %v2055_v0 = vsel %vm1962_vm2, %v1520_v18, 0.0  ;;  %v1509_v16 = vmax.f32 %v1446_v46, 0.0  ;;  %vm1901_vm2 = vcmp.lt.f32.partialorder %v1839_v57, 17.0  ;;  %v5439_v17 = vadd.s32 200, %v4549_v48 }
 0x216   : > { %v2086_v9 = vpack.c.bf16 %v2055_v0, %v2055_v0  ;;  %2552 = vrot.lane.b32.xlu2 %v2469_v27, %s3554_s13  ;;  %vm5429_vm3 = vmand %vm1870_vm0, %vm1901_vm2  ;;  %v2290_v18 = vor.u32 %v2288_v1, %v5418_v25  ;;  %v1829_v46 = vsub.f32 %v1674_v60, %v1798_v49  ;;  %v5450_v52 = vrot.slane %v2292_v39, 1 }
 0x217   : > { %v2044_v20 = vsel %vm1951_vm15, %v1509_v16, 0.0  ;;  %vm5420_vm15 = vmand %vm1588_vm9, %vm1622_vm13  ;;  %vm1589_vm1 = vcmp.ge.s32.totalorder %v5263_v44, %v4586_v41  ;;  %vm1623_vm8 = vcmp.lt.s32.totalorder %v5263_v44, %v4589_v43  ;;  %v5456_v50 = vld [vmem:[#allocation2 + $0x4c] sm:$0xff]   ;;  %v5458_v21 = vrot.slane %v2506_v2, 1 }
 0x218   : > { %2118 = vst.msk [vmem:[#allocation2 + $0x54] sm:$0xf] %vm2096_vm4, %v2086_v9  ;;  %v2075_v56 = vpack.c.bf16 %v2044_v20, %v2044_v20  ;;  %2425 = vrot.lane.b32.xlu1 %v5104_v47, %s3551_s10  ;;  %v1706_v47 = vadd.f32 0.5, %v1675_v22  ;;  %vm1963_vm12 = vmand %vm5420_vm15, %vm5429_vm3  ;;  %vm1871_vm6 = vcmp.ge.f32.partialorder %v1840_v13, 1.0  ;;  %vm1578_vm14 = vcmp.ge.s32.totalorder %v5278_v19, %v4586_v41 }
 0x219   : > { %vm1902_vm9 = vcmp.lt.f32.partialorder %v1840_v13, 17.0  ;;  %v1748_v0 = vmul.f32 0.041666668, %v1717_v7  ;;  %v1687_v16 = vcvt.s32.f32 %v5439_v17  ;;  %vm5465_vm13 = vmand %vm1589_vm1, %vm1623_vm8  ;;  %vm1860_vm0 = vcmp.ge.f32.partialorder %v1829_v46, 1.0 }
 0x21a   : > { %2107 = vst.msk [vmem:[#allocation2 + $0x28] sm:$0xf] %vm2096_vm4, %v2075_v56  ;;  %v1447_v45 = vpop.f32.mrf.mxu0  ;;  %v1737_v61 = vmul.f32 0.041666668, %v1706_v47  ;;  %vm1891_vm2 = vcmp.lt.f32.partialorder %v1829_v46, 17.0  ;;  %v2510_v9 = vshrl.u32 %v5405_v30, 16  ;;  %v5472_v20 = vsel %vm2227_vm11, %v2290_v18, %v5450_v52  ;;  %vm5482_vm3 = vmand %vm1871_vm6, %vm1902_vm9 }
 0x21b   : > { %v1448_v24 = vadd.f32 %v5334_v35, %v1447_v45  ;;  %v2514_v56 = vshll.u32 %v5456_v50, 16  ;;  %v2264_v45 = vshrl.u32 %v5273_v38, 16  ;;  %v1779_v3 = vfloor.f32 %v1748_v0  ;;  %vm1964_vm1 = vmand %vm5465_vm13, %vm5482_vm3 }
 0x21c   : > { %v1768_v42 = vfloor.f32 %v1737_v61  ;;  %v2512_v57 = vor.u32 %v2510_v9, %v5458_v21  ;;  %vm1579_vm8 = vcmp.ge.s32.totalorder %v5351_v51, %v4586_v41  ;;  %v2369_v9 = vrot.slane %v5376_v34, 1 }
 0x21d   : > { %v1510_v28 = vmax.f32 %v1448_v24, 0.0  ;;  %v1718_v24 = vadd.f32 0.5, %v1687_v16  ;;  %v5511_v14 = vrot.slane %v2514_v56, 1  ;;  %v1810_v40 = vmul.f32 24.0, %v1779_v3 }
 0x21e   : > { %v1799_v60 = vmul.f32 24.0, %v1768_v42  ;;  %v5568_v56 = vadd.s32 216, %v4549_v48  ;;  %vm1624_vm3 = vcmp.lt.s32.totalorder %v5400_v37, %v4589_v43 }
 0x21f   : > { %v2045_v53 = vsel %vm1952_vm7, %v1510_v28, 0.0  ;;  %vm1612_vm7 = vcmp.lt.s32.totalorder %v5278_v19, %v4589_v43  ;;  %v2517_v18 = vsel %vm2227_vm11, %v2512_v57, %v5511_v14  ;;  %v5552_v0 = vld [vmem:[#allocation2 + $0x50] sm:$0xff]   ;;  %v1841_v44 = vsub.f32 %v1686_v12, %v1810_v40 }
 0x220   : > { %v2076_v55 = vpack.c.bf16 %v2045_v53, %v2045_v53  ;;  %2637 = vrot.lane.b32.xlu1 %v5273_v38, %s3552_s11  ;;  %vm5474_vm15 = vmand %vm1578_vm14, %vm1612_vm7  ;;  %v1830_v6 = vsub.f32 %v1675_v22, %v1799_v60  ;;  %v5503_v53 = vadd.s32 208, %v4549_v48  ;;  %v2266_v22 = vor.u32 %v2264_v45, %v5290_v63 }
 0x221   : > { %v1475_v58 = vpop.f32.mrf.mxu2  ;;  %vm1613_vm14 = vcmp.lt.s32.totalorder %v5351_v51, %v4589_v43  ;;  %v2371_v60 = vrot.slane %v5415_v11, 1  ;;  %v2308_v57 = vshll.u32 %v5552_v0, 16 }
 0x222   : > { %2108 = vst.msk [vmem:[#allocation2 + $0x2c] sm:$0xf] %vm2096_vm4, %v2076_v55  ;;  %v1476_v31 = vadd.f32 %v5334_v35, %v1475_v58  ;;  %vm1861_vm7 = vcmp.ge.f32.partialorder %v1830_v6, 1.0  ;;  %vm1892_vm9 = vcmp.lt.f32.partialorder %v1830_v6, 17.0  ;;  %v1749_v58 = vmul.f32 0.041666668, %v1718_v24  ;;  %vm5547_vm13 = vmand %vm1579_vm8, %vm1613_vm14 }
 0x223   : > { %v1688_v42 = vcvt.s32.f32 %v5503_v53  ;;  %v5581_v12 = vsel %vm2355_vm10, %v2369_v9, %v2371_v60  ;;  %v1689_v6 = vcvt.s32.f32 %v5568_v56  ;;  %v5592_v24 = vrot.slane %v2308_v57, 1 }
 0x224   : > { %v1521_v29 = vmax.f32 %v1476_v31, 0.0 }
 0x225   : > { %v1719_v19 = vadd.f32 0.5, %v1688_v42 }
 0x226   : > { %v2056_v27 = vsel %vm1963_vm12, %v1521_v29, 0.0  ;;  %vm5488_vm12 = vmand %vm1860_vm0, %vm1891_vm2 }
 0x227   : > { %v2087_v33 = vpack.c.bf16 %v2056_v27, %v2056_v27  ;;  %vm1953_vm6 = vmand %vm5474_vm15, %vm5488_vm12  ;;  %vm1590_vm15 = vcmp.ge.s32.totalorder %v5400_v37, %v4586_v41  ;;  %vm1872_vm12 = vcmp.ge.f32.partialorder %v1841_v44, 1.0  ;;  %v1750_v45 = vmul.f32 0.041666668, %v1719_v19 }
 0x228   : > { %2342 = vrot.lane.b32.xlu1 %v5472_v20, %s3549_s8  ;;  %vm5557_vm0 = vmand %vm1861_vm7, %vm1892_vm9  ;;  %v2592_v37 = vrot.slane %v5456_v50, 1  ;;  %vm1591_vm7 = vcmp.ge.s32.totalorder %v5439_v17, %v4586_v41  ;;  %vm1625_vm9 = vcmp.lt.s32.totalorder %v5439_v17, %v4589_v43  ;;  %v2361_v17 = vrot.slane %v5146_v5, 1 }
 0x229   : > { %2119 = vst.msk [vmem:[#allocation2 + $0x58] sm:$0xf] %vm2096_vm4, %v2087_v33  ;;  %v1477_v4 = vpop.f32.mrf.mxu2  ;;  %v5492_v47 = vld [vmem:[#allocation2 + $0x28] sm:$0xff]   ;;  %v1450_v28 = vpop.f32.mrf.mxu0  ;;  %v1780_v33 = vfloor.f32 %v1749_v58  ;;  %vm1954_vm2 = vmand %vm5547_vm13, %vm5557_vm0 }
 0x22a   : > { %v1478_v8 = vadd.f32 %v5334_v35, %v1477_v4  ;;  %v2365_v61 = vrot.slane %v5492_v47, 1  ;;  %v2268_v49 = vshll.u32 %v5492_v47, 16  ;;  %v1451_v38 = vadd.f32 %v5334_v35, %v1450_v28  ;;  %vm5594_vm8 = vmand %vm1590_vm15, %vm1624_vm3 }
 0x22b   : > { %v1811_v10 = vmul.f32 24.0, %v1780_v33 }
 0x22c   : > { %v1522_v39 = vmax.f32 %v1478_v8, 0.0  ;;  %v5523_v2 = vsel %vm2355_vm10, %v5282_v23, %v2365_v61  ;;  %v5525_v55 = vrot.slane %v2268_v49, 1  ;;  %v1511_v63 = vmax.f32 %v1451_v38, 0.0 }
 0x22d   : > { %2730 = vrot.lane.b32.xlu0 %v5523_v2, %s3555_s14  ;;  %v5602_v38 = vadd.s32 224, %v4549_v48  ;;  %v1842_v58 = vsub.f32 %v1687_v16, %v1811_v10 }
 0x22e   : > { %v2057_v1 = vsel %vm1964_vm1, %v1522_v39, 0.0  ;;  %v5533_v13 = vsel %vm2227_vm11, %v2266_v22, %v5525_v55  ;;  %v2046_v31 = vsel %vm1953_vm6, %v1511_v63, 0.0  ;;  %vm1903_vm1 = vcmp.lt.f32.partialorder %v1841_v44, 17.0 }
 0x22f   : > { %v2088_v7 = vpack.c.bf16 %v2057_v1, %v2057_v1  ;;  %2693 = vrot.lane.b32.xlu2 %v5533_v13, %s3556_s15  ;;  %v2077_v46 = vpack.c.bf16 %v2046_v31, %v2046_v31  ;;  %vm5604_vm6 = vmand %vm1872_vm12, %vm1903_vm1  ;;  %v2312_v39 = vshrl.u32 %v5552_v0, 16  ;;  %v2590_v1 = vrot.slane %v5405_v30, 1 }
 0x230   : > { %2564 = vrot.lane.b32.xlu1 %v2517_v18, %s3554_s13  ;;  %v1720_v31 = vadd.f32 0.5, %v1689_v6  ;;  %vm1965_vm14 = vmand %vm5594_vm8, %vm5604_vm6  ;;  %v1690_v27 = vcvt.s32.f32 %v5602_v38  ;;  %vm1873_vm13 = vcmp.ge.f32.partialorder %v1842_v58, 1.0  ;;  %vm1904_vm0 = vcmp.lt.f32.partialorder %v1842_v58, 17.0 }
 0x231   : > { %2120 = vst.msk [vmem:[#allocation2 + $0x5c] sm:$0xf] %vm2096_vm4, %v2088_v7  ;;  %v1452_v51 = vpop.f32.mrf.mxu0  ;;  %v1781_v7 = vfloor.f32 %v1750_v45  ;;  %v2593_v16 = vsel %vm2355_vm10, %v2590_v1, %v2592_v37  ;;  %vm5653_vm15 = vmand %vm1873_vm13, %vm1904_vm0  ;;  %v2375_v22 = vrot.slane %v5552_v0, 1  ;;  %vm1592_vm12 = vcmp.ge.s32.totalorder %v5503_v53, %v4586_v41 }
 0x232   : > { %2109 = vst.msk [vmem:[#allocation2 + $0x30] sm:$0xf] %vm2096_vm4, %v2077_v46  ;;  %v1453_v59 = vadd.f32 %v5334_v35, %v1452_v51  ;;  %v2314_v46 = vor.u32 %v2312_v39, %v5592_v24  ;;  %v1751_v19 = vmul.f32 0.041666668, %v1720_v31  ;;  %v1721_v45 = vadd.f32 0.5, %v1690_v27 }
 0x233   : > { %v1812_v33 = vmul.f32 24.0, %v1781_v7  ;;  %vm1626_vm1 = vcmp.lt.s32.totalorder %v5503_v53, %v4589_v43  ;;  %vm1593_vm13 = vcmp.ge.s32.totalorder %v5568_v56, %v4586_v41  ;;  %vm1627_vm0 = vcmp.lt.s32.totalorder %v5568_v56, %v4589_v43 }
 0x234   : > { %v1512_v4 = vmax.f32 %v1453_v59, 0.0  ;;  %v1752_v31 = vmul.f32 0.041666668, %v1721_v45  ;;  %v5707_v45 = vadd.s32 240, %v4549_v48 }
 0x235   : > { %2437 = vrot.lane.b32.xlu0 %v5405_v30, %s3551_s10  ;;  %v1843_v39 = vsub.f32 %v1688_v42, %v1812_v33  ;;  %v2362_v42 = vsel %vm2355_vm10, %v2359_v54, %v2361_v17 }
 0x236   : > { %v2047_v3 = vsel %vm1954_vm2, %v1512_v4, 0.0  ;;  %vm5643_vm2 = vmand %vm1591_vm7, %vm1625_vm9 }
 0x237   : > { %2395 = vrot.lane.b32.xlu2 %v5581_v12, %s3550_s9  ;;  %v2078_v8 = vpack.c.bf16 %v2047_v3, %v2047_v3  ;;  %vm1966_vm3 = vmand %vm5643_vm2, %vm5653_vm15  ;;  %vm1874_vm8 = vcmp.ge.f32.partialorder %v1843_v39, 1.0  ;;  %vm1905_vm6 = vcmp.lt.f32.partialorder %v1843_v39, 17.0 }
 0x238   : > { %v5598_v49 = vld [vmem:[#allocation2 + $0x58] sm:$0xff]   ;;  %vm5700_vm7 = vmand %vm1874_vm8, %vm1905_vm6  ;;  %vm1594_vm8 = vcmp.ge.s32.totalorder %v5602_v38, %v4586_v41  ;;  %vm1628_vm6 = vcmp.lt.s32.totalorder %v5602_v38, %v4589_v43 }
 0x239   : > { %v2316_v63 = vshll.u32 %v5598_v49, 16  ;;  %2110 = vst.msk [vmem:[#allocation2 + $0x34] sm:$0xf] %vm2096_vm4, %v2078_v8  ;;  %v5648_v10 = vrot.slane %v5598_v49, 1  ;;  %v5658_v8 = vadd.s32 232, %v4549_v48 }
 0x23a   : > { %v1480_v40 = vpop.f32.mrf.mxu2 }
 0x23b   : > { %v1481_v18 = vadd.f32 %v5334_v35, %v1480_v40  ;;  %v5618_v29 = vrot.slane %v2316_v63, 1  ;;  %v5664_v63 = vld [vmem:[#allocation2 + $0x24] sm:$0xff]   ;;  %v1782_v40 = vfloor.f32 %v1751_v19  ;;  %v5675_v7 = vsel %vm2355_vm10, %v2375_v22, %v5648_v10 }
 0x23c   : > { %v2474_v32 = vshll.u32 %v5664_v63, 16  ;;  %v2582_v53 = vrot.slane %v5664_v63, 1  ;;  %v5698_v19 = vld [vmem:[#allocation2 + $0x48] sm:$0xff]  }
 0x23d   : > { %v1523_v44 = vmax.f32 %v1481_v18, 0.0  ;;  %2649 = vrot.lane.b32.xlu0 %v5552_v0, %s3552_s11  ;;  %v5634_v51 = vsel %vm2227_vm11, %v2314_v46, %v5618_v29  ;;  %v1691_v46 = vcvt.s32.f32 %v5658_v8  ;;  %v1813_v54 = vmul.f32 24.0, %v1782_v40 }
 0x23e   : > { %2705 = vrot.lane.b32.xlu1 %v5634_v51, %s3556_s15  ;;  %v5711_v39 = vrot.slane %v2474_v32, 1  ;;  %v2583_v48 = vsel %vm2355_vm10, %v2580_v26, %v2582_v53 }
 0x23f   : > { %v2058_v59 = vsel %vm1965_vm14, %v1523_v44, 0.0  ;;  %2616 = vrot.lane.b32.xlu2 %v2593_v16, %s3553_s12  ;;  %vm5693_vm14 = vmand %vm1592_vm12, %vm1626_vm1  ;;  %v1722_v4 = vadd.f32 0.5, %v1691_v46  ;;  %v1844_v40 = vsub.f32 %v1689_v6, %v1813_v54 }
 0x240   : > { %v2089_v57 = vpack.c.bf16 %v2058_v59, %v2058_v59  ;;  %v1783_v59 = vfloor.f32 %v1752_v31  ;;  %v2300_v31 = vshll.u32 %v5698_v19, 16  ;;  %vm1967_vm9 = vmand %vm5693_vm14, %vm5700_vm7 }
 0x241   : > { %v1753_v54 = vmul.f32 0.041666668, %v1722_v4  ;;  %vm1875_vm2 = vcmp.ge.f32.partialorder %v1844_v40, 1.0  ;;  %vm1906_vm15 = vcmp.lt.f32.partialorder %v1844_v40, 17.0 }
 0x242   : > { %2121 = vst.msk [vmem:[#allocation2 + $0x60] sm:$0xf] %vm2096_vm4, %v2089_v57  ;;  %v1482_v28 = vpop.f32.mrf.mxu2  ;;  %v1814_v6 = vmul.f32 24.0, %v1783_v59  ;;  %v5742_v33 = vrot.slane %v2300_v31, 1  ;;  %v5744_v59 = vld [vmem:[#allocation2 + $0x54] sm:$0xff]   ;;  %vm5756_vm12 = vmand %vm1875_vm2, %vm1906_vm15  ;;  %v2272_v31 = vshrl.u32 %v5492_v47, 16  ;;  %vm1595_vm2 = vcmp.ge.s32.totalorder %v5658_v8, %v4586_v41 }
 0x243   : > { %v1483_v58 = vadd.f32 %v5334_v35, %v1482_v28  ;;  %v2470_v28 = vshrl.u32 %v5286_v36, 16  ;;  %vm1629_vm15 = vcmp.lt.s32.totalorder %v5658_v8, %v4589_v43 }
 0x245   : > { %v1524_v18 = vmax.f32 %v1483_v58, 0.0  ;;  %2742 = vrot.lane.b32.xlu0 %v5675_v7, %s3555_s14 }
 0x246   : > { %2427 = vrot.lane.b32.xlu1 %v5286_v36, %s3551_s10 }
 0x247   : > { %v2059_v16 = vsel %vm1966_vm3, %v1524_v18, 0.0  ;;  %2385 = vrot.lane.b32.xlu2 %v2362_v42, %s3550_s9  ;;  %v5716_v42 = vld [vmem:[#allocation2 + $0x30] sm:$0xff]   ;;  %v2472_v18 = vor.u32 %v2470_v28, %v5348_v62  ;;  %vm5749_vm3 = vmand %vm1593_vm13, %vm1627_vm0  ;;  %v1845_v28 = vsub.f32 %v1690_v27, %v1814_v6  ;;  %v2274_v6 = vor.u32 %v2272_v31, %v5525_v55 }
 0x248   : > { %v2090_v44 = vpack.c.bf16 %v2059_v16, %v2059_v16  ;;  %v1692_v16 = vcvt.s32.f32 %v5707_v45  ;;  %v2276_v26 = vshll.u32 %v5716_v42, 16  ;;  %vm1968_vm1 = vmand %vm5749_vm3, %vm5756_vm12  ;;  %vm6752_vm3 = vcmask 1041408  }
 0x249   : > { %v2477_v36 = vsel %vm2227_vm11, %v2472_v18, %v5711_v39  ;;  %vm1876_vm14 = vcmp.ge.f32.partialorder %v1845_v28, 1.0  ;;  %vm1907_vm7 = vcmp.lt.f32.partialorder %v1845_v28, 17.0 }
 0x24a   : > { %2122 = vst.msk [vmem:[#allocation2 + $0x64] sm:$0xf] %vm2096_vm4, %v2090_v44  ;;  %v1485_v3 = vpop.f32.mrf.mxu2  ;;  %v2296_v44 = vshrl.u32 %v5415_v11, 16  ;;  %v1723_v56 = vadd.f32 0.5, %v1692_v16  ;;  %vm5806_vm13 = vmand %vm1876_vm14, %vm1907_vm7  ;;  %vm1596_vm7 = vcmp.ge.s32.totalorder %v5707_v45, %v4586_v41 }
 0x24b   : > { %v1486_v58 = vadd.f32 %v5334_v35, %v1485_v3  ;;  %v2367_v3 = vrot.slane %v5716_v42, 1 }
 0x24d   : > { %v1525_v32 = vmax.f32 %v1486_v58, 0.0  ;;  %2606 = vrot.lane.b32.xlu0 %v2583_v48, %s3553_s12  ;;  %v2298_v58 = vor.u32 %v2296_v44, %v5450_v52  ;;  %v1784_v48 = vfloor.f32 %v1753_v54  ;;  %v2522_v52 = vshll.u32 %v5744_v59, 16  ;;  %v2948_v44 = vld [vmem:[%s6412_s3 + $0x10] sm:$0x3] }
 0x24e   : > { %2639 = vrot.lane.b32.xlu1 %v5492_v47, %s3552_s11  ;;  %v5783_v54 = vsel %vm2355_vm10, %v2365_v61, %v2367_v3  ;;  %v2962_v28 = vunpack.c.l.b16 %v2948_v44 }
 0x24f   : > { %v2060_v62 = vsel %vm1967_vm9, %v1525_v32, 0.0  ;;  %2554 = vrot.lane.b32.xlu2 %v2477_v36, %s3554_s13  ;;  %v5765_v32 = vrot.slane %v2276_v26, 1  ;;  %v5770_v27 = vsel %vm2227_vm11, %v2298_v58, %v5742_v33  ;;  %v1815_v26 = vmul.f32 24.0, %v1784_v48  ;;  %vm5799_vm9 = vmand %vm1594_vm8, %vm1628_vm6 }
 0x250   : > { %v2091_v57 = vpack.c.bf16 %v2060_v62, %v2060_v62  ;;  %v1754_v62 = vmul.f32 0.041666668, %v1723_v56  ;;  %v2518_v58 = vshrl.u32 %v5456_v50, 16  ;;  %v5811_v31 = vrot.slane %v2522_v52, 1  ;;  %vm1969_vm0 = vmand %vm5799_vm9, %vm5806_vm13 }
 0x251   : > { %v5795_v47 = vsel %vm2227_vm11, %v2274_v6, %v5765_v32  ;;  %v1846_v48 = vsub.f32 %v1691_v46, %v1815_v26  ;;  %v2965_v6 = vpack.c.b16 %v2962_v28, %v2962_v28  ;;  %v5828_v26 = vpop.permute.xlu2 %2328  ;;  %vm5853_vm8 = vmand %vm1595_vm2, %vm1629_vm15  ;;  %vm1630_vm9 = vcmp.lt.s32.totalorder %v5707_v45, %v4589_v43  ;;  %v5923_v4 = vpop.permute.xlu0 %2330 }
 0x252   : > { %2123 = vst.msk [vmem:[#allocation2 + $0x68] sm:$0xf] %vm2096_vm4, %v2091_v57  ;;  %v1487_v18 = vpop.f32.mrf.mxu2  ;;  %v1785_v56 = vfloor.f32 %v1754_v62  ;;  %vm5890_vm2 = vmand %vm1596_vm7, %vm1630_vm9  ;;  %vm6767_vm7 = vcmask 261120   ;;  %vm6768_vm9 = vcmask 293888  }
 0x253   : > { %v1488_v36 = vadd.f32 %v5334_v35, %v1487_v18  ;;  %v2993_v46 = vsel %vm6752_vm3, %v2965_v6, 0  ;;  %vm1877_vm12 = vcmp.ge.f32.partialorder %v1846_v48, 1.0 }
 0x254   : > { %3000 = vmatpush.bf16.msra.mxu1 %v2993_v46  ;;  %3438 = vmatpush.bf16.msrb.mxu3 %v2993_v46 }
 0x255   : > { %v1526_v55 = vmax.f32 %v1488_v36, 0.0  ;;  %2732 = vrot.lane.b32.xlu0 %v5783_v54, %s3555_s14  ;;  %v2373_v36 = vrot.slane %v5698_v19, 1 }
 0x256   : > { %2344 = vrot.lane.b32.xlu1 %v5770_v27, %s3549_s8 }
 0x257   : > { %v2061_v61 = vsel %vm1968_vm1, %v1526_v55, 0.0  ;;  %2695 = vrot.lane.b32.xlu2 %v5795_v47, %s3556_s15  ;;  %v2520_v55 = vor.u32 %v2518_v58, %v5511_v14  ;;  %vm1908_vm1 = vcmp.lt.f32.partialorder %v1846_v48, 17.0  ;;  %v1816_v14 = vmul.f32 24.0, %v1785_v56  ;;  %v3292_v58 = vld [vmem:[%s6412_s3] sm:$0xff] }
 0x258   : > { %v2092_v57 = vpack.c.bf16 %v2061_v61, %v2061_v61  ;;  %v3293_v61 = vld [vmem:[%s6412_s3 + $0x8] sm:$0xff]  ;;  %v5843_v44 = vsel %vm2355_vm10, %v2371_v60, %v2373_v36  ;;  %vm5857_vm6 = vmand %vm1877_vm12, %vm1908_vm1  ;;  %v2594_v48 = vrot.slane %v5744_v59, 1  ;;  %v5873_v56 = vld [vmem:[#allocation2 + $0x60] sm:$0xff]   ;;  %vm6762_vm12 = vcmask 64512  }
 0x259   : > { %v1490_v40 = vpop.f32.mrf.mxu3  ;;  %v2525_v62 = vsel %vm2227_vm11, %v2520_v55, %v5811_v31  ;;  %3001 = vmatpush.bf16.msra.mxu1 %v3293_v61  ;;  %3439 = vmatpush.bf16.msrb.mxu3 %v3293_v61  ;;  %vm1970_vm14 = vmand %vm5853_vm8, %vm5857_vm6  ;;  %v2663_v41 = vshll.u32 %v5873_v56, 16  ;;  %v2382_v43 = vpop.permute.xlu2 %2381  ;;  %vm6763_vm1 = vcmask 97280   ;;  %vm6764_vm8 = vcmask 130048  }
 0x25a   : > { %2124 = vst.msk [vmem:[#allocation2 + $0x6c] sm:$0xf] %vm2096_vm4, %v2092_v57  ;;  %v1491_v18 = vadd.f32 %v5334_v35, %v1490_v40  ;;  %v1847_v40 = vsub.f32 %v1692_v16, %v1816_v14  ;;  %v2595_v6 = vsel %vm2355_vm10, %v2592_v37, %v2594_v48  ;;  %v2720_v37 = vrot.slane %v5873_v56, 1 }
 0x25b   : > { %v5904_v14 = vrot.slane %v2663_v41, 1  ;;  %v2280_v41 = vshrl.u32 %v5716_v42, 16  ;;  %vm6765_vm6 = vcmask 195584  }
 0x25c   : > { %v1527_v52 = vmax.f32 %v1491_v18, 0.0  ;;  %vm1878_vm13 = vcmp.ge.f32.partialorder %v1847_v40, 1.0 }
 0x25d   : > { %2439 = vrot.lane.b32.xlu0 %v5456_v50, %s3551_s10  ;;  %3002 = vmatpush.bf16.msra.mxu1 %v3292_v58  ;;  %v2282_v55 = vor.u32 %v2280_v41, %v5765_v32 }
 0x25e   : > { %v2062_v38 = vsel %vm1969_vm0, %v1527_v52, 0.0  ;;  %2566 = vrot.lane.b32.xlu1 %v2525_v62, %s3554_s13  ;;  %vm1909_vm0 = vcmp.lt.f32.partialorder %v1847_v40, 17.0  ;;  %3440 = vmatpush.bf16.msrb.mxu3 %v3292_v58  ;;  %v2320_v62 = vshrl.u32 %v5598_v49, 16  ;;  %v3500_v52 = vld [vmem:[#allocation2] sm:$0xff]  }
 0x25f   : > { %v2093_v57 = vpack.c.bf16 %v2062_v38, %v2062_v38  ;;  %2397 = vrot.lane.b32.xlu2 %v5843_v44, %s3550_s9  ;;  %vm5894_vm15 = vmand %vm1878_vm13, %vm1909_vm0  ;;  %v2364_v38 = vsel %vm2355_vm10, %v2361_v17, %v5282_v23 }
 0x260   : > { %vm1971_vm3 = vmand %vm5890_vm2, %vm5894_vm15 }
 0x261   : > { %2125 = vst.msk [vmem:[#allocation2 + $0x70] sm:$0xf] %vm2096_vm4, %v2093_v57  ;;  %v1492_v60 = vpop.f32.mrf.mxu3  ;;  %v5915_v57 = vor.u32 %v2320_v62, %v5618_v29  ;;  %v2603_v23 = vpop.permute.xlu2 %2602  ;;  %vm6770_vm0 = vmmov %vm6762_vm12 }
 0x262   : > { %v1493_v8 = vadd.f32 %v5334_v35, %v1492_v60  ;;  %v2478_v60 = vshrl.u32 %v5664_v63, 16  ;;  %vm6771_vm2 = vmmov %vm6763_vm1 }
 0x263   : > { %v2666_v5 = vsel %vm2227_vm11, %v5915_v57, %v5904_v14  ;;  %vm6772_vm15 = vmmov %vm6764_vm8 }
 0x264   : > { %v1528_v18 = vmax.f32 %v1493_v8, 0.0 }
 0x265   : > { %2651 = vrot.lane.b32.xlu0 %v5598_v49, %s3552_s11  ;;  %v2721_v49 = vsel %vm2355_vm10, %v5648_v10, %v2720_v37 }
 0x266   : > { %v2063_v16 = vsel %vm1970_vm14, %v1528_v18, 0.0  ;;  %2334 = vrot.lane.b32.xlu1 %v5311_v15, %s3549_s8  ;;  %v5898_v15 = vld [vmem:[#allocation2 + $0x2c] sm:$0xff]   ;;  %v2480_v18 = vor.u32 %v2478_v60, %v5711_v39  ;;  %v2424_v39 = vpop.permute.xlu0 %2423  ;;  %vm6766_vm14 = vcmask 228352   ;;  %v2526_v60 = vshrl.u32 %v5744_v59, 16 }
 0x267   : > { %v2094_v45 = vpack.c.bf16 %v2063_v16, %v2063_v16  ;;  %2618 = vrot.lane.b32.xlu2 %v2595_v6, %s3553_s12  ;;  %v2584_v8 = vrot.slane %v5898_v15, 1 }
 0x268   : > { %v5929_v17 = vpop.permute.xlu1 %2332 }
 0x269   : > { %2126 = vst.msk [vmem:[#allocation2 + $0x74] sm:$0xf] %vm2096_vm4, %v2094_v45  ;;  %v1495_v50 = vpop.f32.mrf.mxu3  ;;  %v2585_v6 = vsel %vm2355_vm10, %v2582_v53, %v2584_v8  ;;  %v2729_v45 = vpop.permute.xlu2 %2728 }
 0x26a   : > { %v1496_v46 = vadd.f32 %v5334_v35, %v1495_v50  ;;  %v2482_v35 = vshll.u32 %v5898_v15, 16 }
 0x26c   : > { %v1529_v61 = vmax.f32 %v1496_v46, 0.0  ;;  %v5933_v40 = vrot.slane %v2482_v35, 1 }
 0x26d   : > { %2387 = vrot.lane.b32.xlu0 %v2364_v38, %s3550_s9  ;;  %v5958_v38 = vsel %vm2227_vm11, %v2282_v55, %v5418_v25  ;;  %v3501_v55 = vld [vmem:[#allocation2 + $0x8] sm:$0xff]  }
 0x26e   : > { %v2064_v28 = vsel %vm1971_vm3, %v1529_v61, 0.0  ;;  %2744 = vrot.lane.b32.xlu1 %v2721_v49, %s3555_s14  ;;  %v2485_v16 = vsel %vm2227_vm11, %v2480_v18, %v5933_v40  ;;  %v2636_v25 = vpop.permute.xlu0 %2635  ;;  %v2304_v49 = vshrl.u32 %v5698_v19, 16  ;;  %v2528_v18 = vor.u32 %v2526_v60, %v5811_v31  ;;  %vm6773_vm3 = vmmov %vm6765_vm6 }
 0x26f   : > { %v2095_v29 = vpack.c.bf16 %v2064_v28, %v2064_v28  ;;  %2707 = vrot.lane.b32.xlu2 %v2666_v5, %s3556_s15  ;;  %v5976_v28 = vld [vmem:[#allocation2 + $0x5c] sm:$0xff]  }
 0x270   : > { %v2551_v46 = vpop.permute.xlu1 %2550  ;;  %v2306_v5 = vor.u32 %v2304_v49, %v5742_v33 }
 0x271   : > { %2127 = vst.msk [vmem:[#allocation2 + $0x78] sm:$0xf] %vm2096_vm4, %v2095_v29  ;;  %v1497_v58 = vpop.f32.mrf.mxu3  ;;  %vm6761_vm4 = vcmask 31744  }
 0x272   : > { %v2753_v50 = vsel %vm6761_vm4, %v3500_v52, %v5828_v26  ;;  %v2553_v26 = vpop.permute.xlu2 %2552  ;;  %v5995_v0 = vsel %vm2227_vm11, %v2306_v5, %v5592_v24  ;;  %vm6769_vm13 = vmmov %vm6761_vm4 }
 0x273   : > { %v2777_v62 = vsel %vm6762_vm12, %v2753_v50, %v2382_v43  ;;  %v2755_v52 = vsel %vm6769_vm13, %v3501_v55, %v5923_v4  ;;  %vm6774_vm4 = vmmov %vm6766_vm14 }
 0x274   : > { %v2801_v53 = vsel %vm6763_vm1, %v2777_v62, %v2424_v39  ;;  %v6022_v39 = vld [vmem:[#allocation2 + $0x34] sm:$0xff]   ;;  %vm6775_vm12 = vmmov %vm6767_vm7 }
 0x275   : > { %2556 = vrot.lane.b32.xlu0 %v2485_v16, %s3554_s13  ;;  %v2825_v61 = vsel %vm6764_vm8, %v2801_v53, %v2551_v46  ;;  %vm6776_vm1 = vmmov %vm6768_vm9  ;;  %v2586_v60 = vrot.slane %v6022_v39, 1 }
 0x276   : > { %2608 = vrot.lane.b32.xlu1 %v2585_v6, %s3553_s12  ;;  %v2849_v32 = vsel %vm1218_vm5, %v2825_v61, %v2603_v23  ;;  %v2530_v23 = vshll.u32 %v5976_v28, 16  ;;  %v2384_v41 = vpop.permute.xlu0 %2383  ;;  %v2490_v61 = vshll.u32 %v6022_v39, 16  ;;  %vm6777_vm8 = vmmov %vm6769_vm13 }
 0x277   : > { %2429 = vrot.lane.b32.xlu2 %v5664_v63, %s3551_s10  ;;  %v5967_v63 = vsel %vm2355_vm10, %v2367_v3, %v2369_v9  ;;  %v2873_v35 = vsel %vm6765_vm6, %v2849_v32, %v2636_v25  ;;  %v5984_v3 = vsel %vm2355_vm10, %v2373_v36, %v2375_v22  ;;  %v2596_v22 = vrot.slane %v5976_v28, 1  ;;  %v6001_v36 = vld [vmem:[#allocation2 + $0x68] sm:$0xff]   ;;  %vm6778_vm6 = vmmov %vm6770_vm0 }
 0x278   : > { %v6004_v58 = vrot.slane %v2530_v23, 1  ;;  %v2671_v16 = vshll.u32 %v6001_v36, 16  ;;  %v2779_v50 = vsel %vm6770_vm0, %v2755_v52, %v2384_v41  ;;  %v2486_v25 = vshrl.u32 %v5898_v15, 16  ;;  %v6088_v52 = vld [vmem:[#allocation2 + $0x70] sm:$0xff]  ;;  %vm6782_vm13 = vmmov %vm6774_vm4 }
 0x279   : > { %v2597_v24 = vsel %vm2355_vm10, %v2594_v48, %v2596_v22  ;;  %vm6783_vm0 = vmmov %vm6775_vm12 }
 0x27a   : > { %v2533_v6 = vsel %vm2227_vm11, %v2528_v18, %v6004_v58 }
 0x27d   : > { %2697 = vrot.lane.b32.xlu0 %v5958_v38, %s3556_s15 }
 0x27e   : > { %2734 = vrot.lane.b32.xlu1 %v5967_v63, %s3555_s14 }
 0x27f   : > { %2641 = vrot.lane.b32.xlu2 %v5716_v42, %s3552_s11 }
 0x282   : > { %v2692_v43 = vpop.permute.xlu1 %2691 }
 0x283   : > { %v2897_v9 = vsel %vm6766_vm14, %v2873_v35, %v2692_v43  ;;  %v6039_v43 = vrot.slane %v2490_v61, 1  ;;  %v2722_v35 = vrot.slane %v6001_v36, 1  ;;  %vm6779_vm14 = vmmov %vm6771_vm2 }
 0x284   : > { %v2921_v42 = vsel %vm6767_vm7, %v2897_v9, %v2729_v45  ;;  %v2667_v45 = vshrl.u32 %v5873_v56, 16  ;;  %v2488_v9 = vor.u32 %v2486_v25, %v5933_v40  ;;  %vm6780_vm7 = vmmov %vm6772_vm15 }
 0x285   : > { %2399 = vrot.lane.b32.xlu0 %v5984_v3, %s3550_s9  ;;  %3275 = vmatmul.msk.bf16.vlgmr.msra.gmra.mxu1 %vm6768_vm9, %v2921_v42  ;;  %vm6781_vm9 = vmmov %vm6773_vm3 }
 0x286   : > { %2441 = vrot.lane.b32.xlu1 %v5744_v59, %s3551_s10  ;;  %v6020_v59 = vrot.slane %v2671_v16, 1  ;;  %v2669_v31 = vor.u32 %v2667_v45, %v5904_v14  ;;  %v2605_v14 = vpop.permute.xlu0 %2604  ;;  %v2534_v45 = vshrl.u32 %v5976_v28, 16 }
 0x287   : > { %2346 = vrot.lane.b32.xlu2 %v5995_v0, %s3549_s8 }
 0x288   : > { %v2674_v62 = vsel %vm2227_vm11, %v2669_v31, %v6020_v59 }
 0x289   : > { %v2694_v33 = vpop.permute.xlu2 %2693 }
 0x28a   : > { %v2426_v29 = vpop.permute.xlu1 %2425 }
 0x28b   : > { %v2803_v53 = vsel %vm6771_vm2, %v2779_v50, %v2426_v29  ;;  %vm6784_vm2 = vmmov %vm6776_vm1 }
 0x28c   : > { %v2827_v4 = vsel %vm6772_vm15, %v2803_v53, %v2553_v26  ;;  %v2723_v26 = vsel %vm2355_vm10, %v2720_v37, %v2722_v35  ;;  %vm6785_vm15 = vmmov %vm6777_vm8 }
 0x28d   : > { %2620 = vrot.lane.b32.xlu0 %v2597_v24, %s3553_s12  ;;  %v2851_v49 = vsel %vm1218_vm5, %v2827_v4, %v2605_v14  ;;  %v6070_v24 = vld [vmem:[#allocation2 + $0x64] sm:$0xff]  }
 0x28e   : > { %2653 = vrot.lane.b32.xlu1 %v5873_v56, %s3552_s11  ;;  %v2587_v56 = vsel %vm2355_vm10, %v2584_v8, %v2586_v60  ;;  %v2598_v55 = vrot.slane %v6070_v24, 1 }
 0x28f   : > { %2568 = vrot.lane.b32.xlu2 %v2533_v6, %s3554_s13 }
 0x291   : > { %v2396_v48 = vpop.permute.xlu2 %2395 }
 0x292   : > { %v2638_v46 = vpop.permute.xlu1 %2637 }
 0x293   : > { %v2875_v42 = vsel %vm6773_vm3, %v2851_v49, %v2638_v46  ;;  %v2599_v46 = vsel %vm2355_vm10, %v2596_v22, %v2598_v55  ;;  %v3502_v22 = vld [vmem:[#allocation2 + $0x10] sm:$0xff]   ;;  %vm6786_vm3 = vmmov %vm6778_vm6 }
 0x294   : > { %v2899_v40 = vsel %vm6774_vm4, %v2875_v42, %v2694_v33  ;;  %v2757_v49 = vsel %vm6785_vm15, %v3502_v22, %v5929_v17  ;;  %vm6787_vm4 = vmmov %vm6779_vm14 }
 0x295   : > { %2709 = vrot.lane.b32.xlu0 %v2674_v62, %s3556_s15  ;;  %v2679_v62 = vshll.u32 %v6088_v52, 16 }
 0x296   : > { %2389 = vrot.lane.b32.xlu1 %v5523_v2, %s3550_s9  ;;  %v2493_v2 = vsel %vm2227_vm11, %v2488_v9, %v6039_v43 }
 0x297   : > { %2336 = vrot.lane.b32.xlu2 %v5533_v13, %s3549_s8  ;;  %v6109_v25 = vrot.slane %v2679_v62, 1 }
 0x299   : > { %v2617_v32 = vpop.permute.xlu2 %2616 }
 0x29a   : > { %v2343_v13 = vpop.permute.xlu1 %2342 }
 0x29b   : > { %v2767_v18 = vsel %vm6777_vm8, %v5376_v34, %v2343_v13  ;;  %vm6790_vm8 = vmmov %vm6782_vm13 }
 0x29c   : > { %v2791_v6 = vsel %vm6778_vm6, %v2767_v18, %v2396_v48  ;;  %vm6791_vm6 = vmmov %vm6783_vm0 }
 0x29d   : > { %2431 = vrot.lane.b32.xlu0 %v5898_v15, %s3551_s10 }
 0x29e   : > { %2558 = vrot.lane.b32.xlu1 %v2493_v2, %s3554_s13 }
 0x29f   : > { %v2731_v5 = vpop.permute.xlu0 %2730  ;;  %2746 = vrot.lane.b32.xlu2 %v2723_v26, %s3555_s14 }
 0x2a0   : > { %v2923_v23 = vsel %vm6775_vm12, %v2899_v40, %v2731_v5  ;;  %vm6788_vm12 = vmmov %vm6780_vm7 }
 0x2a1   : > { %3276 = vmatmul.msk.bf16.gmra.mxu1 %vm6776_vm1, %v2923_v23  ;;  %v2386_v29 = vpop.permute.xlu2 %2385  ;;  %v2152_v23 = vld [vmem:[#allocation2 + $0x60] sm:$0x1]  ;;  %vm6789_vm1 = vmmov %vm6781_vm9 }
 0x2a2   : > { %v2565_v33 = vpop.permute.xlu1 %2564  ;;  %v2781_v42 = vsel %vm6786_vm3, %v2757_v49, %v2386_v29 }
 0x2a5   : > { %2643 = vrot.lane.b32.xlu0 %v5376_v34, %s3552_s11 }
 0x2a6   : > { %2699 = vrot.lane.b32.xlu1 %v5472_v20, %s3556_s15  ;;  %v2538_v20 = vshll.u32 %v6070_v24, 16 }
 0x2a7   : > { %v2438_v37 = vpop.permute.xlu0 %2437  ;;  %2610 = vrot.lane.b32.xlu2 %v2587_v56, %s3553_s12  ;;  %v6132_v56 = vld [vmem:[#allocation2 + $0x3c] sm:$0xff]  }
 0x2a8   : > { %v2815_v41 = vsel %vm6779_vm14, %v2791_v6, %v2438_v37  ;;  %v6085_v48 = vrot.slane %v2538_v20, 1  ;;  %v2225_v37 = vunpack.c.l.b16 %v2152_v23  ;;  %vm6792_vm14 = vmmov %vm6784_vm2 }
 0x2a9   : > { %v2555_v16 = vpop.permute.xlu2 %2554  ;;  %v2839_v8 = vsel %vm6780_vm7, %v2815_v41, %v2565_v33  ;;  %vm6793_vm7 = vmmov %vm6785_vm15 }
 0x2aa   : > { %v2226_v41 = vpack.c.b16 %v2225_v37, %v2225_v37  ;;  %vm6798_vm15 = vmmov %vm6790_vm8 }
 0x2ad   : > { %2348 = vrot.lane.b32.xlu0 %v5634_v51, %s3549_s8  ;;  %v2536_v51 = vor.u32 %v2534_v45, %v6004_v58 }
 0x2ae   : > { %2401 = vrot.lane.b32.xlu1 %v5675_v7, %s3550_s9  ;;  %v2863_v7 = vsel %vm1218_vm5, %v2839_v8, %v2617_v32  ;;  %v2675_v32 = vshrl.u32 %v6001_v36, 16 }
 0x2af   : > { %v2650_v15 = vpop.permute.xlu0 %2649  ;;  %2736 = vrot.lane.b32.xlu2 %v5581_v12, %s3555_s14  ;;  %v2541_v12 = vsel %vm2227_vm11, %v2536_v51, %v6085_v48 }
 0x2b0   : > { %v2706_v34 = vpop.permute.xlu1 %2705  ;;  %v2887_v50 = vsel %vm6781_vm9, %v2863_v7, %v2650_v15  ;;  %v2677_v9 = vor.u32 %v2675_v32, %v6020_v59  ;;  %v2724_v59 = vrot.slane %v6088_v52, 1  ;;  %v2588_v15 = vrot.slane %v6132_v56, 1  ;;  %vm6794_vm9 = vmmov %vm6786_vm3 }
 0x2b1   : > { %v2696_v31 = vpop.permute.xlu2 %2695  ;;  %v2911_v58 = vsel %vm6782_vm13, %v2887_v50, %v2706_v34  ;;  %v2157_v34 = vld [vmem:[#allocation2 + $0x6c] sm:$0x1]  ;;  %vm6795_vm13 = vmmov %vm6787_vm4 }
 0x2b2   : > { %v2682_v2 = vsel %vm2227_vm11, %v2677_v9, %v6109_v25  ;;  %v2725_v29 = vsel %vm2355_vm10, %v2722_v35, %v2724_v59  ;;  %v2498_v35 = vshll.u32 %v6132_v56, 16  ;;  %v2448_v51 = vunpack.c.l.b16 %v2157_v34  ;;  %vm6799_vm3 = vmmov %vm6791_vm6 }
 0x2b4   : > { %v6151_v45 = vrot.slane %v2498_v35, 1 }
 0x2b5   : > { %2570 = vrot.lane.b32.xlu0 %v2541_v12, %s3554_s13 }
 0x2b6   : > { %2622 = vrot.lane.b32.xlu1 %v2599_v46, %s3553_s12  ;;  %v2449_v46 = vpack.c.b16 %v2448_v51, %v2448_v51 }
 0x2b7   : > { %v2743_v53 = vpop.permute.xlu0 %2742  ;;  %2443 = vrot.lane.b32.xlu2 %v5976_v28, %s3551_s10 }
 0x2b8   : > { %v2935_v61 = vsel %vm6783_vm0, %v2911_v58, %v2743_v53  ;;  %v2428_v14 = vpop.permute.xlu1 %2427  ;;  %v2546_v53 = vshll.u32 %v2449_v46, 16  ;;  %vm6796_vm0 = vmmov %vm6788_vm12  ;;  %v2600_v23 = vrot.slane %v2449_v46, 1 }
 0x2b9   : > { %3282 = vmatmul.msk.bf16.vlgmr.msrb.gmra.mxu3 %vm6784_vm2, %v2935_v61  ;;  %v2398_v4 = vpop.permute.xlu2 %2397  ;;  %v2805_v28 = vsel %vm6787_vm4, %v2781_v42, %v2428_v14  ;;  %vm6797_vm2 = vmmov %vm6789_vm1 }
 0x2ba   : > { %v2829_v17 = vsel %vm6788_vm12, %v2805_v28, %v2555_v16  ;;  %v2548_v49 = vrot.slane %v2546_v53, 1  ;;  %vm6800_vm4 = vmmov %vm6792_vm14 }
 0x2bb   : > { %vm6801_vm12 = vmmov %vm6793_vm7 }
 0x2bd   : > { %2338 = vrot.lane.b32.xlu0 %v5795_v47, %s3549_s8 }
 0x2be   : > { %2711 = vrot.lane.b32.xlu1 %v2682_v2, %s3556_s15 }
 0x2bf   : > { %v2607_v13 = vpop.permute.xlu0 %2606  ;;  %2655 = vrot.lane.b32.xlu2 %v6001_v36, %s3552_s11  ;;  %v2494_v36 = vshrl.u32 %v6022_v39, 16 }
 0x2c0   : > { %v2640_v26 = vpop.permute.xlu1 %2639  ;;  %v2853_v5 = vsel %vm1218_vm5, %v2829_v17, %v2607_v13 }
 0x2c1   : > { %v2619_v40 = vpop.permute.xlu2 %2618  ;;  %v2877_v47 = vsel %vm6789_vm1, %v2853_v5, %v2640_v26  ;;  %v2496_v8 = vor.u32 %v2494_v36, %v6039_v43  ;;  %vm6802_vm1 = vmmov %vm6794_vm9 }
 0x2c2   : > { %v2901_v18 = vsel %vm6790_vm8, %v2877_v47, %v2696_v31  ;;  %v2324_v31 = vshll.u32 %v2226_v41, 16  ;;  %vm6803_vm8 = vmmov %vm6795_vm13 }
 0x2c3   : > { %v2501_v7 = vsel %vm2227_vm11, %v2496_v8, %v6151_v45  ;;  %v2683_v8 = vshrl.u32 %v6088_v52, 16 }
 0x2c5   : > { %2748 = vrot.lane.b32.xlu0 %v2725_v29, %s3555_s14  ;;  %v3503_v29 = vld [vmem:[#allocation2 + $0x18] sm:$0xff]  }
 0x2c6   : > { %2433 = vrot.lane.b32.xlu1 %v6022_v39, %s3551_s10  ;;  %v2326_v39 = vrot.slane %v2324_v31, 1 }
 0x2c7   : > { %v2733_v33 = vpop.permute.xlu0 %2732  ;;  %2391 = vrot.lane.b32.xlu2 %v5783_v54, %s3550_s9  ;;  %v2589_v54 = vsel %vm2355_vm10, %v2586_v60, %v2588_v15 }
 0x2c8   : > { %v2345_v16 = vpop.permute.xlu1 %2344  ;;  %v2925_v6 = vsel %vm6791_vm6, %v2901_v18, %v2733_v33  ;;  %v2327_v58 = vsel %vm2227_vm11, %v5915_v57, %v2326_v39  ;;  %v2162_v57 = vld [vmem:[#allocation2 + $0x78] sm:$0x1]  ;;  %vm6804_vm6 = vmmov %vm6796_vm0 }
 0x2c9   : > { %3277 = vmatmul.msk.bf16.gmra.mxu1 %vm6792_vm14, %v2925_v6  ;;  %v2708_v20 = vpop.permute.xlu2 %2707  ;;  %v2769_v60 = vsel %vm6793_vm7, %v5415_v11, %v2345_v16  ;;  %v2660_v13 = vunpack.c.l.b16 %v2162_v57  ;;  %vm6805_vm14 = vmmov %vm6797_vm2 }
 0x2ca   : > { %v2793_v62 = vsel %vm6794_vm9, %v2769_v60, %v2398_v4  ;;  %v2542_v4 = vshrl.u32 %v6070_v24, 16  ;;  %vm6806_vm7 = vmmov %vm6798_vm15 }
 0x2cb   : > { %v2661_v47 = vpack.c.b16 %v2660_v13, %v2660_v13  ;;  %vm6807_vm9 = vmmov %vm6799_vm3 }
 0x2cc   : > { %v2544_v9 = vor.u32 %v2542_v4, %v6085_v48 }
 0x2cd   : > { %2612 = vrot.lane.b32.xlu0 %v2589_v54, %s3553_s12  ;;  %v2687_v18 = vshll.u32 %v2661_v47, 16 }
 0x2ce   : > { %2645 = vrot.lane.b32.xlu1 %v5415_v11, %s3552_s11 }
 0x2cf   : > { %v2440_v43 = vpop.permute.xlu0 %2439  ;;  %2560 = vrot.lane.b32.xlu2 %v2501_v7, %s3554_s13  ;;  %v2689_v34 = vrot.slane %v2687_v18, 1 }
 0x2d0   : > { %v2567_v50 = vpop.permute.xlu1 %2566  ;;  %v2817_v61 = vsel %vm6795_vm13, %v2793_v62, %v2440_v43  ;;  %vm6808_vm13 = vmmov %vm6800_vm4 }
 0x2d1   : > { %v2430_v12 = vpop.permute.xlu2 %2429  ;;  %v2841_v11 = vsel %vm6796_vm0, %v2817_v61, %v2567_v50  ;;  %vm6810_vm0 = vmmov %vm6802_vm1 }
 0x2d2   : > { %v2865_v42 = vsel %vm1218_vm5, %v2841_v11, %v2619_v40 }
 0x2d5   : > { %2738 = vrot.lane.b32.xlu0 %v5843_v44, %s3555_s14  ;;  %v2379_v44 = vrot.slane %v2226_v41, 1  ;;  %v2726_v41 = vrot.slane %v2661_v47, 1 }
 0x2d6   : > { %2350 = vrot.lane.b32.xlu1 %v2327_v58, %s3549_s8  ;;  %v3064_v58 = vld [vmem:[%s3630_s7 + $0x38] sm:$0xff] }
 0x2d7   : > { %v2652_v14 = vpop.permute.xlu0 %2651  ;;  %2701 = vrot.lane.b32.xlu2 %v5770_v27, %s3556_s15  ;;  %v2549_v27 = vsel %vm2227_vm11, %v2544_v9, %v2548_v49  ;;  %v2380_v2 = vsel %vm2355_vm10, %v5648_v10, %v2379_v44  ;;  %v2601_v10 = vsel %vm2355_vm10, %v2598_v55, %v2600_v23  ;;  %v2727_v55 = vsel %vm2355_vm10, %v2724_v59, %v2726_v41  ;;  %v3065_v9 = vld [vmem:[%s3630_s7 + $0x40] sm:$0xff] }
 0x2d8   : > { %v2335_v32 = vpop.permute.xlu1 %2334  ;;  %v2889_v28 = vsel %vm6797_vm2, %v2865_v42, %v2652_v14  ;;  %vm6812_vm2 = vmmov %vm6804_vm6 }
 0x2d9   : > { %v2642_v22 = vpop.permute.xlu2 %2641  ;;  %v2913_v26 = vsel %vm6798_vm15, %v2889_v28, %v2708_v20  ;;  %v2759_v37 = vsel %vm6801_vm12, %v3503_v29, %v2335_v32  ;;  %vm6813_vm15 = vmmov %vm6805_vm14  ;;  %v3504_v28 = vld [vmem:[#allocation2 + $0x20] sm:$0xff]  }
 0x2dd   : > { %2445 = vrot.lane.b32.xlu0 %v6070_v24, %s3551_s10  ;;  %v2685_v24 = vor.u32 %v2683_v8, %v6109_v25  ;;  %v3067_v8 = vld [vmem:[%s3630_s7 + $0x50] sm:$0xff] }
 0x2de   : > { %2572 = vrot.lane.b32.xlu1 %v2549_v27, %s3554_s13 }
 0x2df   : > { %v2388_v17 = vpop.permute.xlu0 %2387  ;;  %2403 = vrot.lane.b32.xlu2 %v2380_v2, %s3550_s9  ;;  %v2690_v54 = vsel %vm2227_vm11, %v2685_v24, %v2689_v34 }
 0x2e0   : > { %v2745_v48 = vpop.permute.xlu1 %2744  ;;  %v2783_v33 = vsel %vm6802_vm1, %v2759_v37, %v2388_v17  ;;  %vm6817_vm1 = vmmov %vm6808_vm13 }
 0x2e1   : > { %v2347_v5 = vpop.permute.xlu2 %2346  ;;  %v2937_v40 = vsel %vm6799_vm3, %v2913_v26, %v2745_v48  ;;  %v2807_v6 = vsel %vm6803_vm8, %v2783_v33, %v2430_v12  ;;  %v2591_v12 = vsel %vm2355_vm10, %v2588_v15, %v2590_v1  ;;  %vm6811_vm10 = vmmov %vm6803_vm8 }
 0x2e2   : > { %3283 = vmatmul.msk.bf16.gmra.mxu3 %vm6800_vm4, %v2937_v40  ;;  %vm6815_vm4 = vmmov %vm6806_vm7 }
 0x2e5   : > { %2657 = vrot.lane.b32.xlu0 %v6088_v52, %s3552_s11 }
 0x2e6   : > { %2340 = vrot.lane.b32.xlu1 %v5958_v38, %s3549_s8  ;;  %s3447_s8 = smul.u32 24, %s3623_s25 }
 0x2e7   : > { %v2557_v16 = vpop.permute.xlu0 %2556  ;;  %2624 = vrot.lane.b32.xlu2 %v2601_v10, %s3553_s12 }
 0x2e8   : > { %v2609_v36 = vpop.permute.xlu1 %2608  ;;  %v2831_v35 = vsel %vm6804_vm6, %v2807_v6, %v2557_v16  ;;  %v3066_v16 = vld [vmem:[%s3630_s7 + $0x48] sm:$0xff] }
 0x2e9   : > { %v2569_v20 = vpop.permute.xlu2 %2568  ;;  %v2855_v38 = vsel %vm1218_vm5, %v2831_v35, %v2609_v36 }
 0x2ea   : > { %v2879_v51 = vsel %vm6805_vm14, %v2855_v38, %v2642_v22  ;;  %vm6820_vm14 = vmmov %vm6810_vm0 }
 0x2ed   : > { %2393 = vrot.lane.b32.xlu0 %v5967_v63, %s3550_s9  ;;  %v2502_v63 = vshrl.u32 %v6132_v56, 16  ;;  %s3448_s9 = smul.u32 48, %s6892_s19 }
 0x2ee   : > { %2750 = vrot.lane.b32.xlu1 %v2727_v55, %s3555_s14 }
 0x2ef   : > { %v2698_v31 = vpop.permute.xlu0 %2697  ;;  %2713 = vrot.lane.b32.xlu2 %v2690_v54, %s3556_s15  ;;  %v2504_v59 = vor.u32 %v2502_v63, %v6151_v45  ;;  %v3505_v54 = vld [vmem:[#allocation2 + $0x50] sm:$0xff]  }
 0x2f0   : > { %v2903_v7 = vsel %vm6806_vm7, %v2879_v51, %v2698_v31  ;;  %v2735_v25 = vpop.permute.xlu1 %2734  ;;  %vm6821_vm7 = vmmov %vm6811_vm10 }
 0x2f1   : > { %v2337_v43 = vpop.permute.xlu2 %2336  ;;  %v2927_v52 = vsel %vm6807_vm9, %v2903_v7, %v2735_v25  ;;  %v2509_v50 = vsel %vm2227_vm11, %v2504_v59, %v5458_v21  ;;  %vm6809_vm11 = vmmov %vm6801_vm12 }
 0x2f2   : > { %3278 = vmatmul.msk.bf16.gmra.mxu1 %vm6808_vm13, %v2927_v52  ;;  %v2771_v21 = vsel %vm6809_vm11, %v5698_v19, %v2347_v5  ;;  %vm6814_vm3 = vmmov %vm6809_vm11 }
 0x2f3   : > { %vm6816_vm12 = vmmov %vm6807_vm9 }
 0x2f4   : > { %vm6818_vm8 = vmmov %vm6814_vm3 }
 0x2f5   : > { %2562 = vrot.lane.b32.xlu0 %v2509_v50, %s3554_s13  ;;  %v2761_v27 = vsel %vm6818_vm8, %v3504_v28, %v2337_v43  ;;  %vm6819_vm6 = vmmov %vm6814_vm3 }
 0x2f6   : > { %2614 = vrot.lane.b32.xlu1 %v2591_v12, %s3553_s12  ;;  %s258_s12 = sadd.s32 %s3448_s9, %s3447_s8  ;;  %vm6822_vm9 = vmmov %vm6812_vm2 }
 0x2f7   : > { %v2400_v39 = vpop.permute.xlu0 %2399  ;;  %2435 = vrot.lane.b32.xlu2 %v6132_v56, %s3551_s10  ;;  %v6239_v56 = vld [vmem:[%s6413_s4] ss:$0 sm:$0xff]  ;;  %s3237_s19 = sshll.u32 %s258_s12, 3  ;;  %vm6823_vm13 = vmmov %vm6813_vm15 }
 0x2f8   : > { %v2442_v46 = vpop.permute.xlu1 %2441  ;;  %v2795_v30 = vsel %vm6810_vm0, %v2771_v21, %v2400_v39  ;;  %vm6824_vm11 = vmmov %vm6815_vm4 }
 0x2f9   : > { %v2747_v60 = vpop.permute.xlu2 %2746  ;;  %v2819_v15 = vsel %vm6811_vm10, %v2795_v30, %v2442_v46  ;;  %vm6825_vm0 = vmmov %vm6816_vm12  ;;  %v3506_v30 = vld [vmem:[#allocation2 + $0x28] sm:$0xff]  }
 0x2fa   : > { %vm6826_vm10 = vmmov %vm6817_vm1 }
 0x2fb   : > { %vm6833_vm8 = vmmov %vm6823_vm13 }
 0x2fd   : > { %2703 = vrot.lane.b32.xlu0 %v5995_v0, %s3556_s15 }
 0x2fe   : > { %2740 = vrot.lane.b32.xlu1 %v5984_v3, %s3555_s14  ;;  %v2843_v3 = vsel %vm6812_vm2, %v2819_v15, %v2569_v20  ;;  %s6249_s14 = scalar_lea.vmem %s6414_s5, %s3237_s19  ;;  %vm6827_vm2 = vmmov %vm6814_vm3 }
 0x2ff   : > { %v2621_v1 = vpop.permute.xlu0 %2620  ;;  %2647 = vrot.lane.b32.xlu2 %v5698_v19, %s3552_s11 }
 0x300   : > { %v2654_v45 = vpop.permute.xlu1 %2653  ;;  %v2867_v61 = vsel %vm1218_vm5, %v2843_v3, %v2621_v1 }
 0x301   : > { %v2611_v62 = vpop.permute.xlu2 %2610  ;;  %v2891_v14 = vsel %vm6813_vm15, %v2867_v61, %v2654_v45  ;;  %vm6828_vm15 = vmmov %vm6827_vm2 }
 0x302   : > { %v3004_v0 = vpop.f32.mrf.mxu1 }
 0x303   : > { %v3005_v53 = vadd.f32 %v6239_v56, %v3004_v0  ;;  %v3078_v0 = vld [vmem:[%s3630_s7 + $0xa8] sm:$0xff] }
 0x305   : > { %v3088_v19 = vadd.f32 %v3064_v58, %v3005_v53 }
 0x307   : > { %3112 = vst.msk [vmem:[%s6249_s14] sm:$0xff] %vm6814_vm3, %v3088_v19  ;;  %v2710_v32 = vpop.permute.xlu0 %2709  ;;  %vm6829_vm3 = vmmov %vm6827_vm2 }
 0x308   : > { %v2915_v11 = vsel %vm6815_vm4, %v2891_v14, %v2710_v32  ;;  %v2390_v22 = vpop.permute.xlu1 %2389  ;;  %vm6830_vm4 = vmmov %vm6820_vm14 }
 0x309   : > { %v2939_v4 = vsel %vm6816_vm12, %v2915_v11, %v2747_v60  ;;  %v2737_v49 = vpop.permute.xlu2 %2736  ;;  %v2785_v13 = vsel %vm6820_vm14, %v2761_v27, %v2390_v22  ;;  %vm6831_vm12 = vmmov %vm6821_vm7 }
 0x30a   : > { %v3006_v44 = vpop.f32.mrf.mxu1  ;;  %3284 = vmatmul.msk.bf16.gmra.mxu3 %vm6817_vm1, %v2939_v4  ;;  %vm6832_vm1 = vmmov %vm6822_vm9  ;;  %v3079_v4 = vld [vmem:[%s3630_s7 + $0xb0] sm:$0xff] }
 0x30b   : > { %v3007_v57 = vadd.f32 %v6239_v56, %v3006_v44  ;;  %vm6835_vm14 = vmmov %vm6825_vm0 }
 0x30d   : > { %v3089_v42 = vadd.f32 %v3065_v9, %v3007_v57  ;;  %v3068_v57 = vld [vmem:[%s3630_s7 + $0x58] sm:$0xff] }
 0x30f   : > { %3113 = vst.msk [vmem:[%s6249_s14 + $0x8] sm:$0xff] %vm6819_vm6, %v3089_v42  ;;  %v2432_v2 = vpop.permute.xlu0 %2431  ;;  %vm6834_vm6 = vmmov %vm6824_vm11 }
 0x310   : > { %v2559_v17 = vpop.permute.xlu1 %2558  ;;  %v2809_v48 = vsel %vm6821_vm7, %v2785_v13, %v2432_v2  ;;  %vm6836_vm7 = vmmov %vm6827_vm2 }
 0x311   : > { %v2833_v26 = vsel %vm6822_vm9, %v2809_v48, %v2559_v17  ;;  %v2444_v5 = vpop.permute.xlu2 %2443  ;;  %vm6837_vm9 = vmmov %vm6826_vm10 }
 0x312   : > { %v2857_v23 = vsel %vm1218_vm5, %v2833_v26, %v2611_v62 }
 0x317   : > { %v2644_v40 = vpop.permute.xlu0 %2643 }
 0x318   : > { %v2881_v47 = vsel %vm6823_vm13, %v2857_v23, %v2644_v40  ;;  %v2700_v29 = vpop.permute.xlu1 %2699  ;;  %vm6838_vm13 = vmmov %vm6830_vm4 }
 0x319   : > { %v2905_v37 = vsel %vm6824_vm11, %v2881_v47, %v2700_v29  ;;  %v2656_v10 = vpop.permute.xlu2 %2655  ;;  %vm6839_vm11 = vmmov %vm6831_vm12 }
 0x31a   : > { %v2929_v33 = vsel %vm6825_vm0, %v2905_v37, %v2737_v49  ;;  %vm6840_vm0 = vmmov %vm6832_vm1 }
 0x31b   : > { %3279 = vmatmul.msk.bf16.gmra.mxu1 %vm6826_vm10, %v2929_v33  ;;  %vm6841_vm10 = vmmov %vm6827_vm2  ;;  %v3507_v33 = vld [vmem:[#allocation2 + $0x58] sm:$0xff]  }
 0x31e   : > { %v3009_v18 = vpop.f32.mrf.mxu1 }
 0x31f   : > { %v3010_v6 = vadd.f32 %v6239_v56, %v3009_v18  ;;  %v2349_v36 = vpop.permute.xlu0 %2348 }
 0x320   : > { %v2402_v35 = vpop.permute.xlu1 %2401  ;;  %v2773_v31 = vsel %vm6828_vm15, %v3505_v54, %v2349_v36  ;;  %vm6843_vm15 = vmmov %vm6834_vm6 }
 0x321   : > { %v3090_v20 = vadd.f32 %v3066_v16, %v3010_v6  ;;  %v2392_v24 = vpop.permute.xlu2 %2391  ;;  %v2797_v7 = vsel %vm6830_vm4, %v2773_v31, %v2402_v35  ;;  %vm6845_vm4 = vmmov %vm6836_vm7  ;;  %v3508_v31 = vld [vmem:[#allocation2 + $0x30] sm:$0xff]  }
 0x322   : > { %v2821_v25 = vsel %vm6831_vm12, %v2797_v7, %v2444_v5  ;;  %vm6846_vm12 = vmmov %vm6837_vm9  ;;  %v3069_v5 = vld [vmem:[%s3630_s7 + $0x60] sm:$0xff] }
 0x323   : > { %3114 = vst.msk [vmem:[%s6249_s14 + $0x10] sm:$0xff] %vm6827_vm2, %v3090_v20  ;;  %vm6842_vm2 = vmmov %vm6833_vm8 }
 0x326   : > { %v3011_v41 = vpop.f32.mrf.mxu1 }
 0x327   : > { %v3012_v34 = vadd.f32 %v6239_v56, %v3011_v41  ;;  %v2571_v38 = vpop.permute.xlu0 %2570 }
 0x328   : > { %v2623_v55 = vpop.permute.xlu1 %2622  ;;  %v2845_v43 = vsel %vm6832_vm1, %v2821_v25, %v2571_v38  ;;  %vm6847_vm1 = vmmov %vm6845_vm4 }
 0x329   : > { %v3091_v51 = vadd.f32 %v3067_v8, %v3012_v34  ;;  %v2561_v59 = vpop.permute.xlu2 %2560  ;;  %v2869_v50 = vsel %vm1218_vm5, %v2845_v43, %v2623_v55 }
 0x32a   : > { %v2893_v12 = vsel %vm6833_vm8, %v2869_v50, %v2656_v10  ;;  %vm6848_vm8 = vmmov %vm6847_vm1 }
 0x32b   : > { %3115 = vst.msk [vmem:[%s6249_s14 + $0x18] sm:$0xff] %vm6829_vm3, %v3091_v51  ;;  %vm6844_vm3 = vmmov %vm6835_vm14 }
 0x32f   : > { %v2339_v63 = vpop.permute.xlu0 %2338 }
 0x330   : > { %v2712_v52 = vpop.permute.xlu1 %2711  ;;  %v2763_v1 = vsel %vm6836_vm7, %v3506_v30, %v2339_v63  ;;  %vm6851_vm7 = vmmov %vm6839_vm11  ;;  %v3080_v63 = vld [vmem:[%s3630_s7 + $0xb8] sm:$0xff] }
 0x331   : > { %v2917_v39 = vsel %vm6834_vm6, %v2893_v12, %v2712_v52  ;;  %v2702_v15 = vpop.permute.xlu2 %2701  ;;  %v2787_v45 = vsel %vm6838_vm13, %v2763_v1, %v2392_v24  ;;  %vm6849_vm6 = vmmov %vm6847_vm1 }
 0x337   : > { %v2749_v46 = vpop.permute.xlu0 %2748 }
 0x338   : > { %v2434_v60 = vpop.permute.xlu1 %2433  ;;  %v2941_v21 = vsel %vm6835_vm14, %v2917_v39, %v2749_v46  ;;  %vm6850_vm14 = vmmov %vm6838_vm13 }
 0x339   : > { %3285 = vmatmul.msk.bf16.gmra.mxu3 %vm6837_vm9, %v2941_v21  ;;  %v2811_v58 = vsel %vm6839_vm11, %v2787_v45, %v2434_v60  ;;  %v2404_v44 = vpop.permute.xlu2 %2403  ;;  %vm6852_vm9 = vmmov %vm6840_vm0  ;;  %v3081_v21 = vld [vmem:[%s3630_s7 + $0xc0] sm:$0xff] }
 0x33a   : > { %v2835_v19 = vsel %vm6840_vm0, %v2811_v58, %v2561_v59  ;;  %vm6853_vm13 = vmmov %vm6842_vm2 }
 0x33b   : > { %vm6854_vm11 = vmmov %vm6843_vm15 }
 0x33c   : > { %v3039_v62 = vpop.f32.mrf.mxu3  ;;  %vm6855_vm0 = vmmov %vm6844_vm3 }
 0x33d   : > { %v3040_v3 = vadd.f32 %v6239_v56, %v3039_v62 }
 0x33f   : > { %v3102_v53 = vadd.f32 %v3078_v0, %v3040_v3  ;;  %v2613_v61 = vpop.permute.xlu0 %2612  ;;  %v3070_v0 = vld [vmem:[%s3630_s7 + $0x68] sm:$0xff] }
 0x340   : > { %v2646_v14 = vpop.permute.xlu1 %2645  ;;  %v2859_v32 = vsel %vm1218_vm5, %v2835_v19, %v2613_v61 }
 0x341   : > { %3126 = vst.msk [vmem:[%s6249_s14 + $0x70] sm:$0xff] %vm6841_vm10, %v3102_v53  ;;  %v2883_v11 = vsel %vm6842_vm2, %v2859_v32, %v2646_v14  ;;  %v2625_v47 = vpop.permute.xlu2 %2624  ;;  %vm6856_vm10 = vmmov %vm6846_vm12 }
 0x342   : > { %v2907_v2 = vsel %vm6843_vm15, %v2883_v11, %v2702_v15  ;;  %vm6857_vm2 = vmmov %vm6847_vm1  ;;  %v3071_v11 = vld [vmem:[%s3630_s7 + $0x70] sm:$0xff] }
 0x343   : > { %vm6858_vm15 = vmmov %vm6850_vm14 }
 0x344   : > { %v3041_v22 = vpop.f32.mrf.mxu3 }
 0x345   : > { %v3042_v49 = vadd.f32 %v6239_v56, %v3041_v22 }
 0x346   : > { %v3014_v9 = vpop.f32.mrf.mxu1 }
 0x347   : > { %v3103_v42 = vadd.f32 %v3079_v4, %v3042_v49  ;;  %v3015_v28 = vadd.f32 %v6239_v56, %v3014_v9  ;;  %v2739_v27 = vpop.permute.xlu0 %2738 }
 0x348   : > { %v2351_v13 = vpop.permute.xlu1 %2350  ;;  %v2931_v17 = vsel %vm6844_vm3, %v2907_v2, %v2739_v27  ;;  %vm6859_vm3 = vmmov %vm6851_vm7 }
 0x349   : > { %3127 = vst.msk [vmem:[%s6249_s14 + $0x78] sm:$0xff] %vm6845_vm4, %v3103_v42  ;;  %v3092_v48 = vadd.f32 %v3068_v57, %v3015_v28  ;;  %3280 = vmatmul.msk.bf16.gmra.mxu1 %vm6846_vm12, %v2931_v17  ;;  %v2775_v10 = vsel %vm6848_vm8, %v3507_v33, %v2351_v13  ;;  %v2714_v20 = vpop.permute.xlu2 %2713  ;;  %vm6860_vm4 = vmmov %vm6852_vm9  ;;  %v3083_v28 = vld [vmem:[%s3630_s7 + $0xd0] sm:$0xff]  ;;  %v3072_v17 = vld [vmem:[%s3630_s7 + $0x78] sm:$0xff] }
 0x34a   : > { %v2799_v18 = vsel %vm6850_vm14, %v2775_v10, %v2404_v44  ;;  %vm6861_vm12 = vmmov %vm6847_vm1  ;;  %v3082_v44 = vld [vmem:[%s3630_s7 + $0xc8] sm:$0xff] }
 0x34b   : > { %3116 = vst.msk [vmem:[%s6249_s14 + $0x20] sm:$0xff] %vm6847_vm1, %v3092_v48  ;;  %vm6862_vm1 = vmmov %vm6853_vm13 }
 0x34c   : > { %vm6863_vm8 = vmmov %vm6854_vm11 }
 0x34d   : > { %vm6866_vm14 = vmmov %vm6856_vm10 }
 0x34e   : > { %v3016_v26 = vpop.f32.mrf.mxu1 }
 0x34f   : > { %v3017_v40 = vadd.f32 %v6239_v56, %v3016_v26  ;;  %v2446_v23 = vpop.permute.xlu0 %2445 }
 0x350   : > { %v2573_v29 = vpop.permute.xlu1 %2572  ;;  %v2823_v16 = vsel %vm6851_vm7, %v2799_v18, %v2446_v23  ;;  %vm6867_vm7 = vmmov %vm6857_vm2 }
 0x351   : > { %v3093_v37 = vadd.f32 %v3069_v5, %v3017_v40  ;;  %v2847_v35 = vsel %vm6852_vm9, %v2823_v16, %v2573_v29  ;;  %v2436_v54 = vpop.permute.xlu2 %2435  ;;  %vm6868_vm9 = vmmov %vm6857_vm2  ;;  %v3073_v40 = vld [vmem:[%s3630_s7 + $0x80] sm:$0xff] }
 0x352   : > { %v2871_v41 = vsel %vm1218_vm5, %v2847_v35, %v2625_v47  ;;  %v3085_v16 = vld [vmem:[%s3630_s7 + $0xe0] sm:$0xff]  ;;  %v3074_v35 = vld [vmem:[%s3630_s7 + $0x88] sm:$0xff] }
 0x353   : > { %3117 = vst.msk [vmem:[%s6249_s14 + $0x28] sm:$0xff] %vm6849_vm6, %v3093_v37  ;;  %vm6865_vm6 = vmmov %vm6857_vm2  ;;  %v3084_v37 = vld [vmem:[%s3630_s7 + $0xd8] sm:$0xff] }
 0x357   : > { %v2658_v6 = vpop.permute.xlu0 %2657 }
 0x358   : > { %v2341_v36 = vpop.permute.xlu1 %2340  ;;  %v2895_v8 = vsel %vm6853_vm13, %v2871_v41, %v2658_v6  ;;  %vm6869_vm13 = vmmov %vm6857_vm2 }
 0x359   : > { %v2919_v24 = vsel %vm6854_vm11, %v2895_v8, %v2714_v20  ;;  %v2765_v51 = vsel %vm6857_vm2, %v3508_v31, %v2341_v36  ;;  %v2648_v30 = vpop.permute.xlu2 %2647  ;;  %vm6870_vm11 = vmmov %vm6857_vm2  ;;  %v3086_v31 = vld [vmem:[%s3630_s7 + $0xe8] sm:$0xff] }
 0x35f   : > { %v2394_v34 = vpop.permute.xlu0 %2393 }
 0x360   : > { %v2751_v38 = vpop.permute.xlu1 %2750  ;;  %v2789_v7 = vsel %vm6858_vm15, %v2765_v51, %v2394_v34 }
 0x361   : > { %v2943_v55 = vsel %vm6855_vm0, %v2919_v24, %v2751_v38  ;;  %v2813_v50 = vsel %vm6859_vm3, %v2789_v7, %v2436_v54  ;;  %v3075_v38 = vld [vmem:[%s3630_s7 + $0x90] sm:$0xff] }
 0x362   : > { %3286 = vmatmul.msk.bf16.gmra.mxu3 %vm6856_vm10, %v2943_v55 }
 0x365   : > { %v3044_v25 = vpop.f32.mrf.mxu3 }
 0x366   : > { %v3045_v43 = vadd.f32 %v6239_v56, %v3044_v25 }
 0x367   : > { %v2563_v52 = vpop.permute.xlu0 %2562 }
 0x368   : > { %v3104_v59 = vadd.f32 %v3080_v63, %v3045_v43  ;;  %v2615_v12 = vpop.permute.xlu1 %2614  ;;  %v2837_v39 = vsel %vm6860_vm4, %v2813_v50, %v2563_v52  ;;  %v3087_v63 = vld [vmem:[%s3630_s7 + $0xf0] sm:$0xff] }
 0x369   : > { %v2861_v46 = vsel %vm1218_vm5, %v2837_v39, %v2615_v12  ;;  %vm6864_vm5 = vmmov %vm6855_vm0 }
 0x36a   : > { %3128 = vst.msk [vmem:[%s6249_s14 + $0x80] sm:$0xff] %vm6861_vm12, %v3104_v59  ;;  %v2885_v45 = vsel %vm6862_vm1, %v2861_v46, %v2648_v30  ;;  %vm6871_vm0 = vmmov %vm6857_vm2  ;;  %v3076_v59 = vld [vmem:[%s3630_s7 + $0x98] sm:$0xff] }
 0x36b   : > { %vm6872_vm10 = vmmov %vm6871_vm0 }
 0x36c   : > { %vm6873_vm2 = vmmov %vm6871_vm0 }
 0x36d   : > { %v3046_v60 = vpop.f32.mrf.mxu3  ;;  %vm6874_vm15 = vmmov %vm6871_vm0 }
 0x36e   : > { %v3047_v1 = vadd.f32 %v6239_v56, %v3046_v60  ;;  %vm6875_vm3 = vmmov %vm6871_vm0  ;;  %v3077_v60 = vld [vmem:[%s3630_s7 + $0xa0] sm:$0xff] }
 0x36f   : > { %v2704_v15 = vpop.permute.xlu0 %2703  ;;  %v3019_v62 = vpop.f32.mrf.mxu1  ;;  %vm6876_vm4 = vmmov %vm6871_vm0 }
 0x370   : > { %v3105_v58 = vadd.f32 %v3081_v21, %v3047_v1  ;;  %v2909_v3 = vsel %vm6863_vm8, %v2885_v45, %v2704_v15  ;;  %v3020_v53 = vadd.f32 %v6239_v56, %v3019_v62  ;;  %v2741_v61 = vpop.permute.xlu1 %2740  ;;  %vm6877_vm12 = vmmov %vm6871_vm0 }
 0x371   : > { %v2933_v19 = vsel %vm6864_vm5, %v2909_v3, %v2741_v61  ;;  %vm6878_vm1 = vmmov %vm6871_vm0 }
 0x372   : > { %3129 = vst.msk [vmem:[%s6249_s14 + $0x88] sm:$0xff] %vm6865_vm6, %v3105_v58  ;;  %v3094_v14 = vadd.f32 %v3070_v0, %v3020_v53  ;;  %3281 = vmatmul.msk.bf16.gmra.mxu1 %vm6866_vm14, %v2933_v19  ;;  %vm6879_vm8 = vmmov %vm6871_vm0 }
 0x373   : > { %vm6880_vm5 = vmmov %vm6871_vm0 }
 0x374   : > { %3118 = vst.msk [vmem:[%s6249_s14 + $0x30] sm:$0xff] %vm6867_vm7, %v3094_v14 }
 0x377   : > { %v3021_v32 = vpop.f32.mrf.mxu1 }
 0x378   : > { %v3022_v22 = vadd.f32 %v6239_v56, %v3021_v32 }
 0x37a   : > { %v3095_v4 = vadd.f32 %v3071_v11, %v3022_v22 }
 0x37c   : > { %3119 = vst.msk [vmem:[%s6249_s14 + $0x38] sm:$0xff] %vm6868_vm9, %v3095_v4 }
 0x38d   : > { %v3049_v49 = vpop.f32.mrf.mxu3 }
 0x38e   : > { %v3050_v9 = vadd.f32 %v6239_v56, %v3049_v49 }
 0x390   : > { %v3106_v57 = vadd.f32 %v3082_v44, %v3050_v9 }
 0x392   : > { %3130 = vst.msk [vmem:[%s6249_s14 + $0x90] sm:$0xff] %vm6869_vm13, %v3106_v57 }
 0x395   : > { %v3051_v42 = vpop.f32.mrf.mxu3 }
 0x396   : > { %v3052_v27 = vadd.f32 %v6239_v56, %v3051_v42 }
 0x398   : > { %v3107_v2 = vadd.f32 %v3083_v28, %v3052_v27  ;;  %v3024_v13 = vpop.f32.mrf.mxu1 }
 0x399   : > { %v3025_v48 = vadd.f32 %v6239_v56, %v3024_v13 }
 0x39a   : > { %3131 = vst.msk [vmem:[%s6249_s14 + $0x98] sm:$0xff] %vm6870_vm11, %v3107_v2 }
 0x39b   : > { %v3096_v26 = vadd.f32 %v3072_v17, %v3025_v48 }
 0x39d   : > { %3120 = vst.msk [vmem:[%s6249_s14 + $0x40] sm:$0xff] %vm6871_vm0, %v3096_v26 }
 0x3a0   : > { %v3026_v5 = vpop.f32.mrf.mxu1 }
 0x3a1   : > { %v3027_v23 = vadd.f32 %v6239_v56, %v3026_v5 }
 0x3a3   : > { %v3097_v47 = vadd.f32 %v3073_v40, %v3027_v23 }
 0x3a5   : > { %3121 = vst.msk [vmem:[%s6249_s14 + $0x48] sm:$0xff] %vm6872_vm10, %v3097_v47 }
 0x3bc   : > { %v3054_v29 = vpop.f32.mrf.mxu3 }
 0x3bd   : > { %v3055_v33 = vadd.f32 %v6239_v56, %v3054_v29 }
 0x3bf   : > { %v3108_v10 = vadd.f32 %v3084_v37, %v3055_v33 }
 0x3c1   : > { %3132 = vst.msk [vmem:[%s6249_s14 + $0xa0] sm:$0xff] %vm6873_vm2, %v3108_v10 }
 0x3c4   : > { %v3056_v18 = vpop.f32.mrf.mxu3 }
 0x3c5   : > { %v3057_v6 = vadd.f32 %v6239_v56, %v3056_v18 }
 0x3c6   : > { %v3029_v36 = vpop.f32.mrf.mxu1 }
 0x3c7   : > { %v3109_v20 = vadd.f32 %v3085_v16, %v3057_v6  ;;  %v3030_v41 = vadd.f32 %v6239_v56, %v3029_v36 }
 0x3c9   : > { %3133 = vst.msk [vmem:[%s6249_s14 + $0xa8] sm:$0xff] %vm6874_vm15, %v3109_v20  ;;  %v3098_v8 = vadd.f32 %v3074_v35, %v3030_v41 }
 0x3cb   : > { %3122 = vst.msk [vmem:[%s6249_s14 + $0x50] sm:$0xff] %vm6875_vm3, %v3098_v8 }
 0x3ce   : > { %v3031_v34 = vpop.f32.mrf.mxu1 }
 0x3cf   : > { %v3032_v24 = vadd.f32 %v6239_v56, %v3031_v34 }
 0x3d1   : > { %v3099_v55 = vadd.f32 %v3075_v38, %v3032_v24 }
 0x3d3   : > { %3123 = vst.msk [vmem:[%s6249_s14 + $0x58] sm:$0xff] %vm6876_vm4, %v3099_v55 }
 0x3e5   : > { %v3059_v54 = vpop.f32.mrf.mxu3 }
 0x3e6   : > { %v3060_v51 = vadd.f32 %v6239_v56, %v3059_v54 }
 0x3e8   : > { %v3110_v7 = vadd.f32 %v3086_v31, %v3060_v51 }
 0x3ea   : > { %3134 = vst.msk [vmem:[%s6249_s14 + $0xb0] sm:$0xff] %vm6877_vm12, %v3110_v7 }
 0x3ed   : > { %v3061_v25 = vpop.f32.mrf.mxu3 }
 0x3ee   : > { %v3062_v43 = vadd.f32 %v6239_v56, %v3061_v25 }
 0x3ef   : > { %v3034_v52 = vpop.f32.mrf.mxu1 }
 0x3f0   : > { %v3111_v50 = vadd.f32 %v3087_v63, %v3062_v43  ;;  %v3035_v12 = vadd.f32 %v6239_v56, %v3034_v52 }
 0x3f2   : > { %3135 = vst.msk [vmem:[%s6249_s14 + $0xb8] sm:$0xff] %vm6878_vm1, %v3111_v50  ;;  %v3100_v39 = vadd.f32 %v3076_v59, %v3035_v12 }
 0x3f4   : > { %3124 = vst.msk [vmem:[%s6249_s14 + $0x60] sm:$0xff] %vm6879_vm8, %v3100_v39 }
 0x3f7   : > { %v3036_v46 = vpop.f32.mrf.mxu1 }
 0x3f8   : > { %v3037_v21 = vadd.f32 %v6239_v56, %v3036_v46 }
 0x3fa   : > { %v3101_v30 = vadd.f32 %v3077_v60, %v3037_v21 }
 0x3fc   : > { %3125 = vst.msk [vmem:[%s6249_s14 + $0x68] sm:$0xff] %vm6880_vm5, %v3101_v30 }
 0x3fd PF: > { %s15_s22 = sadd.s32 1, %s3547_s22   ;;  %s6881_s18 = smov %s3539_s20 }
 0x3fe   : > { %p12_p7 = scmp.ge.s32.totalorder %s15_s22, 6   ;;  %s6882_s19 = smov %s3543_s21 }
 0x3ff   : > { %s6883_s20 = smov %s6886_s23  ;;  %s6884_s21 = smov %s6890_s24 }
 0x400   :  { %14 = sbr.rel (!%p12_p7) target bundleno = 3 (0x3), region = 70 }

</bundles_post_ra>
